<compile_context>
chip_gen: v7x
topology: tpu7x:2x2x1
jax: 0.10.0
libtpu: 0.0.40
codegen_flags: <defaults>
</compile_context>

<pallas_src>
import functools

import jax
import jax.numpy as jnp
from jax.experimental import pallas as pl
from jax.experimental.pallas import tpu as pltpu

IN_DIM, H1, H2, OUT_DIM = 784, 512, 256, 1


def _leaky_relu(x, slope=0.2):
    return jnp.maximum(x, slope * x)


def discriminator_kernel(x_ref, w1_ref, b1_ref, w2_ref, b2_ref, w3_ref, b3_ref, o_ref):
    # x tile is batch-major (tile_b, 784) f32; cast to bf16 for the MXU.
    x = x_ref[...].astype(jnp.bfloat16)

    # Layer 1: contract last dims of both operands (no transpose materialized):
    #   (512, 784) . (tile_b, 784) -> (512, tile_b), f32 accumulation on MXU.
    h1 = jax.lax.dot_general(
        w1_ref[...], x,
        dimension_numbers=(((1,), (1,)), ((), ())),
        preferred_element_type=jnp.float32) + b1_ref[...]
    h1 = _leaky_relu(h1).astype(jnp.bfloat16)            # act math in f32, store bf16

    # Layer 2: (256, 512) @ (512, tile_b) -> (256, tile_b)
    h2 = jnp.dot(w2_ref[...], h1, preferred_element_type=jnp.float32) + b2_ref[...]
    h2 = _leaky_relu(h2).astype(jnp.bfloat16)

    # Layer 3: (1, 256) @ (256, tile_b) -> (1, tile_b)  (lane-dense logits row)
    logits = jnp.dot(w3_ref[...], h2, preferred_element_type=jnp.float32) + b3_ref[...]
    o_ref[...] = jax.nn.sigmoid(logits).astype(o_ref.dtype)


@functools.partial(jax.jit, static_argnames=("tile_b",))
def discriminator_forward(img, params, *, tile_b=256):
    """img: (B, 784) float32. Returns (B, 1) float32 sigmoid probabilities."""
    w1, b1, w2, b2, w3, b3 = params
    B = img.shape[0]

    # Keep >= 2 grid steps when the batch permits (v7x: 2 TensorCores share a
    # "parallel" grid axis); never go below 128 lanes.
    tile_b = max(128, int(tile_b))
    while tile_b > 128 and B < 2 * tile_b:
        tile_b //= 2

    # Zero-pad ragged batches up to a tile multiple (sliced off below).
    Bp = pl.cdiv(B, tile_b) * tile_b
    x = img if Bp == B else jnp.pad(img, ((0, Bp - B), (0, 0)))

    grid = (Bp // tile_b,)

    flops = 2 * Bp * (IN_DIM * H1 + H1 * H2 + H2 * OUT_DIM)
    bytes_accessed = int(
        Bp * IN_DIM * 4                                            # img read once (f32)
        + sum(int(a.size) * a.dtype.itemsize for a in (w1, b1, w2, b2, w3, b3))
        + Bp * OUT_DIM * 4)                                        # output write

    out_t = pl.pallas_call(
        discriminator_kernel,
        out_shape=jax.ShapeDtypeStruct((OUT_DIM, Bp), jnp.float32),
        grid_spec=pltpu.PrefetchScalarGridSpec(
            num_scalar_prefetch=0,
            grid=grid,
            in_specs=[
                pl.BlockSpec((tile_b, IN_DIM), lambda i: (i, 0)),   # x tile (batch-major)
                pl.BlockSpec((H1, IN_DIM), lambda i: (0, 0)),       # W1 (resident, bf16)
                pl.BlockSpec((H1, 1), lambda i: (0, 0)),            # b1 (f32 column)
                pl.BlockSpec((H2, H1), lambda i: (0, 0)),           # W2
                pl.BlockSpec((H2, 1), lambda i: (0, 0)),            # b2
                pl.BlockSpec((OUT_DIM, H2), lambda i: (0, 0)),      # W3 row
                pl.BlockSpec((OUT_DIM, 1), lambda i: (0, 0)),       # b3
            ],
            out_specs=pl.BlockSpec((OUT_DIM, tile_b), lambda i: (0, i)),
        ),
        compiler_params=pltpu.CompilerParams(
            dimension_semantics=("parallel",),
        ),
        cost_estimate=pl.CostEstimate(
            flops=flops, transcendentals=Bp, bytes_accessed=bytes_accessed),
    )(x, w1, b1, w2, b2, w3, b3)

    # (1, Bp) lane-dense row -> (B, 1); transposing a single row is a reshape.
    return out_t[:, :B].T


def init_params(key):
    """Deterministic synthetic init. Weights in PyTorch (out, in) layout, bf16;
    biases as f32 column vectors."""
    ks = jax.random.split(key, 6)

    def lin(kw, kb, fan_in, fan_out):
        # PyTorch nn.Linear default: U(-1/sqrt(fan_in), 1/sqrt(fan_in))
        bound = 1.0 / jnp.sqrt(fan_in)
        w = jax.random.uniform(kw, (fan_out, fan_in), jnp.float32, -bound, bound)
        b = jax.random.uniform(kb, (fan_out, 1), jnp.float32, -bound, bound)
        return w.astype(jnp.bfloat16), b

    w1, b1 = lin(ks[0], ks[1], IN_DIM, H1)
    w2, b2 = lin(ks[2], ks[3], H1, H2)
    w3, b3 = lin(ks[4], ks[5], H2, OUT_DIM)
    return (w1, b1, w2, b2, w3, b3)


def reference_forward(img, params):
    """Pure-JAX reference mirroring the kernel's bf16-input / f32-accumulate numerics."""
    w1, b1, w2, b2, w3, b3 = params
    hp = jax.lax.Precision.HIGHEST

    def layer(x, w, b):
        return jnp.dot(x, w.astype(jnp.float32).T, precision=hp) + b.T

    x = img.astype(jnp.bfloat16).astype(jnp.float32)
    h = layer(x, w1, b1)
    h = jnp.maximum(h, 0.2 * h).astype(jnp.bfloat16).astype(jnp.float32)
    h = layer(h, w2, b2)
    h = jnp.maximum(h, 0.2 * h).astype(jnp.bfloat16).astype(jnp.float32)
    h = layer(h, w3, b3)
    return jax.nn.sigmoid(h)


if __name__ == "__main__":
    key = jax.random.PRNGKey(0)
    k_img, k_params = jax.random.split(key)
    params = init_params(k_params)

    # Main check: 2 grid steps of tile_b=256 (keeps both v7x TensorCores busy,
    # fills the 256-wide MXU on v6e/v7x).
    B = 512
    img = jax.random.normal(k_img, (B, IN_DIM), dtype=jnp.float32)
    out = jax.block_until_ready(discriminator_forward(img, params))
    ref = reference_forward(img, params)
    assert out.shape == (B, OUT_DIM)
    assert jnp.allclose(out, ref, atol=1e-3, rtol=1e-3), "mismatch vs reference (B=512)"

    # Ragged-batch check: non-multiple batch handled via zero-padding + slice.
    B2 = 200
    img2 = jax.random.normal(k_img, (B2, IN_DIM), dtype=jnp.float32)
    out2 = jax.block_until_ready(discriminator_forward(img2, params))
    ref2 = reference_forward(img2, params)
    assert out2.shape == (B2, OUT_DIM)
    assert jnp.allclose(out2, ref2, atol=1e-3, rtol=1e-3), "mismatch vs reference (B=200)"

    print("KERNEL_OK")
</pallas_src>

<mosaic_0001>
module attributes {stable_mosaic.version = 11 : i64} {
  func.func @discriminator_kernel(%arg0: i32, %arg1: memref<256x784xf32, #tpu.memory_space<vmem>>, %arg2: memref<512x784xbf16, #tpu.memory_space<vmem>>, %arg3: memref<512x1xf32, #tpu.memory_space<vmem>>, %arg4: memref<256x512xbf16, #tpu.memory_space<vmem>>, %arg5: memref<256x1xf32, #tpu.memory_space<vmem>>, %arg6: memref<1x256xbf16, #tpu.memory_space<vmem>>, %arg7: memref<1x1xf32, #tpu.memory_space<vmem>>, %arg8: memref<1x256xf32, #tpu.memory_space<vmem>>) attributes {dimension_semantics = [#tpu.dimension_semantics<parallel>], iteration_bounds = array<i64: 2>, scalar_prefetch = 0 : i64, scratch_operands = 0 : i64, tpu.core_type = #tpu.core_type<tc>, window_params = [{transform_indices = @transform_0, window_bounds = array<i64: 256, 784>}, {pipeline_mode = #tpu.pipeline_mode<synchronous>, transform_indices = @transform_1, window_bounds = array<i64: 512, 784>}, {pipeline_mode = #tpu.pipeline_mode<synchronous>, transform_indices = @transform_2, window_bounds = array<i64: 512, 1>}, {pipeline_mode = #tpu.pipeline_mode<synchronous>, transform_indices = @transform_3, window_bounds = array<i64: 256, 512>}, {pipeline_mode = #tpu.pipeline_mode<synchronous>, transform_indices = @transform_4, window_bounds = array<i64: 256, 1>}, {pipeline_mode = #tpu.pipeline_mode<synchronous>, transform_indices = @transform_5, window_bounds = array<i64: 1, 256>}, {pipeline_mode = #tpu.pipeline_mode<synchronous>, transform_indices = @transform_6, window_bounds = array<i64: 1, 1>}, {transform_indices = @transform_7, window_bounds = array<i64: 1, 256>}]} {
    %c0 = arith.constant 0 : index
    %c0_0 = arith.constant 0 : index
    %0 = vector.load %arg1[%c0, %c0_0] : memref<256x784xf32, #tpu.memory_space<vmem>>, vector<256x784xf32>
    %1 = arith.truncf %0 : vector<256x784xf32> to vector<256x784xbf16>
    %c0_1 = arith.constant 0 : index
    %c0_2 = arith.constant 0 : index
    %2 = vector.load %arg2[%c0_1, %c0_2] : memref<512x784xbf16, #tpu.memory_space<vmem>>, vector<512x784xbf16>
    %cst = arith.constant dense<0.000000e+00> : vector<512x256xf32>
    %3 = tpu.matmul %2, %1, %cst {dimension_numbers = #tpu.dot_dimension_numbers<[1], [1], [0], [0], [0, 0, 1, 0], [], []>} : vector<512x784xbf16>, vector<256x784xbf16>, vector<512x256xf32> -> vector<512x256xf32>
    %c0_3 = arith.constant 0 : index
    %c0_4 = arith.constant 0 : index
    %4 = vector.load %arg3[%c0_3, %c0_4] : memref<512x1xf32, #tpu.memory_space<vmem>>, vector<512x1xf32>
    %5 = vector.broadcast %4 : vector<512x1xf32> to vector<512x256xf32>
    %6 = arith.addf %3, %5 : vector<512x256xf32>
    %cst_5 = arith.constant 2.000000e-01 : f32
    %7 = vector.broadcast %cst_5 : f32 to vector<512x256xf32>
    %8 = arith.mulf %7, %6 : vector<512x256xf32>
    %9 = arith.maximumf %6, %8 : vector<512x256xf32>
    %10 = arith.truncf %9 : vector<512x256xf32> to vector<512x256xbf16>
    %c0_6 = arith.constant 0 : index
    %c0_7 = arith.constant 0 : index
    %11 = vector.load %arg4[%c0_6, %c0_7] : memref<256x512xbf16, #tpu.memory_space<vmem>>, vector<256x512xbf16>
    %cst_8 = arith.constant dense<0.000000e+00> : vector<256x256xf32>
    %12 = tpu.matmul %11, %10, %cst_8 {dimension_numbers = #tpu.dot_dimension_numbers<[1], [0], [0], [1], [0, 0, 1, 1], [], []>} : vector<256x512xbf16>, vector<512x256xbf16>, vector<256x256xf32> -> vector<256x256xf32>
    %c0_9 = arith.constant 0 : index
    %c0_10 = arith.constant 0 : index
    %13 = vector.load %arg5[%c0_9, %c0_10] : memref<256x1xf32, #tpu.memory_space<vmem>>, vector<256x1xf32>
    %14 = vector.broadcast %13 : vector<256x1xf32> to vector<256x256xf32>
    %15 = arith.addf %12, %14 : vector<256x256xf32>
    %cst_11 = arith.constant 2.000000e-01 : f32
    %16 = vector.broadcast %cst_11 : f32 to vector<256x256xf32>
    %17 = arith.mulf %16, %15 : vector<256x256xf32>
    %18 = arith.maximumf %15, %17 : vector<256x256xf32>
    %19 = arith.truncf %18 : vector<256x256xf32> to vector<256x256xbf16>
    %c0_12 = arith.constant 0 : index
    %c0_13 = arith.constant 0 : index
    %20 = vector.load %arg6[%c0_12, %c0_13] : memref<1x256xbf16, #tpu.memory_space<vmem>>, vector<1x256xbf16>
    %cst_14 = arith.constant dense<0.000000e+00> : vector<1x256xf32>
    %21 = tpu.matmul %20, %19, %cst_14 {dimension_numbers = #tpu.dot_dimension_numbers<[1], [0], [0], [1], [0, 0, 1, 1], [], []>} : vector<1x256xbf16>, vector<256x256xbf16>, vector<1x256xf32> -> vector<1x256xf32>
    %c0_15 = arith.constant 0 : index
    %c0_16 = arith.constant 0 : index
    %22 = vector.load %arg7[%c0_15, %c0_16] : memref<1x1xf32, #tpu.memory_space<vmem>>, vector<1x1xf32>
    %23 = vector.broadcast %22 : vector<1x1xf32> to vector<1x256xf32>
    %24 = arith.addf %21, %23 : vector<1x256xf32>
    %25 = arith.negf %24 : vector<1x256xf32>
    %26 = math.exp %25 : vector<1x256xf32>
    %cst_17 = arith.constant 1.000000e+00 : f32
    %27 = vector.broadcast %cst_17 : f32 to vector<1x256xf32>
    %28 = arith.addf %27, %26 : vector<1x256xf32>
    %29 = arith.divf %27, %28 : vector<1x256xf32>
    %c0_18 = arith.constant 0 : index
    %c0_19 = arith.constant 0 : index
    %30 = vector.load %arg8[%c0_18, %c0_19] : memref<1x256xf32, #tpu.memory_space<vmem>>, vector<1x256xf32>
    tpu.vector_store %arg8[%c0_18, %c0_19], %29 {strides = array<i32>} : memref<1x256xf32, #tpu.memory_space<vmem>>, vector<1x256xf32>,
    return
  }
  func.func @transform_0(%arg0: i32) -> (i32, i32) {
    %c0_i32 = arith.constant 0 : i32
    %c0_i32_0 = arith.constant 0 : i32
    return %arg0, %c0_i32 : i32, i32
  }
  func.func @transform_1(%arg0: i32) -> (i32, i32) {
    %c0_i32 = arith.constant 0 : i32
    %c0_i32_0 = arith.constant 0 : i32
    %c0_i32_1 = arith.constant 0 : i32
    return %c0_i32, %c0_i32_0 : i32, i32
  }
  func.func @transform_2(%arg0: i32) -> (i32, i32) {
    %c0_i32 = arith.constant 0 : i32
    %c0_i32_0 = arith.constant 0 : i32
    %c0_i32_1 = arith.constant 0 : i32
    return %c0_i32, %c0_i32_0 : i32, i32
  }
  func.func @transform_3(%arg0: i32) -> (i32, i32) {
    %c0_i32 = arith.constant 0 : i32
    %c0_i32_0 = arith.constant 0 : i32
    %c0_i32_1 = arith.constant 0 : i32
    return %c0_i32, %c0_i32_0 : i32, i32
  }
  func.func @transform_4(%arg0: i32) -> (i32, i32) {
    %c0_i32 = arith.constant 0 : i32
    %c0_i32_0 = arith.constant 0 : i32
    %c0_i32_1 = arith.constant 0 : i32
    return %c0_i32, %c0_i32_0 : i32, i32
  }
  func.func @transform_5(%arg0: i32) -> (i32, i32) {
    %c0_i32 = arith.constant 0 : i32
    %c0_i32_0 = arith.constant 0 : i32
    %c0_i32_1 = arith.constant 0 : i32
    return %c0_i32, %c0_i32_0 : i32, i32
  }
  func.func @transform_6(%arg0: i32) -> (i32, i32) {
    %c0_i32 = arith.constant 0 : i32
    %c0_i32_0 = arith.constant 0 : i32
    %c0_i32_1 = arith.constant 0 : i32
    return %c0_i32, %c0_i32_0 : i32, i32
  }
  func.func @transform_7(%arg0: i32) -> (i32, i32) {
    %c0_i32 = arith.constant 0 : i32
    %c0_i32_0 = arith.constant 0 : i32
    return %c0_i32, %arg0 : i32, i32
  }
}

</mosaic_0001>

<bundles_post_ra>
// kernel: discriminator_forward.1
= control target key start
LH: loop header
LB: loop body
LE: loop exit
PB: predicated region body
PF: predicated region fallthrough
CT: control target
= control target key end

     0   :  { %s9330_s0 = inlined_call_operand.vmem [shape: f32[512,784], index: 0, kind: input, shape index: {}]   ;;  %s9331_s1 = inlined_call_operand.vmem [shape: bf16[512,784], index: 1, kind: input, shape index: {}]   ;;  %s9332_s2 = inlined_call_operand.vmem [shape: f32[512,1], index: 2, kind: input, shape index: {}]   ;;  %s9333_s3 = inlined_call_operand.vmem [shape: bf16[256,512], index: 3, kind: input, shape index: {}]   ;;  %s9334_s4 = inlined_call_operand.vmem [shape: f32[256,1], index: 4, kind: input, shape index: {}]   ;;  %s9335_s5 = inlined_call_operand.vmem [shape: bf16[1,256], index: 5, kind: input, shape index: {}]   ;;  %s9336_s6 = inlined_call_operand.<no memory space> [shape: f32[1,1], index: 6, kind: input, shape index: {}]   ;;  %s9337_s7 = inlined_call_operand.hbm [shape: f32[1,512], index: 7, kind: output, shape index: {}]  }
   0x1   :  { %v12_v0 = vstv %s9336_s6 }
   0x2   :  { %13 = vst [vmem:[#allocation2] sm:$0x1] %v12_v0 }
   0x3   :  { %14 = vsyncpa [#allocation4], 0 }
   0x4   :  { %16 = vsyncpa [#allocation4 + $0x1], 0  ;;  %s7241_s26 = smov 0   ;;  %s7243_s27 = smov 0  }
   0x5   :  { %s7245_s28 = smov 0   ;;  %s7247_s29 = smov 0  }
   0x6 LB: > { %s5566_s6 = sadd.s32 4294967295, %s7193_s29   ;;  %s5567_s30 = sadd.s32 4294967294, %s7193_s29   ;;  %s7193_s29 = sphi %s7247_s29, %s9517_s29   ;;  %s7189_s28 = sphi %s7245_s28, %s9516_s28   ;;  %s7185_s27 = sphi %s7243_s27, %s9515_s27   ;;  %s7181_s26 = sphi %s7241_s26, %s9514_s26  }
   0x7   : > { %s7264_s8 = sadd.s32 1, %s7193_s29   ;;  %s181_s9 = sadd.s32 1, %s7189_s28 }
   0x8   : > { %s178_s10 = ssub.s32 %s7193_s29, %s7264_s8  ;;  %p191_p0 = scmp.ne.s32.totalorder %s7189_s28, %s7185_s27 }
   0x9   : > { %p179_p1 = scmp.eq.s32.totalorder %s178_s10, 0  ;;  %p192_p2 = scmp.eq.s32.totalorder %s5566_s6, 1 }
   0xa   : > { %p197_p3 = scmp.ne.s32.totalorder %s7185_s27, %s7181_s26  ;;  %p198_p4 = scmp.eq.s32.totalorder %s5567_s30, 1 }
   0xb   : > { %s7274_s11 = scalar_select %p179_p1, %s7189_s28, %s181_s9  }
   0xc   : > { %p7276_p5 = por %p192_p2, %p191_p0  ;;  %p7280_p6 = por %p198_p4, %p197_p3 }
   0xd   : > { %p5570_p7 = scmp.ge.s32.totalorder %s7193_s29, 1  ;;  %p244_p8 = scmp.lt.s32.totalorder %s7193_s29, 3 }
   0xf   : > { %p245_p9 = pnand %p5570_p7, %p244_p8 }
  0x11   : > { %248 = sbr.rel (%p245_p9) target bundleno = 1630 (0x65e), region = 48 }
  0x18   : > { %s7286_s14 = sshll.u32 %s5566_s6, 5  ;;  %v6709_v1 = vld [vmem:[%s9331_s1 + $0xc] ss:$28 sps:$4 sm:$0xff]   ;;  %vm2382_vm0 = vcmask 130048   ;;  %s274_s17 = sand.u32 1, %s7185_s27  }
  0x19   : > { %p278_p10 = scmp.lt.s32.totalorder %s7286_s14, 63  ;;  %2912 = vmatprep.mubr.bf16.mxu0 %v6709_v1  ;;  %s5571_s18 = sshll.u32 %s274_s17, 1 }
  0x1a   : > { %s9288_s23 = scalar_lea.hbm %s9337_s7, %s7286_s14  ;;  %s5494_s24 = scalar_lea.sflag [#allocation4], %s274_s17 }
  0x1b   : > { %s279_s15 = scalar_select %p278_p10, %s7286_s14, 63 }
  0x1c   : > { %s7197_s6 = smov [#allocation3]  }
  0x1d   : > { %s6663_s16 = smul.u32 56, %s279_s15  ;;  %s7135_s30 = sshll.u32 %s7197_s6, 4  ;;  %s7136_s30 = int_to_ptr.vmem [resolvable:$false] %s7135_s30 }
  0x1e   : > { %s7137_s9 = scalar_lea.vmem %s7136_s30, 64 }
  0x1f   : > { %s7296_s21 = scalar_lea.vmem %s9330_s0, %s6663_s16 }
  0x20   : > { %v289_v2 = vld [vmem:[%s7296_s21 + $0x18] sm:$0xff]  ;;  %v296_v3 = vld [vmem:[%s7296_s21 + $0x50] sm:$0xff]  ;;  %v295_v6 = vld [vmem:[%s7296_s21 + $0x48] sm:$0xff] }
  0x21   : > { %v288_v4 = vld [vmem:[%s7296_s21 + $0x10] sm:$0xff]  ;;  %v7301_v5 = vpack.c.bf16 %v296_v3, %v289_v2  ;;  %v287_v7 = vld [vmem:[%s7296_s21 + $0x8] sm:$0xff]  ;;  %v294_v8 = vld [vmem:[%s7296_s21 + $0x40] sm:$0xff] }
  0x22   : > { %v7306_v9 = vpack.c.bf16 %v295_v6, %v288_v4  ;;  %v511_v10 = vpack.c.bf16 %v294_v8, %v287_v7  ;;  %v286_v11 = vld [vmem:[%s7296_s21] sm:$0xff]  ;;  %v293_v12 = vld [vmem:[%s7296_s21 + $0x38] sm:$0xff]  ;;  %v303_v13 = vld [vmem:[%s7296_s21 + $0x88] sm:$0xff] }
  0x23   : > { %2880 = vmatprep.subr.bf16.mxu0 %v7301_v5  ;;  %v510_v14 = vpack.c.bf16 %v293_v12, %v286_v11  ;;  %v310_v15 = vld [vmem:[%s7296_s21 + $0xc0] sm:$0xff]  ;;  %v301_v17 = vld [vmem:[%s7296_s21 + $0x78] sm:$0xff]  ;;  %v308_v18 = vld [vmem:[%s7296_s21 + $0xb0] sm:$0xff] }
  0x24   : > { %2881 = vmatpush1.bf16.xpose.msra.mxu0 %v7306_v9  ;;  %2527 = vmatprep.subr.bf16.mxu1 %v511_v10  ;;  %v7314_v16 = vpack.c.bf16 %v310_v15, %v303_v13  ;;  %v302_v19 = vld [vmem:[%s7296_s21 + $0x80] sm:$0xff]  ;;  %v309_v20 = vld [vmem:[%s7296_s21 + $0xb8] sm:$0xff]  ;;  %v518_v21 = vpack.c.bf16 %v308_v18, %v301_v17  ;;  %v300_v22 = vld [vmem:[%s7296_s21 + $0x70] sm:$0xff] }
  0x25   : > { %2528 = vmatpush1.bf16.xpose.msra.mxu1 %v510_v14  ;;  %v307_v23 = vld [vmem:[%s7296_s21 + $0xa8] sm:$0xff]  ;;  %v317_v24 = vld [vmem:[%s7296_s21 + $0xf8] sm:$0xff]  ;;  %v324_v25 = vld [vmem:[%s7296_s21 + $0x130] sm:$0xff]  ;;  %v7327_v28 = vpack.c.bf16 %v309_v20, %v302_v19 }
  0x26   : > { %2882 = vmatprep.subr.bf16.mxu0 %v7314_v16  ;;  %2529 = vmatprep.subr.bf16.mxu1 %v518_v21  ;;  %v315_v26 = vld [vmem:[%s7296_s21 + $0xe8] sm:$0xff]  ;;  %v322_v27 = vld [vmem:[%s7296_s21 + $0x120] sm:$0xff]  ;;  %v517_v29 = vpack.c.bf16 %v307_v23, %v300_v22  ;;  %v7329_v30 = vpack.c.bf16 %v324_v25, %v317_v24  ;;  %v316_v32 = vld [vmem:[%s7296_s21 + $0xf0] sm:$0xff] }
  0x27   : > { %v525_v31 = vpack.c.bf16 %v322_v27, %v315_v26  ;;  %v323_v33 = vld [vmem:[%s7296_s21 + $0x128] sm:$0xff]  ;;  %v314_v34 = vld [vmem:[%s7296_s21 + $0xe0] sm:$0xff]  ;;  %v321_v35 = vld [vmem:[%s7296_s21 + $0x118] sm:$0xff] }
  0x28   : > { %v331_v36 = vld [vmem:[%s7296_s21 + $0x168] sm:$0xff]  ;;  %v338_v37 = vld [vmem:[%s7296_s21 + $0x1a0] sm:$0xff]  ;;  %v329_v38 = vld [vmem:[%s7296_s21 + $0x158] sm:$0xff]  ;;  %v7341_v40 = vpack.c.bf16 %v323_v33, %v316_v32  ;;  %v524_v41 = vpack.c.bf16 %v321_v35, %v314_v34 }
  0x29   : > { %v336_v39 = vld [vmem:[%s7296_s21 + $0x190] sm:$0xff]  ;;  %v7343_v42 = vpack.c.bf16 %v338_v37, %v331_v36  ;;  %v330_v44 = vld [vmem:[%s7296_s21 + $0x160] sm:$0xff]  ;;  %v337_v45 = vld [vmem:[%s7296_s21 + $0x198] sm:$0xff] }
  0x2a   : > { %v532_v43 = vpack.c.bf16 %v336_v39, %v329_v38  ;;  %v328_v46 = vld [vmem:[%s7296_s21 + $0x150] sm:$0xff]  ;;  %v335_v47 = vld [vmem:[%s7296_s21 + $0x188] sm:$0xff]  ;;  %v345_v48 = vld [vmem:[%s7296_s21 + $0x1d8] sm:$0xff]  ;;  %v7355_v52 = vpack.c.bf16 %v337_v45, %v330_v44 }
  0x2b   : > { %v352_v49 = vld [vmem:[%s7296_s21 + $0x210] sm:$0xff]  ;;  %v343_v50 = vld [vmem:[%s7296_s21 + $0x1c8] sm:$0xff]  ;;  %v350_v51 = vld [vmem:[%s7296_s21 + $0x200] sm:$0xff]  ;;  %v531_v53 = vpack.c.bf16 %v335_v47, %v328_v46 }
  0x2c   : > { %2883 = vmatpush1.bf16.xpose.msra.mxu0 %v7327_v28  ;;  %v7357_v54 = vpack.c.bf16 %v352_v49, %v345_v48  ;;  %v539_v55 = vpack.c.bf16 %v350_v51, %v343_v50  ;;  %v344_v56 = vld [vmem:[%s7296_s21 + $0x1d0] sm:$0xff]  ;;  %v351_v57 = vld [vmem:[%s7296_s21 + $0x208] sm:$0xff]  ;;  %v342_v58 = vld [vmem:[%s7296_s21 + $0x1c0] sm:$0xff] }
  0x2d   : > { %2530 = vmatpush1.bf16.xpose.msra.mxu1 %v517_v29  ;;  %2884 = vmatprep.subr.bf16.mxu0 %v7329_v30  ;;  %v349_v59 = vld [vmem:[%s7296_s21 + $0x1f8] sm:$0xff]  ;;  %v359_v60 = vld [vmem:[%s7296_s21 + $0x248] sm:$0xff]  ;;  %v366_v61 = vld [vmem:[%s7296_s21 + $0x280] sm:$0xff]  ;;  %v7369_v0 = vpack.c.bf16 %v351_v57, %v344_v56 }
  0x2e   : > { %2531 = vmatprep.subr.bf16.mxu1 %v525_v31  ;;  %v357_v62 = vld [vmem:[%s7296_s21 + $0x238] sm:$0xff]  ;;  %v364_v63 = vld [vmem:[%s7296_s21 + $0x270] sm:$0xff]  ;;  %v538_v1 = vpack.c.bf16 %v349_v59, %v342_v58  ;;  %v7371_v2 = vpack.c.bf16 %v366_v61, %v359_v60  ;;  %v358_v4 = vld [vmem:[%s7296_s21 + $0x240] sm:$0xff] }
  0x2f   : > { %v546_v3 = vpack.c.bf16 %v364_v63, %v357_v62  ;;  %v365_v6 = vld [vmem:[%s7296_s21 + $0x278] sm:$0xff]  ;;  %v356_v7 = vld [vmem:[%s7296_s21 + $0x230] sm:$0xff]  ;;  %v363_v8 = vld [vmem:[%s7296_s21 + $0x268] sm:$0xff] }
  0x30   : > { %v373_v10 = vld [vmem:[%s7296_s21 + $0x2b8] sm:$0xff]  ;;  %v380_v11 = vld [vmem:[%s7296_s21 + $0x2f0] sm:$0xff]  ;;  %v371_v12 = vld [vmem:[%s7296_s21 + $0x2a8] sm:$0xff]  ;;  %v7383_v14 = vpack.c.bf16 %v365_v6, %v358_v4  ;;  %v545_v15 = vpack.c.bf16 %v363_v8, %v356_v7 }
  0x31   : > { %v378_v13 = vld [vmem:[%s7296_s21 + $0x2e0] sm:$0xff]  ;;  %v7385_v17 = vpack.c.bf16 %v380_v11, %v373_v10  ;;  %v372_v20 = vld [vmem:[%s7296_s21 + $0x2b0] sm:$0xff]  ;;  %v379_v21 = vld [vmem:[%s7296_s21 + $0x2e8] sm:$0xff] }
  0x32   : > { %v553_v18 = vpack.c.bf16 %v378_v13, %v371_v12  ;;  %v6712_v19 = vld [vmem:[%s9331_s1 + $0x4] ss:$28 sps:$4 sm:$0xff]   ;;  %v377_v23 = vld [vmem:[%s7296_s21 + $0x2d8] sm:$0xff]  ;;  %v387_v24 = vld [vmem:[%s7296_s21 + $0x328] sm:$0xff]  ;;  %v7400_v29 = vpack.c.bf16 %v379_v21, %v372_v20 }
  0x33   : > { %v370_v22 = vld [vmem:[%s7296_s21 + $0x2a0] sm:$0xff]  ;;  %2559 = vmatprep.mubr.bf16.mxu1 %v6712_v19  ;;  %v385_v26 = vld [vmem:[%s7296_s21 + $0x318] sm:$0xff]  ;;  %v392_v27 = vld [vmem:[%s7296_s21 + $0x350] sm:$0xff] }
  0x34   : > { %2885 = vmatpush1.bf16.xpose.msra.mxu0 %v7341_v40  ;;  %v394_v25 = vld [vmem:[%s7296_s21 + $0x360] sm:$0xff]  ;;  %v552_v31 = vpack.c.bf16 %v377_v23, %v370_v22  ;;  %v560_v33 = vpack.c.bf16 %v392_v27, %v385_v26  ;;  %v393_v35 = vld [vmem:[%s7296_s21 + $0x358] sm:$0xff]  ;;  %v384_v36 = vld [vmem:[%s7296_s21 + $0x310] sm:$0xff] }
  0x35   : > { %2532 = vmatpush1.bf16.xpose.msra.mxu1 %v524_v41  ;;  %2886 = vmatprep.subr.bf16.mxu0 %v7343_v42  ;;  %v7402_v32 = vpack.c.bf16 %v394_v25, %v387_v24  ;;  %v386_v34 = vld [vmem:[%s7296_s21 + $0x320] sm:$0xff]  ;;  %v391_v37 = vld [vmem:[%s7296_s21 + $0x348] sm:$0xff]  ;;  %v401_v38 = vld [vmem:[%s7296_s21 + $0x398] sm:$0xff] }
  0x36   : > { %2533 = vmatprep.subr.bf16.mxu1 %v532_v43  ;;  %v408_v39 = vld [vmem:[%s7296_s21 + $0x3d0] sm:$0xff]  ;;  %v399_v41 = vld [vmem:[%s7296_s21 + $0x388] sm:$0xff]  ;;  %v406_v43 = vld [vmem:[%s7296_s21 + $0x3c0] sm:$0xff]  ;;  %v7414_v44 = vpack.c.bf16 %v393_v35, %v386_v34  ;;  %v559_v45 = vpack.c.bf16 %v391_v37, %v384_v36 }
  0x37   : > { %v7416_v46 = vpack.c.bf16 %v408_v39, %v401_v38  ;;  %v567_v47 = vpack.c.bf16 %v406_v43, %v399_v41  ;;  %v400_v48 = vld [vmem:[%s7296_s21 + $0x390] sm:$0xff]  ;;  %v407_v49 = vld [vmem:[%s7296_s21 + $0x3c8] sm:$0xff]  ;;  %v398_v50 = vld [vmem:[%s7296_s21 + $0x380] sm:$0xff] }
  0x38   : > { %v405_v51 = vld [vmem:[%s7296_s21 + $0x3b8] sm:$0xff]  ;;  %v420_v57 = vld [vmem:[%s7296_s21 + $0x430] sm:$0xff]  ;;  %v7428_v58 = vpack.c.bf16 %v407_v49, %v400_v48  ;;  %v414_v62 = vld [vmem:[%s7296_s21 + $0x400] sm:$0xff] }
  0x39   : > { %v413_v56 = vld [vmem:[%s7296_s21 + $0x3f8] sm:$0xff]  ;;  %v566_v59 = vpack.c.bf16 %v405_v51, %v398_v50  ;;  %v436_v6 = vld [vmem:[%s7296_s21 + $0x4b0] sm:$0xff]  ;;  %v427_v7 = vld [vmem:[%s7296_s21 + $0x468] sm:$0xff] }
  0x3a   : > { %v574_v61 = vpack.c.bf16 %v420_v57, %v413_v56  ;;  %v421_v63 = vld [vmem:[%s7296_s21 + $0x438] sm:$0xff]  ;;  %v434_v8 = vld [vmem:[%s7296_s21 + $0x4a0] sm:$0xff]  ;;  %v443_v21 = vld [vmem:[%s7296_s21 + $0x4e8] sm:$0xff] }
  0x3b   : > { %v429_v4 = vld [vmem:[%s7296_s21 + $0x478] sm:$0xff]  ;;  %v7442_v10 = vpack.c.bf16 %v421_v63, %v414_v62  ;;  %v581_v13 = vpack.c.bf16 %v434_v8, %v427_v7  ;;  %v426_v19 = vld [vmem:[%s7296_s21 + $0x460] sm:$0xff]  ;;  %v448_v24 = vld [vmem:[%s7296_s21 + $0x510] sm:$0xff] }
  0x3c   : > { %2887 = vmatpush1.bf16.xpose.msra.mxu0 %v7355_v52  ;;  %v7444_v12 = vpack.c.bf16 %v436_v6, %v429_v4  ;;  %v433_v20 = vld [vmem:[%s7296_s21 + $0x498] sm:$0xff]  ;;  %v450_v22 = vld [vmem:[%s7296_s21 + $0x520] sm:$0xff]  ;;  %v440_v35 = vld [vmem:[%s7296_s21 + $0x4d0] sm:$0xff] }
  0x3d   : > { %2534 = vmatpush1.bf16.xpose.msra.mxu1 %v531_v53  ;;  %2888 = vmatprep.subr.bf16.mxu0 %v7357_v54  ;;  %v415_v53 = vld [vmem:[%s7296_s21 + $0x408] sm:$0xff]  ;;  %v441_v23 = vld [vmem:[%s7296_s21 + $0x4d8] sm:$0xff]  ;;  %v580_v26 = vpack.c.bf16 %v433_v20, %v426_v19  ;;  %v7458_v27 = vpack.c.bf16 %v450_v22, %v443_v21  ;;  %v464_v38 = vld [vmem:[%s7296_s21 + $0x590] sm:$0xff] }
  0x3e   : > { %2535 = vmatprep.subr.bf16.mxu1 %v539_v55  ;;  %v422_v55 = vld [vmem:[%s7296_s21 + $0x440] sm:$0xff]  ;;  %v449_v34 = vld [vmem:[%s7296_s21 + $0x518] sm:$0xff]  ;;  %v447_v36 = vld [vmem:[%s7296_s21 + $0x508] sm:$0xff] }
  0x3f   : > { %v7430_v60 = vpack.c.bf16 %v422_v55, %v415_v53  ;;  %v457_v37 = vld [vmem:[%s7296_s21 + $0x558] sm:$0xff]  ;;  %v455_v39 = vld [vmem:[%s7296_s21 + $0x548] sm:$0xff]  ;;  %v462_v41 = vld [vmem:[%s7296_s21 + $0x580] sm:$0xff] }
  0x40   : > { %v595_v48 = vpack.c.bf16 %v462_v41, %v455_v39  ;;  %v456_v49 = vld [vmem:[%s7296_s21 + $0x550] sm:$0xff]  ;;  %v463_v50 = vld [vmem:[%s7296_s21 + $0x588] sm:$0xff]  ;;  %v454_v51 = vld [vmem:[%s7296_s21 + $0x540] sm:$0xff] }
  0x41   : > { %v461_v53 = vld [vmem:[%s7296_s21 + $0x578] sm:$0xff]  ;;  %v471_v55 = vld [vmem:[%s7296_s21 + $0x5c8] sm:$0xff]  ;;  %v478_v56 = vld [vmem:[%s7296_s21 + $0x600] sm:$0xff] }
  0x42   : > { %v469_v57 = vld [vmem:[%s7296_s21 + $0x5b8] sm:$0xff]  ;;  %v594_v62 = vpack.c.bf16 %v461_v53, %v454_v51  ;;  %v7486_v63 = vpack.c.bf16 %v478_v56, %v471_v55  ;;  %v468_v6 = vld [vmem:[%s7296_s21 + $0x5b0] sm:$0xff]  ;;  %v475_v7 = vld [vmem:[%s7296_s21 + $0x5e8] sm:$0xff] }
  0x43   : > { %v477_v4 = vld [vmem:[%s7296_s21 + $0x5f8] sm:$0xff]  ;;  %v601_v19 = vpack.c.bf16 %v475_v7, %v468_v6  ;;  %v484_v22 = vld [vmem:[%s7296_s21 + $0x630] sm:$0xff]  ;;  %v498_v41 = vld [vmem:[%s7296_s21 + $0x6a0] sm:$0xff] }
  0x44   : > { %2889 = vmatpush1.bf16.xpose.msra.mxu0 %v7369_v0  ;;  %v485_v8 = vld [vmem:[%s7296_s21 + $0x638] sm:$0xff]  ;;  %v298_v51 = vld [vmem:[%s7296_s21 + $0x60] sm:$0xff] }
  0x45   : > { %2536 = vmatpush1.bf16.xpose.msra.mxu1 %v538_v1  ;;  %2890 = vmatprep.subr.bf16.mxu0 %v7371_v2  ;;  %v412_v1 = vld [vmem:[%s7296_s21 + $0x3f0] sm:$0xff]  ;;  %v6713_v6 = vld [vmem:[%s9331_s1 + $0x44] ss:$28 sps:$4 sm:$0xff]  }
  0x46   : > { %2537 = vmatprep.subr.bf16.mxu1 %v546_v3  ;;  %v419_v3 = vld [vmem:[%s7296_s21 + $0x428] sm:$0xff] }
  0x47   : > { %v573_v11 = vpack.c.bf16 %v419_v3, %v412_v1  ;;  %v470_v3 = vld [vmem:[%s7296_s21 + $0x5c0] sm:$0xff] }
  0x4c   : > { %2891 = vmatpush1.bf16.xpose.msra.mxu0 %v7383_v14 }
  0x4d   : > { %2538 = vmatpush1.bf16.xpose.msra.mxu1 %v545_v15  ;;  %2892 = vmatprep.subr.bf16.mxu0 %v7385_v17  ;;  %v428_v15 = vld [vmem:[%s7296_s21 + $0x470] sm:$0xff] }
  0x4e   : > { %2539 = vmatprep.subr.bf16.mxu1 %v553_v18  ;;  %v435_v18 = vld [vmem:[%s7296_s21 + $0x4a8] sm:$0xff] }
  0x4f   : > { %v7456_v25 = vpack.c.bf16 %v435_v18, %v428_v15  ;;  %v490_v15 = vld [vmem:[%s7296_s21 + $0x660] sm:$0xff]  ;;  %v7498_v18 = vpack.c.bf16 %v477_v4, %v470_v3  ;;  %v312_v3 = vld [vmem:[%s7296_s21 + $0xd0] sm:$0xff] }
  0x50   : > { %v6710_v4 = vld [vmem:[%s9331_s1] ss:$28 sps:$4 sm:$0xff]  }
  0x54   : > { %2893 = vmatpush1.bf16.xpose.msra.mxu0 %v7400_v29 }
  0x55   : > { %2540 = vmatpush1.bf16.xpose.msra.mxu1 %v552_v31  ;;  %2894 = vmatprep.subr.bf16.mxu0 %v7402_v32  ;;  %v588_v31 = vpack.c.bf16 %v448_v24, %v441_v23  ;;  %v491_v23 = vld [vmem:[%s7296_s21 + $0x668] sm:$0xff]  ;;  %v482_v24 = vld [vmem:[%s7296_s21 + $0x620] sm:$0xff] }
  0x56   : > { %2541 = vmatprep.subr.bf16.mxu1 %v560_v33  ;;  %v442_v33 = vld [vmem:[%s7296_s21 + $0x4e0] sm:$0xff] }
  0x57   : > { %v7470_v43 = vpack.c.bf16 %v449_v34, %v442_v33  ;;  %v506_v33 = vld [vmem:[%s7296_s21 + $0x6e0] sm:$0xff]  ;;  %v497_v34 = vld [vmem:[%s7296_s21 + $0x698] sm:$0xff] }
  0x5c   : > { %2895 = vmatpush1.bf16.xpose.msra.mxu0 %v7414_v44 }
  0x5d   : > { %2542 = vmatpush1.bf16.xpose.msra.mxu1 %v559_v45  ;;  %2896 = vmatprep.subr.bf16.mxu0 %v7416_v46  ;;  %v587_v45 = vpack.c.bf16 %v447_v36, %v440_v35  ;;  %v504_v35 = vld [vmem:[%s7296_s21 + $0x6d0] sm:$0xff]  ;;  %v7512_v36 = vpack.c.bf16 %v491_v23, %v484_v22  ;;  %v6719_v23 = vld [vmem:[%s9331_s1 + $0x7c] ss:$28 sps:$4 sm:$0xff]  }
  0x5e   : > { %2543 = vmatprep.subr.bf16.mxu1 %v567_v47  ;;  %v7472_v47 = vpack.c.bf16 %v464_v38, %v457_v37  ;;  %v616_v39 = vpack.c.bf16 %v504_v35, %v497_v34  ;;  %v6718_v22 = vld [vmem:[%s9331_s1 + $0x38] ss:$28 sps:$4 sm:$0xff]  }
  0x5f   : > { %v325_v34 = vld [vmem:[%s7296_s21 + $0x138] sm:$0xff]  ;;  %v340_v35 = vld [vmem:[%s7296_s21 + $0x1b0] sm:$0xff] }
  0x64   : > { %2897 = vmatpush1.bf16.xpose.msra.mxu0 %v7428_v58 }
  0x65   : > { %2544 = vmatpush1.bf16.xpose.msra.mxu1 %v566_v59  ;;  %2898 = vmatprep.subr.bf16.mxu0 %v7430_v60  ;;  %v476_v59 = vld [vmem:[%s7296_s21 + $0x5f0] sm:$0xff] }
  0x66   : > { %2545 = vmatprep.subr.bf16.mxu1 %v574_v61  ;;  %v7484_v61 = vpack.c.bf16 %v463_v50, %v456_v49  ;;  %v602_v1 = vpack.c.bf16 %v476_v59, %v469_v57  ;;  %v503_v49 = vld [vmem:[%s7296_s21 + $0x6c8] sm:$0xff]  ;;  %v290_v57 = vld [vmem:[%s7296_s21 + $0x20] sm:$0xff]  ;;  %v297_v59 = vld [vmem:[%s7296_s21 + $0x58] sm:$0xff] }
  0x67   : > { %v291_v50 = vld [vmem:[%s7296_s21 + $0x28] sm:$0xff]  ;;  %v514_v7 = vpack.c.bf16 %v297_v59, %v290_v57  ;;  %v6734_v59 = vld [vmem:[%s9331_s1 + $0xe4] ss:$28 sps:$4 sm:$0xff]  }
  0x68   : > { %v515_v56 = vpack.c.bf16 %v298_v51, %v291_v50  ;;  %v339_v50 = vld [vmem:[%s7296_s21 + $0x1a8] sm:$0xff]  ;;  %v354_v51 = vld [vmem:[%s7296_s21 + $0x220] sm:$0xff] }
  0x6c   : > { %2899 = vmatpush1.bf16.xpose.msra.mxu0 %v7442_v10 }
  0x6d   : > { %2546 = vmatpush1.bf16.xpose.msra.mxu1 %v573_v11  ;;  %2900 = vmatprep.subr.bf16.mxu0 %v7444_v12  ;;  %v492_v11 = vld [vmem:[%s7296_s21 + $0x670] sm:$0xff] }
  0x6e   : > { %2547 = vmatprep.subr.bf16.mxu1 %v581_v13  ;;  %v483_v13 = vld [vmem:[%s7296_s21 + $0x628] sm:$0xff]  ;;  %v7500_v20 = vpack.c.bf16 %v492_v11, %v485_v8  ;;  %v6716_v8 = vld [vmem:[%s9331_s1 + $0x3c] ss:$28 sps:$4 sm:$0xff]  }
  0x6f   : > { %v609_v21 = vpack.c.bf16 %v490_v15, %v483_v13  ;;  %v304_v13 = vld [vmem:[%s7296_s21 + $0x90] sm:$0xff]  ;;  %v311_v15 = vld [vmem:[%s7296_s21 + $0xc8] sm:$0xff] }
  0x74   : > { %2901 = vmatpush1.bf16.xpose.msra.mxu0 %v7456_v25 }
  0x75   : > { %2548 = vmatpush1.bf16.xpose.msra.mxu1 %v580_v26  ;;  %2902 = vmatprep.subr.bf16.mxu0 %v7458_v27  ;;  %v489_v26 = vld [vmem:[%s7296_s21 + $0x658] sm:$0xff] }
  0x76   : > { %2549 = vmatprep.subr.bf16.mxu1 %v588_v31  ;;  %v499_v31 = vld [vmem:[%s7296_s21 + $0x6a8] sm:$0xff]  ;;  %v608_v37 = vpack.c.bf16 %v489_v26, %v482_v24  ;;  %v521_v24 = vpack.c.bf16 %v311_v15, %v304_v13  ;;  %v6722_v26 = vld [vmem:[%s9331_s1 + $0x74] ss:$28 sps:$4 sm:$0xff]  }
  0x77   : > { %v7514_v38 = vpack.c.bf16 %v506_v33, %v499_v31  ;;  %v318_v33 = vld [vmem:[%s7296_s21 + $0x100] sm:$0xff]  ;;  %v367_v15 = vld [vmem:[%s7296_s21 + $0x288] sm:$0xff] }
  0x7c   : > { %2903 = vmatpush1.bf16.xpose.msra.mxu0 %v7470_v43 }
  0x7d   : > { %2550 = vmatpush1.bf16.xpose.msra.mxu1 %v587_v45  ;;  %2904 = vmatprep.subr.bf16.mxu0 %v7472_v47  ;;  %v505_v45 = vld [vmem:[%s7296_s21 + $0x6d8] sm:$0xff] }
  0x7e   : > { %2551 = vmatprep.subr.bf16.mxu1 %v595_v48  ;;  %v496_v48 = vld [vmem:[%s7296_s21 + $0x690] sm:$0xff]  ;;  %v7524_v53 = vpack.c.bf16 %v505_v45, %v498_v41  ;;  %v528_v41 = vpack.c.bf16 %v325_v34, %v318_v33  ;;  %v6728_v45 = vld [vmem:[%s9331_s1 + $0xac] ss:$28 sps:$4 sm:$0xff]   ;;  %v381_v33 = vld [vmem:[%s7296_s21 + $0x2f8] sm:$0xff] }
  0x7f   : > { %v615_v55 = vpack.c.bf16 %v503_v49, %v496_v48  ;;  %v332_v49 = vld [vmem:[%s7296_s21 + $0x170] sm:$0xff] }
  0x80   : > { %v535_v57 = vpack.c.bf16 %v339_v50, %v332_v49  ;;  %v396_v34 = vld [vmem:[%s7296_s21 + $0x370] sm:$0xff]  ;;  %v6754_v49 = vld [vmem:[%s9331_s1 + $0x188] ss:$28 sps:$4 sm:$0xff]  }
  0x81   : > { %v6755_v50 = vld [vmem:[%s9331_s1 + $0x1cc] ss:$28 sps:$4 sm:$0xff]  }
  0x84   : > { %2905 = vmatpush1.bf16.xpose.msra.mxu0 %v7484_v61 }
  0x85   : > { %2552 = vmatpush1.bf16.xpose.msra.mxu1 %v594_v62  ;;  %2906 = vmatprep.subr.bf16.mxu0 %v7486_v63  ;;  %v305_v62 = vld [vmem:[%s7296_s21 + $0x98] sm:$0xff] }
  0x86   : > { %2553 = vmatprep.subr.bf16.mxu1 %v602_v1  ;;  %v6707_v1 = vld [vmem:[%s9331_s1 + $0x8] ss:$28 sps:$4 sm:$0xff]   ;;  %v522_v11 = vpack.c.bf16 %v312_v3, %v305_v62  ;;  %v353_v3 = vld [vmem:[%s7296_s21 + $0x218] sm:$0xff] }
  0x8c   : > { %2907 = vmatpush1.bf16.xpose.msra.mxu0 %v7498_v18 }
  0x8d   : > { %2554 = vmatpush1.bf16.xpose.msra.mxu1 %v601_v19  ;;  %2908 = vmatprep.subr.bf16.mxu0 %v7500_v20  ;;  %v319_v19 = vld [vmem:[%s7296_s21 + $0x108] sm:$0xff] }
  0x8e   : > { %2555 = vmatprep.subr.bf16.mxu1 %v609_v21  ;;  %v326_v21 = vld [vmem:[%s7296_s21 + $0x140] sm:$0xff] }
  0x8f   : > { %v529_v31 = vpack.c.bf16 %v326_v21, %v319_v19  ;;  %v382_v19 = vld [vmem:[%s7296_s21 + $0x300] sm:$0xff]  ;;  %v6742_v21 = vld [vmem:[%s9331_s1 + $0x118] ss:$28 sps:$4 sm:$0xff]  }
  0x94   : > { %2909 = vmatpush1.bf16.xpose.msra.mxu0 %v7512_v36 }
  0x95   : > { %2556 = vmatpush1.bf16.xpose.msra.mxu1 %v608_v37  ;;  %2910 = vmatprep.subr.bf16.mxu0 %v7514_v38  ;;  %v6724_v37 = vld [vmem:[%s9331_s1 + $0x70] ss:$28 sps:$4 sm:$0xff]  }
  0x96   : > { %2557 = vmatprep.subr.bf16.mxu1 %v616_v39  ;;  %v6725_v39 = vld [vmem:[%s9331_s1 + $0xb4] ss:$28 sps:$4 sm:$0xff]  }
  0x9c   : > { %2911 = vmatpush1.bf16.xpose.msra.mxu0 %v7524_v53 }
  0x9d   : > { %2558 = vmatpush1.bf16.xpose.msra.mxu1 %v615_v55  ;;  %3233 = vmatprep.subr.bf16.mxu0 %v515_v56  ;;  %v6730_v55 = vld [vmem:[%s9331_s1 + $0xa8] ss:$28 sps:$4 sm:$0xff]  }
  0x9e   : > { %5983 = vmatprep.subr.bf16.mxu1 %v7301_v5  ;;  %v6715_v5 = vld [vmem:[%s9331_s1 + $0x40] ss:$28 sps:$4 sm:$0xff]   ;;  %v6731_v56 = vld [vmem:[%s9331_s1 + $0xec] ss:$28 sps:$4 sm:$0xff]  }
  0xa3   : > { %2913 = vmatmul.mubr.bf16.vlgmr.msra.gmra.mrb[0].mxu0 %v6707_v1  ;;  %v346_v1 = vld [vmem:[%s7296_s21 + $0x1e0] sm:$0xff] }
  0xa4   : > { %3234 = vmatpush1.bf16.xpose.msra.mxu0 %v514_v7  ;;  %2560 = vmatmul.mubr.bf16.vlgmr.msra.gmra.mrb[0].mxu1 %v6710_v4  ;;  %v361_v4 = vld [vmem:[%s7296_s21 + $0x258] sm:$0xff]  ;;  %v6737_v7 = vld [vmem:[%s9331_s1 + $0x124] ss:$28 sps:$4 sm:$0xff]  }
  0xa5   : > { %2922 = vmatprep.mubr.bf16.mxu0 %v6713_v6  ;;  %3235 = vmatprep.subr.bf16.mxu0 %v522_v11  ;;  %v6733_v6 = vld [vmem:[%s9331_s1 + $0xe8] ss:$28 sps:$4 sm:$0xff]   ;;  %v6740_v11 = vld [vmem:[%s9331_s1 + $0x11c] ss:$28 sps:$4 sm:$0xff]  }
  0xa6   : > { %2569 = vmatprep.mubr.bf16.mxu1 %v6716_v8  ;;  %5999 = vmatpush1.bf16.xpose.msra.mxu1 %v7306_v9  ;;  %v333_v9 = vld [vmem:[%s7296_s21 + $0x178] sm:$0xff]  ;;  %v542_v8 = vpack.c.bf16 %v353_v3, %v346_v1 }
  0xa7   : > { %5984 = vmatprep.subr.bf16.mxu1 %v7314_v16  ;;  %v6721_v16 = vld [vmem:[%s9331_s1 + $0x78] ss:$28 sps:$4 sm:$0xff]   ;;  %v536_v48 = vpack.c.bf16 %v340_v35, %v333_v9  ;;  %v6748_v9 = vld [vmem:[%s9331_s1 + $0x150] ss:$28 sps:$4 sm:$0xff]  }
  0xa8   : > { %v6749_v35 = vld [vmem:[%s9331_s1 + $0x194] ss:$28 sps:$4 sm:$0xff]   ;;  %v6764_v3 = vld [vmem:[%s9331_s1 + $0x1fc] ss:$28 sps:$4 sm:$0xff]  }
  0xab   : > { %2923 = vmatmul.mubr.bf16.gmra.mrb[4].mxu0 %v6715_v5  ;;  %v360_v5 = vld [vmem:[%s7296_s21 + $0x250] sm:$0xff] }
  0xac   : > { %3236 = vmatpush1.bf16.xpose.msra.mxu0 %v521_v24  ;;  %2570 = vmatmul.mubr.bf16.gmra.mrb[4].mxu1 %v6718_v22  ;;  %v6743_v22 = vld [vmem:[%s9331_s1 + $0x15c] ss:$28 sps:$4 sm:$0xff]   ;;  %v6746_v24 = vld [vmem:[%s9331_s1 + $0x154] ss:$28 sps:$4 sm:$0xff]  }
  0xad   : > { %2932 = vmatprep.mubr.bf16.mxu0 %v6719_v23  ;;  %3237 = vmatprep.subr.bf16.mxu0 %v529_v31  ;;  %v549_v23 = vpack.c.bf16 %v367_v15, %v360_v5  ;;  %v374_v31 = vld [vmem:[%s7296_s21 + $0x2c0] sm:$0xff]  ;;  %v6770_v5 = vld [vmem:[%s9331_s1 + $0x234] ss:$28 sps:$4 sm:$0xff]  }
  0xae   : > { %2579 = vmatprep.mubr.bf16.mxu1 %v6722_v26  ;;  %6000 = vmatpush1.bf16.xpose.msra.mxu1 %v7327_v28  ;;  %v347_v28 = vld [vmem:[%s7296_s21 + $0x1e8] sm:$0xff]  ;;  %v452_v15 = vld [vmem:[%s7296_s21 + $0x530] sm:$0xff] }
  0xaf   : > { %5985 = vmatprep.subr.bf16.mxu1 %v7329_v30  ;;  %v6727_v30 = vld [vmem:[%s9331_s1 + $0xb0] ss:$28 sps:$4 sm:$0xff]   ;;  %v543_v62 = vpack.c.bf16 %v354_v51, %v347_v28  ;;  %v6758_v51 = vld [vmem:[%s9331_s1 + $0x1c4] ss:$28 sps:$4 sm:$0xff]  }
  0xb3   : > { %2933 = vmatmul.mubr.bf16.gmra.mrb[8].mxu0 %v6721_v16  ;;  %v556_v16 = vpack.c.bf16 %v381_v33, %v374_v31  ;;  %v466_v31 = vld [vmem:[%s7296_s21 + $0x5a0] sm:$0xff]  ;;  %v6775_v33 = vld [vmem:[%s9331_s1 + $0x270] ss:$28 sps:$4 sm:$0xff]  }
  0xb4   : > { %3238 = vmatpush1.bf16.xpose.msra.mxu0 %v528_v41  ;;  %2580 = vmatmul.mubr.bf16.gmra.mrb[8].mxu1 %v6724_v37  ;;  %v6752_v37 = vld [vmem:[%s9331_s1 + $0x18c] ss:$28 sps:$4 sm:$0xff]   ;;  %v388_v41 = vld [vmem:[%s7296_s21 + $0x330] sm:$0xff] }
  0xb5   : > { %2942 = vmatprep.mubr.bf16.mxu0 %v6725_v39  ;;  %3239 = vmatprep.subr.bf16.mxu0 %v536_v48  ;;  %v410_v48 = vld [vmem:[%s7296_s21 + $0x3e0] sm:$0xff] }
  0xb6   : > { %2589 = vmatprep.mubr.bf16.mxu1 %v6728_v45  ;;  %6001 = vmatpush1.bf16.xpose.msra.mxu1 %v7341_v40  ;;  %v368_v40 = vld [vmem:[%s7296_s21 + $0x290] sm:$0xff]  ;;  %v395_v45 = vld [vmem:[%s7296_s21 + $0x368] sm:$0xff] }
  0xb7   : > { %5986 = vmatprep.subr.bf16.mxu1 %v7343_v42  ;;  %v6736_v42 = vld [vmem:[%s9331_s1 + $0xe0] ss:$28 sps:$4 sm:$0xff]   ;;  %v550_v13 = vpack.c.bf16 %v368_v40, %v361_v4  ;;  %v563_v28 = vpack.c.bf16 %v395_v45, %v388_v41  ;;  %v416_v40 = vld [vmem:[%s7296_s21 + $0x410] sm:$0xff] }
  0xb8   : > { %v6784_v45 = vld [vmem:[%s9331_s1 + $0x2a0] ss:$28 sps:$4 sm:$0xff]  }
  0xbb   : > { %2943 = vmatmul.mubr.bf16.gmra.mrb[12].mxu0 %v6727_v30 }
  0xbc   : > { %3240 = vmatpush1.bf16.xpose.msra.mxu0 %v535_v57  ;;  %2590 = vmatmul.mubr.bf16.gmra.mrb[12].mxu1 %v6730_v55  ;;  %v402_v55 = vld [vmem:[%s7296_s21 + $0x3a0] sm:$0xff]  ;;  %v417_v57 = vld [vmem:[%s7296_s21 + $0x418] sm:$0xff] }
  0xbd   : > { %2952 = vmatprep.mubr.bf16.mxu0 %v6731_v56  ;;  %3241 = vmatprep.subr.bf16.mxu0 %v543_v62  ;;  %v409_v56 = vld [vmem:[%s7296_s21 + $0x3d8] sm:$0xff]  ;;  %v6761_v62 = vld [vmem:[%s9331_s1 + $0x204] ss:$28 sps:$4 sm:$0xff]  }
  0xbe   : > { %2599 = vmatprep.mubr.bf16.mxu1 %v6734_v59  ;;  %6002 = vmatpush1.bf16.xpose.msra.mxu1 %v7355_v52  ;;  %v6739_v52 = vld [vmem:[%s9331_s1 + $0x120] ss:$28 sps:$4 sm:$0xff]   ;;  %v6757_v59 = vld [vmem:[%s9331_s1 + $0x1c8] ss:$28 sps:$4 sm:$0xff]   ;;  %v570_v1 = vpack.c.bf16 %v409_v56, %v402_v55 }
  0xbf   : > { %5987 = vmatprep.subr.bf16.mxu1 %v7357_v54  ;;  %v375_v54 = vld [vmem:[%s7296_s21 + $0x2c8] sm:$0xff]  ;;  %v6791_v55 = vld [vmem:[%s9331_s1 + $0x31c] ss:$28 sps:$4 sm:$0xff]  }
  0xc0   : > { %v557_v26 = vpack.c.bf16 %v382_v19, %v375_v54  ;;  %v6769_v54 = vld [vmem:[%s9331_s1 + $0x238] ss:$28 sps:$4 sm:$0xff]  }
  0xc3   : > { %2953 = vmatmul.mubr.bf16.gmra.mrb[16].mxu0 %v6733_v6  ;;  %v423_v6 = vld [vmem:[%s7296_s21 + $0x448] sm:$0xff] }
  0xc4   : > { %3242 = vmatpush1.bf16.xpose.msra.mxu0 %v542_v8  ;;  %2600 = vmatmul.mubr.bf16.gmra.mrb[16].mxu1 %v6736_v42  ;;  %v431_v42 = vld [vmem:[%s7296_s21 + $0x488] sm:$0xff]  ;;  %v6766_v8 = vld [vmem:[%s9331_s1 + $0x1f8] ss:$28 sps:$4 sm:$0xff]  }
  0xc5   : > { %2962 = vmatprep.mubr.bf16.mxu0 %v6737_v7  ;;  %3243 = vmatprep.subr.bf16.mxu0 %v550_v13  ;;  %v577_v7 = vpack.c.bf16 %v423_v6, %v416_v40  ;;  %v507_v40 = vld [vmem:[%s7296_s21 + $0x6e8] sm:$0xff]  ;;  %v404_v6 = vld [vmem:[%s7296_s21 + $0x3b0] sm:$0xff] }
  0xc6   : > { %2609 = vmatprep.mubr.bf16.mxu1 %v6740_v11  ;;  %6003 = vmatpush1.bf16.xpose.msra.mxu1 %v7369_v0  ;;  %v389_v0 = vld [vmem:[%s7296_s21 + $0x338] sm:$0xff] }
  0xc7   : > { %5988 = vmatprep.subr.bf16.mxu1 %v7371_v2  ;;  %v6745_v2 = vld [vmem:[%s9331_s1 + $0x158] ss:$28 sps:$4 sm:$0xff]   ;;  %v564_v39 = vpack.c.bf16 %v396_v34, %v389_v0  ;;  %v6778_v34 = vld [vmem:[%s9331_s1 + $0x268] ss:$28 sps:$4 sm:$0xff]  }
  0xc8   : > { %v6767_v11 = vld [vmem:[%s9331_s1 + $0x23c] ss:$28 sps:$4 sm:$0xff]  }
  0xcb   : > { %2963 = vmatmul.mubr.bf16.gmra.mrb[20].mxu0 %v6739_v52  ;;  %v445_v52 = vld [vmem:[%s7296_s21 + $0x4f8] sm:$0xff] }
  0xcc   : > { %3244 = vmatpush1.bf16.xpose.msra.mxu0 %v549_v23  ;;  %2610 = vmatmul.mubr.bf16.gmra.mrb[20].mxu1 %v6742_v21  ;;  %v6772_v21 = vld [vmem:[%s9331_s1 + $0x230] ss:$28 sps:$4 sm:$0xff]   ;;  %v592_v23 = vpack.c.bf16 %v452_v15, %v445_v52  ;;  %v425_v52 = vld [vmem:[%s7296_s21 + $0x458] sm:$0xff] }
  0xcd   : > { %2972 = vmatprep.mubr.bf16.mxu0 %v6743_v22  ;;  %3245 = vmatprep.subr.bf16.mxu0 %v557_v26  ;;  %v6773_v22 = vld [vmem:[%s9331_s1 + $0x274] ss:$28 sps:$4 sm:$0xff]   ;;  %v459_v26 = vld [vmem:[%s7296_s21 + $0x568] sm:$0xff]  ;;  %v6808_v15 = vld [vmem:[%s9331_s1 + $0x380] ss:$28 sps:$4 sm:$0xff]  }
  0xce   : > { %2619 = vmatprep.mubr.bf16.mxu1 %v6746_v24  ;;  %6004 = vmatpush1.bf16.xpose.msra.mxu1 %v7383_v14  ;;  %v403_v14 = vld [vmem:[%s7296_s21 + $0x3a8] sm:$0xff] }
  0xcf   : > { %5989 = vmatprep.subr.bf16.mxu1 %v7385_v17  ;;  %v6751_v17 = vld [vmem:[%s9331_s1 + $0x190] ss:$28 sps:$4 sm:$0xff]   ;;  %v571_v30 = vpack.c.bf16 %v410_v48, %v403_v14  ;;  %v6785_v14 = vld [vmem:[%s9331_s1 + $0x2e4] ss:$28 sps:$4 sm:$0xff]  }
  0xd0   : > { %v451_v24 = vld [vmem:[%s7296_s21 + $0x528] sm:$0xff] }
  0xd3   : > { %2973 = vmatmul.mubr.bf16.gmra.mrb[24].mxu0 %v6745_v2  ;;  %v6779_v2 = vld [vmem:[%s9331_s1 + $0x2ac] ss:$28 sps:$4 sm:$0xff]  }
  0xd4   : > { %3246 = vmatpush1.bf16.xpose.msra.mxu0 %v556_v16  ;;  %2620 = vmatmul.mubr.bf16.gmra.mrb[24].mxu1 %v6748_v9  ;;  %v599_v9 = vpack.c.bf16 %v466_v31, %v459_v26  ;;  %v473_v16 = vld [vmem:[%s7296_s21 + $0x5d8] sm:$0xff]  ;;  %v439_v26 = vld [vmem:[%s7296_s21 + $0x4c8] sm:$0xff] }
  0xd5   : > { %2982 = vmatprep.mubr.bf16.mxu0 %v6749_v35  ;;  %3247 = vmatprep.subr.bf16.mxu0 %v564_v39  ;;  %v465_v35 = vld [vmem:[%s7296_s21 + $0x598] sm:$0xff]  ;;  %v6781_v39 = vld [vmem:[%s9331_s1 + $0x2a8] ss:$28 sps:$4 sm:$0xff]  }
  0xd6   : > { %2629 = vmatprep.mubr.bf16.mxu1 %v6752_v37  ;;  %6005 = vmatpush1.bf16.xpose.msra.mxu1 %v7400_v29  ;;  %v424_v29 = vld [vmem:[%s7296_s21 + $0x450] sm:$0xff] }
  0xd7   : > { %5990 = vmatprep.subr.bf16.mxu1 %v7402_v32  ;;  %v6760_v32 = vld [vmem:[%s9331_s1 + $0x1c0] ss:$28 sps:$4 sm:$0xff]   ;;  %v578_v4 = vpack.c.bf16 %v424_v29, %v417_v57  ;;  %v480_v37 = vld [vmem:[%s7296_s21 + $0x610] sm:$0xff] }
  0xd8   : > { %v606_v48 = vpack.c.bf16 %v480_v37, %v473_v16  ;;  %v493_v57 = vld [vmem:[%s7296_s21 + $0x678] sm:$0xff]  ;;  %v446_v37 = vld [vmem:[%s7296_s21 + $0x500] sm:$0xff] }
  0xd9   : > { %v501_v29 = vld [vmem:[%s7296_s21 + $0x6b8] sm:$0xff] }
  0xda   : > { %v6814_v31 = vld [vmem:[%s9331_s1 + $0x3b8] ss:$28 sps:$4 sm:$0xff]   ;;  %v6817_v16 = vld [vmem:[%s9331_s1 + $0x80] ss:$28 sps:$4 sm:$0xff]  }
  0xdb   : > { %2983 = vmatmul.mubr.bf16.gmra.mrb[28].mxu0 %v6751_v17  ;;  %v479_v17 = vld [vmem:[%s7296_s21 + $0x608] sm:$0xff] }
  0xdc   : > { %3248 = vmatpush1.bf16.xpose.msra.mxu0 %v563_v28  ;;  %2630 = vmatmul.mubr.bf16.gmra.mrb[28].mxu1 %v6754_v49  ;;  %v487_v49 = vld [vmem:[%s7296_s21 + $0x648] sm:$0xff]  ;;  %v6787_v28 = vld [vmem:[%s9331_s1 + $0x2e0] ss:$28 sps:$4 sm:$0xff]  }
  0xdd   : > { %2992 = vmatprep.mubr.bf16.mxu0 %v6755_v50  ;;  %3249 = vmatprep.subr.bf16.mxu0 %v571_v30  ;;  %v494_v50 = vld [vmem:[%s7296_s21 + $0x680] sm:$0xff]  ;;  %v6790_v30 = vld [vmem:[%s9331_s1 + $0x2d8] ss:$28 sps:$4 sm:$0xff]  }
  0xde   : > { %2639 = vmatprep.mubr.bf16.mxu1 %v6758_v51  ;;  %6006 = vmatpush1.bf16.xpose.msra.mxu1 %v7414_v44  ;;  %v6763_v44 = vld [vmem:[%s9331_s1 + $0x200] ss:$28 sps:$4 sm:$0xff]   ;;  %v613_v56 = vpack.c.bf16 %v494_v50, %v487_v49  ;;  %v6823_v50 = vld [vmem:[%s9331_s1 + $0xb8] ss:$28 sps:$4 sm:$0xff]  }
  0xdf   : > { %5991 = vmatprep.subr.bf16.mxu1 %v7416_v46  ;;  %v438_v46 = vld [vmem:[%s7296_s21 + $0x4c0] sm:$0xff] }
  0xe0   : > { %v585_v13 = vpack.c.bf16 %v438_v46, %v431_v42  ;;  %v411_v42 = vld [vmem:[%s7296_s21 + $0x3e8] sm:$0xff]  ;;  %v878_v49 = vld [vmem:[%s9332_s2] sm:$0xff] }
  0xe3   : > { %2993 = vmatmul.mubr.bf16.gmra.mrb[32].mxu0 %v6757_v59  ;;  %v508_v59 = vld [vmem:[%s7296_s21 + $0x6f0] sm:$0xff] }
  0xe4   : > { %3250 = vmatpush1.bf16.xpose.msra.mxu0 %v570_v1  ;;  %2640 = vmatmul.mubr.bf16.gmra.mrb[32].mxu1 %v6760_v32  ;;  %v6793_v32 = vld [vmem:[%s9331_s1 + $0x318] ss:$28 sps:$4 sm:$0xff]   ;;  %v6796_v1 = vld [vmem:[%s9331_s1 + $0x310] ss:$28 sps:$4 sm:$0xff]  }
  0xe5   : > { %3002 = vmatprep.mubr.bf16.mxu0 %v6761_v62  ;;  %3251 = vmatprep.subr.bf16.mxu0 %v578_v4  ;;  %v620_v4 = vpack.c.bf16 %v508_v59, %v501_v29  ;;  %v348_v59 = vld [vmem:[%s7296_s21 + $0x1f0] sm:$0xff] }
  0xe6   : > { %2649 = vmatprep.mubr.bf16.mxu1 %v6764_v3  ;;  %6007 = vmatpush1.bf16.xpose.msra.mxu1 %v7428_v58  ;;  %v430_v58 = vld [vmem:[%s7296_s21 + $0x480] sm:$0xff]  ;;  %v6797_v3 = vld [vmem:[%s9331_s1 + $0x354] ss:$28 sps:$4 sm:$0xff]  }
  0xe7   : > { %5992 = vmatprep.subr.bf16.mxu1 %v7430_v60  ;;  %v437_v60 = vld [vmem:[%s7296_s21 + $0x4b8] sm:$0xff] }
  0xe8   : > { %v584_v19 = vpack.c.bf16 %v437_v60, %v430_v58  ;;  %v6803_v58 = vld [vmem:[%s9331_s1 + $0x10] ss:$28 sps:$4 sm:$0xff]   ;;  %v418_v60 = vld [vmem:[%s7296_s21 + $0x420] sm:$0xff] }
  0xeb   : > { %3003 = vmatmul.mubr.bf16.gmra.mrb[36].mxu0 %v6763_v44  ;;  %v6799_v44 = vld [vmem:[%s9331_s1 + $0x350] ss:$28 sps:$4 sm:$0xff]  }
  0xec   : > { %3252 = vmatpush1.bf16.xpose.msra.mxu0 %v577_v7  ;;  %2650 = vmatmul.mubr.bf16.gmra.mrb[36].mxu1 %v6766_v8  ;;  %v6802_v7 = vld [vmem:[%s9331_s1 + $0x348] ss:$28 sps:$4 sm:$0xff]   ;;  %v6805_v8 = vld [vmem:[%s9331_s1 + $0x14] ss:$28 sps:$4 sm:$0xff]  }
  0xed   : > { %3012 = vmatprep.mubr.bf16.mxu0 %v6767_v11  ;;  %3253 = vmatprep.subr.bf16.mxu0 %v585_v13  ;;  %v572_v11 = vpack.c.bf16 %v411_v42, %v404_v6  ;;  %v292_v13 = vld [vmem:[%s7296_s21 + $0x30] sm:$0xff]  ;;  %v881_v42 = vld [vmem:[%s9332_s2 + $0x18] sm:$0xff] }
  0xee   : > { %2659 = vmatprep.mubr.bf16.mxu1 %v6770_v5  ;;  %6008 = vmatpush1.bf16.xpose.msra.mxu1 %v7442_v10  ;;  %v6776_v10 = vld [vmem:[%s9331_s1 + $0x26c] ss:$28 sps:$4 sm:$0xff]  }
  0xef   : > { %5993 = vmatprep.subr.bf16.mxu1 %v7444_v12  ;;  %v444_v12 = vld [vmem:[%s7296_s21 + $0x4f0] sm:$0xff]  ;;  %v299_v5 = vld [vmem:[%s7296_s21 + $0x68] sm:$0xff] }
  0xf0   : > { %v591_v0 = vpack.c.bf16 %v451_v24, %v444_v12  ;;  %v6811_v12 = vld [vmem:[%s9331_s1 + $0x48] ss:$28 sps:$4 sm:$0xff]   ;;  %v432_v24 = vld [vmem:[%s7296_s21 + $0x490] sm:$0xff] }
  0xf3   : > { %3013 = vmatmul.mubr.bf16.gmra.mrb[40].mxu0 %v6769_v54 }
  0xf4   : > { %3254 = vmatpush1.bf16.xpose.msra.mxu0 %v584_v19  ;;  %2660 = vmatmul.mubr.bf16.gmra.mrb[40].mxu1 %v6772_v21  ;;  %v6809_v19 = vld [vmem:[%s9331_s1 + $0x4c] ss:$28 sps:$4 sm:$0xff]   ;;  %v579_v21 = vpack.c.bf16 %v425_v52, %v418_v60  ;;  %v6838_v52 = vld [vmem:[%s9331_s1 + $0x498] ss:$28 sps:$4 sm:$0xff]  }
  0xf5   : > { %3022 = vmatprep.mubr.bf16.mxu0 %v6773_v22  ;;  %3255 = vmatprep.subr.bf16.mxu0 %v592_v23  ;;  %v306_v22 = vld [vmem:[%s7296_s21 + $0xa0] sm:$0xff]  ;;  %v313_v23 = vld [vmem:[%s7296_s21 + $0xd8] sm:$0xff] }
  0xf6   : > { %2669 = vmatprep.mubr.bf16.mxu1 %v6776_v10  ;;  %6009 = vmatpush1.bf16.xpose.msra.mxu1 %v7456_v25  ;;  %v6782_v25 = vld [vmem:[%s9331_s1 + $0x2a4] ss:$28 sps:$4 sm:$0xff]   ;;  %v523_v10 = vpack.c.bf16 %v313_v23, %v306_v22  ;;  %v887_v23 = vld [vmem:[%s9332_s2 + $0x48] sm:$0xff] }
  0xf7   : > { %5994 = vmatprep.subr.bf16.mxu1 %v7458_v27  ;;  %v458_v27 = vld [vmem:[%s7296_s21 + $0x560] sm:$0xff] }
  0xf8   : > { %v598_v41 = vpack.c.bf16 %v465_v35, %v458_v27  ;;  %v7195_v35 = vmov 0   ;;  %v6841_v22 = vld [vmem:[%s9331_s1 + $0x160] ss:$28 sps:$4 sm:$0xff]  }
  0xf9   : > { %6705 = vset.pattern.permute.xlu0 %v7195_v35  ;;  %6706 = vset.pattern.permute.xlu1 %v7195_v35  ;;  %v893_v35 = vld [vmem:[%s9332_s2 + $0x78] sm:$0xff] }
  0xfa   : > { %944 = vperm.xlu0 %6705, %v878_v49   ;;  %v495_v49 = vld [vmem:[%s7296_s21 + $0x688] sm:$0xff] }
  0xfb   : > { %3023 = vmatmul.mubr.bf16.gmra.mrb[44].mxu0 %v6775_v33  ;;  %v6815_v33 = vld [vmem:[%s9331_s1 + $0x84] ss:$28 sps:$4 sm:$0xff]  }
  0xfc   : > { %3256 = vmatpush1.bf16.xpose.msra.mxu0 %v591_v0  ;;  %2670 = vmatmul.mubr.bf16.gmra.mrb[44].mxu1 %v6778_v34  ;;  %v6818_v0 = vld [vmem:[%s9331_s1 + $0x3f4] ss:$28 sps:$4 sm:$0xff]   ;;  %v2483_v34 = vsel %vm2382_vm0, %v523_v10, 0 }
  0xfd   : > { %3032 = vmatprep.mubr.bf16.mxu0 %v6779_v2  ;;  %3257 = vmatprep.subr.bf16.mxu0 %v599_v9  ;;  %v586_v2 = vpack.c.bf16 %v439_v26, %v432_v24  ;;  %v320_v9 = vld [vmem:[%s7296_s21 + $0x110] sm:$0xff]  ;;  %v6845_v24 = vld [vmem:[%s9331_s1 + $0x19c] ss:$28 sps:$4 sm:$0xff]   ;;  %v6848_v26 = vld [vmem:[%s9331_s1 + $0x50c] ss:$28 sps:$4 sm:$0xff]  }
  0xfe   : > { %2679 = vmatprep.mubr.bf16.mxu1 %v6782_v25  ;;  %6010 = vmatpush1.bf16.xpose.msra.mxu1 %v7470_v43  ;;  %v6788_v43 = vld [vmem:[%s9331_s1 + $0x2dc] ss:$28 sps:$4 sm:$0xff]   ;;  %v327_v25 = vld [vmem:[%s7296_s21 + $0x148] sm:$0xff]  ;;  %v892_v10 = vld [vmem:[%s9332_s2 + $0x70] sm:$0xff] }
  0xff   : > { %5995 = vmatprep.subr.bf16.mxu1 %v7472_v47  ;;  %v472_v47 = vld [vmem:[%s7296_s21 + $0x5d0] sm:$0xff]  ;;  %v530_v27 = vpack.c.bf16 %v327_v25, %v320_v9  ;;  %v6850_v9 = vld [vmem:[%s9331_s1 + $0x508] ss:$28 sps:$4 sm:$0xff]  }
 0x100   : > { %v605_v51 = vpack.c.bf16 %v479_v17, %v472_v47  ;;  %v334_v47 = vld [vmem:[%s7296_s21 + $0x180] sm:$0xff]  ;;  %v341_v17 = vld [vmem:[%s7296_s21 + $0x1b8] sm:$0xff]  ;;  %v6851_v25 = vld [vmem:[%s9331_s1 + $0x1d4] ss:$28 sps:$4 sm:$0xff]  }
 0x103   : > { %3033 = vmatmul.mubr.bf16.gmra.mrb[48].mxu0 %v6781_v39  ;;  %v453_v39 = vld [vmem:[%s7296_s21 + $0x538] sm:$0xff] }
 0x104   : > { %3258 = vmatpush1.bf16.xpose.msra.mxu0 %v598_v41  ;;  %2680 = vmatmul.mubr.bf16.gmra.mrb[48].mxu1 %v6784_v45  ;;  %v6820_v41 = vld [vmem:[%s9331_s1 + $0x3f0] ss:$28 sps:$4 sm:$0xff]   ;;  %v6821_v45 = vld [vmem:[%s9331_s1 + $0xbc] ss:$28 sps:$4 sm:$0xff]  }
 0x105   : > { %3042 = vmatprep.mubr.bf16.mxu0 %v6785_v14  ;;  %3259 = vmatprep.subr.bf16.mxu0 %v606_v48  ;;  %v6824_v14 = vld [vmem:[%s9331_s1 + $0x42c] ss:$28 sps:$4 sm:$0xff]   ;;  %v2486_v48 = vsel %vm2382_vm0, %v530_v27, 0  ;;  %v6854_v27 = vld [vmem:[%s9331_s1 + $0x544] ss:$28 sps:$4 sm:$0xff]  }
 0x106   : > { %2689 = vmatprep.mubr.bf16.mxu1 %v6788_v43  ;;  %6011 = vmatpush1.bf16.xpose.msra.mxu1 %v7484_v61  ;;  %v6794_v61 = vld [vmem:[%s9331_s1 + $0x314] ss:$28 sps:$4 sm:$0xff]   ;;  %v593_v43 = vpack.c.bf16 %v453_v39, %v446_v37  ;;  %v895_v39 = vld [vmem:[%s9332_s2 + $0x88] sm:$0xff] }
 0x107   : > { %5996 = vmatprep.subr.bf16.mxu1 %v7486_v63  ;;  %v486_v63 = vld [vmem:[%s7296_s21 + $0x640] sm:$0xff]  ;;  %v6853_v37 = vld [vmem:[%s9331_s1 + $0x1d0] ss:$28 sps:$4 sm:$0xff]  }
 0x108   : > { %v612_v62 = vpack.c.bf16 %v493_v57, %v486_v63  ;;  %v6830_v63 = vld [vmem:[%s9331_s1 + $0x464] ss:$28 sps:$4 sm:$0xff]  }
 0x10b   : > { %3043 = vmatmul.mubr.bf16.gmra.mrb[52].mxu0 %v6787_v28  ;;  %v537_v28 = vpack.c.bf16 %v341_v17, %v334_v47  ;;  %v902_v47 = vld [vmem:[%s9332_s2 + $0xc0] sm:$0xff]  ;;  %v488_v17 = vld [vmem:[%s7296_s21 + $0x650] sm:$0xff] }
 0x10c   : > { %3260 = vmatpush1.bf16.xpose.msra.mxu0 %v605_v51  ;;  %2690 = vmatmul.mubr.bf16.gmra.mrb[52].mxu1 %v6790_v30  ;;  %v460_v51 = vld [vmem:[%s7296_s21 + $0x570] sm:$0xff]  ;;  %v467_v30 = vld [vmem:[%s7296_s21 + $0x5a8] sm:$0xff] }
 0x10d   : > { %3052 = vmatprep.mubr.bf16.mxu0 %v6791_v55  ;;  %3261 = vmatprep.subr.bf16.mxu0 %v613_v56  ;;  %v879_v55 = vld [vmem:[%s9332_s2 + $0x8] sm:$0xff]  ;;  %v2489_v57 = vsel %vm2382_vm0, %v537_v28, 0  ;;  %v600_v29 = vpack.c.bf16 %v467_v30, %v460_v51  ;;  %v376_v28 = vld [vmem:[%s7296_s21 + $0x2d0] sm:$0xff] }
 0x10e   : > { %2699 = vmatprep.mubr.bf16.mxu1 %v6794_v61  ;;  %6012 = vmatpush1.bf16.xpose.msra.mxu1 %v7498_v18  ;;  %v6800_v18 = vld [vmem:[%s9331_s1 + $0x34c] ss:$28 sps:$4 sm:$0xff]   ;;  %v6827_v61 = vld [vmem:[%s9331_s1 + $0xf4] ss:$28 sps:$4 sm:$0xff]  }
 0x10f   : > { %5997 = vmatprep.subr.bf16.mxu1 %v7500_v20  ;;  %v500_v20 = vld [vmem:[%s7296_s21 + $0x6b0] sm:$0xff]  ;;  %v6826_v56 = vld [vmem:[%s9331_s1 + $0x428] ss:$28 sps:$4 sm:$0xff]   ;;  %949 = vperm.xlu0 %6705, %v879_v55  }
 0x110   : > { %v619_v46 = vpack.c.bf16 %v507_v40, %v500_v20  ;;  %v6832_v20 = vld [vmem:[%s9331_s1 + $0x460] ss:$28 sps:$4 sm:$0xff]   ;;  %v6833_v40 = vld [vmem:[%s9331_s1 + $0x12c] ss:$28 sps:$4 sm:$0xff]  }
 0x111   : > { %v383_v51 = vld [vmem:[%s7296_s21 + $0x308] sm:$0xff] }
 0x112   : > { %v6859_v30 = vld [vmem:[%s9331_s1 + $0x208] ss:$28 sps:$4 sm:$0xff]  }
 0x113   : > { %3053 = vmatmul.mubr.bf16.gmra.mrb[56].mxu0 %v6793_v32  ;;  %v355_v32 = vld [vmem:[%s7296_s21 + $0x228] sm:$0xff] }
 0x114   : > { %3262 = vmatpush1.bf16.xpose.msra.mxu0 %v612_v62  ;;  %2700 = vmatmul.mubr.bf16.gmra.mrb[56].mxu1 %v6796_v1  ;;  %v882_v62 = vld [vmem:[%s9332_s2 + $0x20] sm:$0xff]  ;;  %v880_v1 = vld [vmem:[%s9332_s2 + $0x10] sm:$0xff]  ;;  %v899_v55 = vld [vmem:[%s9332_s2 + $0xa8] sm:$0xff] }
 0x115   : > { %3062 = vmatprep.mubr.bf16.mxu0 %v6797_v3  ;;  %3263 = vmatprep.subr.bf16.mxu0 %v620_v4  ;;  %v544_v3 = vpack.c.bf16 %v355_v32, %v348_v59  ;;  %v6829_v4 = vld [vmem:[%s9331_s1 + $0xf0] ss:$28 sps:$4 sm:$0xff]   ;;  %v901_v32 = vld [vmem:[%s9332_s2 + $0xb8] sm:$0xff] }
 0x116   : > { %2709 = vmatprep.mubr.bf16.mxu1 %v6800_v18  ;;  %6013 = vmatpush1.bf16.xpose.msra.mxu1 %v7512_v36  ;;  %v6806_v36 = vld [vmem:[%s9331_s1 + $0x384] ss:$28 sps:$4 sm:$0xff]   ;;  %v884_v18 = vld [vmem:[%s9332_s2 + $0x30] sm:$0xff] }
 0x117   : > { %5998 = vmatprep.subr.bf16.mxu1 %v7514_v38  ;;  %v516_v38 = vpack.c.bf16 %v299_v5, %v292_v13  ;;  %964 = vperm.xlu0 %6705, %v882_v62   ;;  %v2492_v6 = vsel %vm2382_vm0, %v544_v3, 0  ;;  %v369_v13 = vld [vmem:[%s7296_s21 + $0x298] sm:$0xff]  ;;  %v6835_v5 = vld [vmem:[%s9331_s1 + $0x128] ss:$28 sps:$4 sm:$0xff]  }
 0x118   : > { %954 = vperm.xlu1 %6706, %v880_v1   ;;  %v906_v62 = vld [vmem:[%s9332_s2 + $0xe0] sm:$0xff]  ;;  %v903_v3 = vld [vmem:[%s9332_s2 + $0xc8] sm:$0xff] }
 0x119   : > { %v2480_v54 = vsel %vm2382_vm0, %v516_v38, 0  ;;  %v883_v38 = vld [vmem:[%s9332_s2 + $0x28] sm:$0xff]  ;;  %v6865_v1 = vld [vmem:[%s9331_s1 + $0x240] ss:$28 sps:$4 sm:$0xff]  }
 0x11b   : > { %3063 = vmatmul.mubr.bf16.gmra.mrb[60].mxu0 %v6799_v44  ;;  %v6836_v44 = vld [vmem:[%s9331_s1 + $0x49c] ss:$28 sps:$4 sm:$0xff]   ;;  %974 = vperm.xlu0 %6705, %v884_v18   ;;  %v6868_v18 = vld [vmem:[%s9331_s1 + $0x5b0] ss:$28 sps:$4 sm:$0xff]  }
 0x11c   : > { %3264 = vmatpush1.bf16.xpose.msra.mxu0 %v619_v46  ;;  %2710 = vmatmul.mubr.bf16.gmra.mrb[60].mxu1 %v6802_v7  ;;  %v886_v46 = vld [vmem:[%s9332_s2 + $0x40] sm:$0xff] }
 0x11d   : > { %3265 = vmatprep.mubr.bf16.mxu0 %v6805_v8  ;;  %2719 = vmatprep.mubr.bf16.mxu1 %v6806_v36  ;;  %v474_v7 = vld [vmem:[%s7296_s21 + $0x5e0] sm:$0xff]  ;;  %v481_v8 = vld [vmem:[%s7296_s21 + $0x618] sm:$0xff] }
 0x11e   : > { %6655 = vmatprep.subr.msk.bf16.mxu0 %vm2382_vm0, %v572_v11  ;;  %6014 = vmatpush1.bf16.xpose.msra.mxu1 %v7524_v53  ;;  %v6812_v53 = vld [vmem:[%s9331_s1 + $0x3bc] ss:$28 sps:$4 sm:$0xff]   ;;  %v607_v36 = vpack.c.bf16 %v481_v8, %v474_v7  ;;  %v362_v11 = vld [vmem:[%s7296_s21 + $0x260] sm:$0xff]  ;;  %v912_v7 = vld [vmem:[%s9332_s2 + $0x110] sm:$0xff] }
 0x11f   : > { %959 = vperm.xlu1 %6706, %v881_v42   ;;  %984 = vperm.xlu0 %6705, %v886_v46   ;;  %v551_v60 = vpack.c.bf16 %v369_v13, %v362_v11  ;;  %v6871_v42 = vld [vmem:[%s9331_s1 + $0x278] ss:$28 sps:$4 sm:$0xff]   ;;  %v907_v46 = vld [vmem:[%s9332_s2 + $0xe8] sm:$0xff]  ;;  %v6878_v11 = vld [vmem:[%s9331_s1 + $0x624] ss:$28 sps:$4 sm:$0xff]  }
 0x120   : > { %v6874_v8 = vld [vmem:[%s9331_s1 + $0x5e8] ss:$28 sps:$4 sm:$0xff]   ;;  %v909_v13 = vld [vmem:[%s9332_s2 + $0xf8] sm:$0xff] }
 0x123   : > { %3266 = vmatmul.mubr.bf16.vlgmr.msra.gmra.mrb[0].mxu0 %v6803_v58  ;;  %v888_v58 = vld [vmem:[%s9332_s2 + $0x50] sm:$0xff]  ;;  %969 = vperm.xlu1 %6706, %v883_v38  }
 0x124   : > { %2720 = vmatmul.mubr.bf16.gmra.mrb[64].mxu1 %v6808_v15  ;;  %5904 = vmatpush3.bf16.xpose.msra.mxu0 %v2480_v54  ;;  %v6839_v15 = vld [vmem:[%s9331_s1 + $0x164] ss:$28 sps:$4 sm:$0xff]   ;;  %v6842_v54 = vld [vmem:[%s9331_s1 + $0x4d4] ss:$28 sps:$4 sm:$0xff]  }
 0x125   : > { %3275 = vmatprep.mubr.bf16.mxu0 %v6809_v19  ;;  %2729 = vmatprep.mubr.bf16.mxu1 %v6812_v53  ;;  %v2495_v19 = vsel %vm2382_vm0, %v551_v60, 0  ;;  %v885_v53 = vld [vmem:[%s9332_s2 + $0x38] sm:$0xff]  ;;  %v6877_v38 = vld [vmem:[%s9331_s1 + $0x2b0] ss:$28 sps:$4 sm:$0xff]  }
 0x126   : > { %6656 = vmatprep.subr.msk.bf16.mxu0 %vm2382_vm0, %v579_v21  ;;  %994 = vperm.xlu0 %6705, %v888_v58   ;;  %v890_v21 = vld [vmem:[%s9332_s2 + $0x60] sm:$0xff]  ;;  %v911_v58 = vld [vmem:[%s9332_s2 + $0x108] sm:$0xff]  ;;  %v916_v60 = vld [vmem:[%s9332_s2 + $0x130] sm:$0xff] }
 0x127   : > { %979 = vperm.xlu1 %6706, %v885_v53   ;;  %v918_v53 = vld [vmem:[%s9332_s2 + $0x140] sm:$0xff] }
 0x12a   : > { %1004 = vperm.xlu0 %6705, %v890_v21   ;;  %v502_v21 = vld [vmem:[%s7296_s21 + $0x6c0] sm:$0xff] }
 0x12b   : > { %3276 = vmatmul.mubr.bf16.gmra.mrb[4].mxu0 %v6811_v12  ;;  %v6844_v12 = vld [vmem:[%s9331_s1 + $0x4d0] ss:$28 sps:$4 sm:$0xff]   ;;  %989 = vperm.xlu1 %6706, %v887_v23  }
 0x12c   : > { %2730 = vmatmul.mubr.bf16.gmra.mrb[68].mxu1 %v6814_v31  ;;  %3285 = vmatprep.mubr.bf16.mxu0 %v6815_v33  ;;  %v889_v31 = vld [vmem:[%s9332_s2 + $0x58] sm:$0xff]  ;;  %v894_v33 = vld [vmem:[%s9332_s2 + $0x80] sm:$0xff] }
 0x12d   : > { %2739 = vmatprep.mubr.bf16.mxu1 %v6818_v0  ;;  %5906 = vmatpush3.bf16.xpose.msra.mxu0 %v2483_v34  ;;  %v6847_v0 = vld [vmem:[%s9331_s1 + $0x198] ss:$28 sps:$4 sm:$0xff]   ;;  %v891_v34 = vld [vmem:[%s9332_s2 + $0x68] sm:$0xff] }
 0x12e   : > { %6657 = vmatprep.subr.msk.bf16.mxu0 %vm2382_vm0, %v586_v2  ;;  %1014 = vperm.xlu0 %6705, %v892_v10   ;;  %v896_v2 = vld [vmem:[%s9332_s2 + $0x90] sm:$0xff]  ;;  %v390_v10 = vld [vmem:[%s7296_s21 + $0x340] sm:$0xff] }
 0x12f   : > { %999 = vperm.xlu1 %6706, %v889_v31   ;;  %v920_v31 = vld [vmem:[%s9332_s2 + $0x150] sm:$0xff] }
 0x132   : > { %1024 = vperm.xlu0 %6705, %v894_v33  }
 0x133   : > { %3286 = vmatmul.mubr.bf16.gmra.mrb[8].mxu0 %v6817_v16  ;;  %1009 = vperm.xlu1 %6706, %v891_v34   ;;  %v898_v16 = vld [vmem:[%s9332_s2 + $0xa0] sm:$0xff] }
 0x134   : > { %2740 = vmatmul.mubr.bf16.gmra.mrb[72].mxu1 %v6820_v41  ;;  %3295 = vmatprep.mubr.bf16.mxu0 %v6821_v45  ;;  %v900_v41 = vld [vmem:[%s9332_s2 + $0xb0] sm:$0xff]  ;;  %v6856_v45 = vld [vmem:[%s9331_s1 + $0x540] ss:$28 sps:$4 sm:$0xff]  }
 0x135   : > { %2749 = vmatprep.mubr.bf16.mxu1 %v6824_v14  ;;  %5908 = vmatpush3.bf16.xpose.msra.mxu0 %v2486_v48  ;;  %v6857_v14 = vld [vmem:[%s9331_s1 + $0x20c] ss:$28 sps:$4 sm:$0xff]   ;;  %v6860_v48 = vld [vmem:[%s9331_s1 + $0x57c] ss:$28 sps:$4 sm:$0xff]   ;;  %v6887_v34 = vld [vmem:[%s9331_s1 + $0x324] ss:$28 sps:$4 sm:$0xff]  }
 0x136   : > { %6658 = vmatprep.subr.msk.bf16.mxu0 %vm2382_vm0, %v593_v43  ;;  %1034 = vperm.xlu0 %6705, %v896_v2   ;;  %v897_v43 = vld [vmem:[%s9332_s2 + $0x98] sm:$0xff]  ;;  %v6890_v2 = vld [vmem:[%s9331_s1 + $0x694] ss:$28 sps:$4 sm:$0xff]  }
 0x137   : > { %1019 = vperm.xlu1 %6706, %v893_v35   ;;  %v6889_v35 = vld [vmem:[%s9331_s1 + $0x320] ss:$28 sps:$4 sm:$0xff]  }
 0x13a   : > { %1044 = vperm.xlu0 %6705, %v898_v16   ;;  %v919_v16 = vld [vmem:[%s9332_s2 + $0x148] sm:$0xff] }
 0x13b   : > { %3296 = vmatmul.mubr.bf16.gmra.mrb[12].mxu0 %v6823_v50  ;;  %1029 = vperm.xlu1 %6706, %v895_v39   ;;  %v614_v50 = vpack.c.bf16 %v495_v49, %v488_v17  ;;  %v6892_v39 = vld [vmem:[%s9331_s1 + $0x690] ss:$28 sps:$4 sm:$0xff]   ;;  %v6898_v49 = vld [vmem:[%s9331_s1 + $0x6c8] ss:$28 sps:$4 sm:$0xff]  }
 0x13c   : > { %2750 = vmatmul.mubr.bf16.gmra.mrb[76].mxu1 %v6826_v56  ;;  %3305 = vmatprep.mubr.bf16.mxu0 %v6827_v61  ;;  %v904_v56 = vld [vmem:[%s9332_s2 + $0xd0] sm:$0xff]  ;;  %v558_v61 = vpack.c.bf16 %v383_v51, %v376_v28  ;;  %v6904_v28 = vld [vmem:[%s9331_s1 + $0x38c] ss:$28 sps:$4 sm:$0xff]   ;;  %v925_v51 = vld [vmem:[%s9332_s2 + $0x178] sm:$0xff] }
 0x13d   : > { %2759 = vmatprep.mubr.bf16.mxu1 %v6830_v63  ;;  %5910 = vmatpush3.bf16.xpose.msra.mxu0 %v2489_v57  ;;  %v6862_v63 = vld [vmem:[%s9331_s1 + $0x578] ss:$28 sps:$4 sm:$0xff]   ;;  %v6863_v57 = vld [vmem:[%s9331_s1 + $0x244] ss:$28 sps:$4 sm:$0xff]  }
 0x13e   : > { %6659 = vmatprep.subr.msk.bf16.mxu0 %vm2382_vm0, %v600_v29  ;;  %1054 = vperm.xlu0 %6705, %v900_v41   ;;  %v6866_v29 = vld [vmem:[%s9331_s1 + $0x5b4] ss:$28 sps:$4 sm:$0xff]   ;;  %v2498_v59 = vsel %vm2382_vm0, %v558_v61, 0  ;;  %v6893_v41 = vld [vmem:[%s9331_s1 + $0x35c] ss:$28 sps:$4 sm:$0xff]  }
 0x13f   : > { %1039 = vperm.xlu1 %6706, %v897_v43   ;;  %v6895_v43 = vld [vmem:[%s9331_s1 + $0x358] ss:$28 sps:$4 sm:$0xff]  }
 0x140   : > { %v928_v17 = vld [vmem:[%s9332_s2 + $0x190] sm:$0xff] }
 0x141   : > { %v932_v61 = vld [vmem:[%s9332_s2 + $0x1b0] sm:$0xff] }
 0x142   : > { %1064 = vperm.xlu0 %6705, %v902_v47   ;;  %v923_v47 = vld [vmem:[%s9332_s2 + $0x168] sm:$0xff] }
 0x143   : > { %3306 = vmatmul.mubr.bf16.gmra.mrb[16].mxu0 %v6829_v4  ;;  %1049 = vperm.xlu1 %6706, %v899_v55   ;;  %v908_v4 = vld [vmem:[%s9332_s2 + $0xf0] sm:$0xff] }
 0x144   : > { %2760 = vmatmul.mubr.bf16.gmra.mrb[80].mxu1 %v6832_v20  ;;  %3315 = vmatprep.mubr.bf16.mxu0 %v6833_v40  ;;  %v6869_v20 = vld [vmem:[%s9331_s1 + $0x27c] ss:$28 sps:$4 sm:$0xff]   ;;  %v6872_v40 = vld [vmem:[%s9331_s1 + $0x5ec] ss:$28 sps:$4 sm:$0xff]  }
 0x145   : > { %2769 = vmatprep.mubr.bf16.mxu1 %v6836_v44  ;;  %5912 = vmatpush3.bf16.xpose.msra.mxu0 %v2492_v6  ;;  %v905_v44 = vld [vmem:[%s9332_s2 + $0xd8] sm:$0xff]  ;;  %v910_v6 = vld [vmem:[%s9332_s2 + $0x100] sm:$0xff]  ;;  %v6901_v55 = vld [vmem:[%s9331_s1 + $0x390] ss:$28 sps:$4 sm:$0xff]  }
 0x146   : > { %6660 = vmatprep.subr.msk.bf16.mxu0 %vm2382_vm0, %v607_v36  ;;  %1074 = vperm.xlu0 %6705, %v904_v56   ;;  %v6875_v36 = vld [vmem:[%s9331_s1 + $0x2b4] ss:$28 sps:$4 sm:$0xff]   ;;  %v927_v56 = vld [vmem:[%s9332_s2 + $0x188] sm:$0xff] }
 0x147   : > { %1059 = vperm.xlu1 %6706, %v901_v32   ;;  %v934_v32 = vld [vmem:[%s9332_s2 + $0x1c0] sm:$0xff] }
 0x14a   : > { %1084 = vperm.xlu0 %6705, %v906_v62   ;;  %v6907_v62 = vld [vmem:[%s9331_s1 + $0x3c8] ss:$28 sps:$4 sm:$0xff]  }
 0x14b   : > { %3316 = vmatmul.mubr.bf16.gmra.mrb[20].mxu0 %v6835_v5  ;;  %1069 = vperm.xlu1 %6706, %v903_v3   ;;  %v914_v5 = vld [vmem:[%s9332_s2 + $0x120] sm:$0xff]  ;;  %v936_v3 = vld [vmem:[%s9332_s2 + $0x1d0] sm:$0xff] }
 0x14c   : > { %2770 = vmatmul.mubr.bf16.gmra.mrb[84].mxu1 %v6838_v52  ;;  %3325 = vmatprep.mubr.bf16.mxu0 %v6839_v15  ;;  %v6880_v52 = vld [vmem:[%s9331_s1 + $0x620] ss:$28 sps:$4 sm:$0xff]   ;;  %v6881_v15 = vld [vmem:[%s9331_s1 + $0x2ec] ss:$28 sps:$4 sm:$0xff]  }
 0x14d   : > { %2779 = vmatprep.mubr.bf16.mxu1 %v6842_v54  ;;  %5914 = vmatpush3.bf16.xpose.msra.mxu0 %v2495_v19  ;;  %v6884_v54 = vld [vmem:[%s9331_s1 + $0x65c] ss:$28 sps:$4 sm:$0xff]  }
 0x14e   : > { %6661 = vmatprep.subr.msk.bf16.mxu0 %vm2382_vm0, %v614_v50  ;;  %1094 = vperm.xlu0 %6705, %v908_v4   ;;  %v913_v19 = vld [vmem:[%s9332_s2 + $0x118] sm:$0xff]  ;;  %v6899_v50 = vld [vmem:[%s9331_s1 + $0x394] ss:$28 sps:$4 sm:$0xff]  }
 0x14f   : > { %1079 = vperm.xlu1 %6706, %v905_v44   ;;  %v6910_v4 = vld [vmem:[%s9331_s1 + $0x3c0] ss:$28 sps:$4 sm:$0xff]  }
 0x150   : > { %v938_v44 = vld [vmem:[%s9332_s2 + $0x1e0] sm:$0xff] }
 0x152   : > { %1104 = vperm.xlu0 %6705, %v910_v6   ;;  %v6913_v6 = vld [vmem:[%s9331_s1 + $0x400] ss:$28 sps:$4 sm:$0xff]  }
 0x153   : > { %3326 = vmatmul.mubr.bf16.gmra.mrb[24].mxu0 %v6841_v22  ;;  %1089 = vperm.xlu1 %6706, %v907_v46   ;;  %v509_v22 = vld [vmem:[%s7296_s21 + $0x6f8] sm:$0xff]  ;;  %v940_v46 = vld [vmem:[%s9332_s2 + $0x1f0] sm:$0xff] }
 0x154   : > { %2780 = vmatmul.mubr.bf16.gmra.mrb[88].mxu1 %v6844_v12  ;;  %3335 = vmatprep.mubr.bf16.mxu0 %v6845_v24  ;;  %v621_v23 = vpack.c.bf16 %v509_v22, %v502_v21  ;;  %v397_v12 = vld [vmem:[%s7296_s21 + $0x378] sm:$0xff]  ;;  %v6883_v24 = vld [vmem:[%s9331_s1 + $0x2e8] ss:$28 sps:$4 sm:$0xff]   ;;  %v4329_v22 = vld [vmem:[%s9334_s4 + $0x30] sm:$0xff]  ;;  %s276_s21 = scalar_lea.vmem [#allocation3], %s5571_s18 }
 0x155   : > { %2789 = vmatprep.mubr.bf16.mxu1 %v6848_v26  ;;  %5916 = vmatpush3.bf16.xpose.msra.mxu0 %v2498_v59  ;;  %v915_v26 = vld [vmem:[%s9332_s2 + $0x128] sm:$0xff]  ;;  %v565_v33 = vpack.c.bf16 %v397_v12, %v390_v10  ;;  %v929_v59 = vld [vmem:[%s9332_s2 + $0x198] sm:$0xff]  ;;  %v6932_v12 = vld [vmem:[%s9331_s1 + $0x4a4] ss:$28 sps:$4 sm:$0xff]   ;;  %s5508_s19 = sshll.u32 %s276_s21, 4  ;;  %s9290_s19 = int_to_ptr.vmem [resolvable:$true] %s5508_s19 }
 0x156   : > { %1114 = vperm.xlu0 %6705, %v912_v7   ;;  %6662 = vmatprep.subr.msk.bf16.mxu0 %vm2382_vm0, %v621_v23  ;;  %v6916_v7 = vld [vmem:[%s9331_s1 + $0x3f8] ss:$28 sps:$4 sm:$0xff]   ;;  %v4324_v21 = vld [vmem:[%s9334_s4 + $0x8] sm:$0xff]  ;;  %s7131_s25 = scalar_lea.vmem %s9290_s19, 32  ;;  %p7138_p0 = scmp.lt.s32.totalorder %s9290_s19, %s7136_s30 }
 0x157   : > { %1099 = vperm.xlu1 %6706, %v909_v13   ;;  %v4323_v13 = vld [vmem:[%s9334_s4] sm:$0xff]  ;;  %v6929_v10 = vld [vmem:[%s9331_s1 + $0x4ac] ss:$28 sps:$4 sm:$0xff]   ;;  %p7132_p11 = scmp.ne.s32.totalorder %s9290_s19, %s7131_s25  ;;  %p7139_p1 = scmp.lt.s32.totalorder %s7137_s9, %s7131_s25 }
 0x158   : > { %v6928_v23 = vld [vmem:[%s9331_s1 + $0x468] ss:$28 sps:$4 sm:$0xff]  }
 0x159   : > { %p7133_p12 = pnand %p7132_p11, %p7276_p5  ;;  %p7140_p2 = por %p7139_p1, %p7138_p0 }
 0x15a   : > { %1124 = vperm.xlu0 %6705, %v914_v5   ;;  %v6919_v5 = vld [vmem:[%s9331_s1 + $0x438] ss:$28 sps:$4 sm:$0xff]  }
 0x15b   : > { %3336 = vmatmul.mubr.bf16.gmra.mrb[28].mxu0 %v6847_v0  ;;  %1109 = vperm.xlu1 %6706, %v911_v58   ;;  %v6886_v0 = vld [vmem:[%s9331_s1 + $0x658] ss:$28 sps:$4 sm:$0xff]   ;;  %p7134_p13 = pneg %p7133_p12 }
 0x15c   : > { %2790 = vmatmul.mubr.bf16.gmra.mrb[92].mxu1 %v6850_v9  ;;  %3345 = vmatprep.mubr.bf16.mxu0 %v6851_v25  ;;  %v2501_v9 = vsel %vm2382_vm0, %v565_v33, 0  ;;  %v917_v25 = vld [vmem:[%s9332_s2 + $0x138] sm:$0xff]  ;;  %v4325_v58 = vld [vmem:[%s9334_s4 + $0x10] sm:$0xff]  ;;  %v4328_v33 = vld [vmem:[%s9334_s4 + $0x28] sm:$0xff] }
 0x15d   : > { %2799 = vmatprep.mubr.bf16.mxu1 %v6854_v27  ;;  %v922_v27 = vld [vmem:[%s9332_s2 + $0x160] sm:$0xff]  ;;  %5918 = vmatpush3.bf16.xpose.msra.mxu0 %v2501_v9  ;;  %v6938_v9 = vld [vmem:[%s9331_s1 + $0x4dc] ss:$28 sps:$4 sm:$0xff]   ;;  %p7141_p3 = pnand %p7140_p2, %p7134_p13 }
 0x15e   : > { %1134 = vperm.xlu0 %6705, %v916_v60   ;;  %v6922_v60 = vld [vmem:[%s9331_s1 + $0x430] ss:$28 sps:$4 sm:$0xff]  }
 0x15f   : > { %1119 = vperm.xlu1 %6706, %v913_v19   ;;  %v4327_v19 = vld [vmem:[%s9334_s4 + $0x20] sm:$0xff] }
 0x162   : > { %1144 = vperm.xlu0 %6705, %v918_v53   ;;  %v6925_v53 = vld [vmem:[%s9331_s1 + $0x470] ss:$28 sps:$4 sm:$0xff]  }
 0x163   : > { %3346 = vmatmul.mubr.bf16.gmra.mrb[32].mxu0 %v6853_v37  ;;  %1129 = vperm.xlu1 %6706, %v915_v26   ;;  %v924_v37 = vld [vmem:[%s9332_s2 + $0x170] sm:$0xff]  ;;  %v4331_v26 = vld [vmem:[%s9334_s4 + $0x40] sm:$0xff] }
 0x164   : > { %2800 = vmatmul.mubr.bf16.gmra.mrb[96].mxu1 %v6856_v45  ;;  %3355 = vmatprep.mubr.bf16.mxu0 %v6857_v14  ;;  %v6896_v45 = vld [vmem:[%s9331_s1 + $0x6cc] ss:$28 sps:$4 sm:$0xff]   ;;  %v921_v14 = vld [vmem:[%s9332_s2 + $0x158] sm:$0xff] }
 0x165   : > { %2809 = vmatprep.mubr.bf16.mxu1 %v6860_v48  ;;  %v926_v48 = vld [vmem:[%s9332_s2 + $0x180] sm:$0xff] }
 0x166   : > { %1154 = vperm.xlu0 %6705, %v920_v31   ;;  %v6931_v31 = vld [vmem:[%s9331_s1 + $0x4a8] ss:$28 sps:$4 sm:$0xff]  }
 0x167   : > { %1139 = vperm.xlu1 %6706, %v917_v25   ;;  %v4330_v25 = vld [vmem:[%s9334_s4 + $0x38] sm:$0xff] }
 0x16a   : > { %1164 = vperm.xlu0 %6705, %v922_v27   ;;  %v4335_v27 = vld [vmem:[%s9334_s4 + $0x60] sm:$0xff] }
 0x16b   : > { %3356 = vmatmul.mubr.bf16.gmra.mrb[36].mxu0 %v6859_v30  ;;  %1149 = vperm.xlu1 %6706, %v919_v16   ;;  %v930_v30 = vld [vmem:[%s9332_s2 + $0x1a0] sm:$0xff]  ;;  %v4332_v16 = vld [vmem:[%s9334_s4 + $0x48] sm:$0xff] }
 0x16c   : > { %2810 = vmatmul.mubr.bf16.gmra.mrb[100].mxu1 %v6862_v63  ;;  %3365 = vmatprep.mubr.bf16.mxu0 %v6863_v57  ;;  %v6902_v63 = vld [vmem:[%s9331_s1 + $0x388] ss:$28 sps:$4 sm:$0xff]  }
 0x16d   : > { %2819 = vmatprep.mubr.bf16.mxu1 %v6866_v29  ;;  %v6905_v57 = vld [vmem:[%s9331_s1 + $0x3cc] ss:$28 sps:$4 sm:$0xff]   ;;  %v6908_v29 = vld [vmem:[%s9331_s1 + $0x3c4] ss:$28 sps:$4 sm:$0xff]  }
 0x16e   : > { %1174 = vperm.xlu0 %6705, %v924_v37   ;;  %v4337_v37 = vld [vmem:[%s9334_s4 + $0x70] sm:$0xff] }
 0x16f   : > { %1159 = vperm.xlu1 %6706, %v921_v14   ;;  %v4334_v14 = vld [vmem:[%s9334_s4 + $0x58] sm:$0xff] }
 0x172   : > { %1184 = vperm.xlu0 %6705, %v926_v48   ;;  %v4339_v48 = vld [vmem:[%s9334_s4 + $0x80] sm:$0xff] }
 0x173   : > { %3366 = vmatmul.mubr.bf16.gmra.mrb[40].mxu0 %v6865_v1  ;;  %1169 = vperm.xlu1 %6706, %v923_v47   ;;  %v931_v1 = vld [vmem:[%s9332_s2 + $0x1a8] sm:$0xff] }
 0x174   : > { %2820 = vmatmul.mubr.bf16.gmra.mrb[104].mxu1 %v6868_v18  ;;  %3375 = vmatprep.mubr.bf16.mxu0 %v6869_v20  ;;  %v6911_v18 = vld [vmem:[%s9331_s1 + $0x404] ss:$28 sps:$4 sm:$0xff]   ;;  %v6914_v20 = vld [vmem:[%s9331_s1 + $0x3fc] ss:$28 sps:$4 sm:$0xff]   ;;  %v4336_v47 = vld [vmem:[%s9334_s4 + $0x68] sm:$0xff] }
 0x175   : > { %2829 = vmatprep.mubr.bf16.mxu1 %v6872_v40  ;;  %v933_v40 = vld [vmem:[%s9332_s2 + $0x1b8] sm:$0xff] }
 0x176   : > { %1194 = vperm.xlu0 %6705, %v928_v17   ;;  %v4341_v17 = vld [vmem:[%s9334_s4 + $0x90] sm:$0xff] }
 0x177   : > { %1179 = vperm.xlu1 %6706, %v925_v51   ;;  %v4338_v51 = vld [vmem:[%s9334_s4 + $0x78] sm:$0xff] }
 0x17a   : > { %1204 = vperm.xlu0 %6705, %v930_v30   ;;  %v4343_v30 = vld [vmem:[%s9334_s4 + $0xa0] sm:$0xff] }
 0x17b   : > { %3376 = vmatmul.mubr.bf16.gmra.mrb[44].mxu0 %v6871_v42  ;;  %1189 = vperm.xlu1 %6706, %v927_v56   ;;  %v935_v42 = vld [vmem:[%s9332_s2 + $0x1c8] sm:$0xff] }
 0x17c   : > { %2830 = vmatmul.mubr.bf16.gmra.mrb[108].mxu1 %v6874_v8  ;;  %3385 = vmatprep.mubr.bf16.mxu0 %v6875_v36  ;;  %v6917_v8 = vld [vmem:[%s9331_s1 + $0x43c] ss:$28 sps:$4 sm:$0xff]   ;;  %v6920_v36 = vld [vmem:[%s9331_s1 + $0x434] ss:$28 sps:$4 sm:$0xff]   ;;  %v4340_v56 = vld [vmem:[%s9334_s4 + $0x88] sm:$0xff] }
 0x17d   : > { %2839 = vmatprep.mubr.bf16.mxu1 %v6878_v11  ;;  %v937_v11 = vld [vmem:[%s9332_s2 + $0x1d8] sm:$0xff] }
 0x17e   : > { %1214 = vperm.xlu0 %6705, %v932_v61   ;;  %v4345_v61 = vld [vmem:[%s9334_s4 + $0xb0] sm:$0xff] }
 0x17f   : > { %1199 = vperm.xlu1 %6706, %v929_v59   ;;  %v4342_v59 = vld [vmem:[%s9334_s4 + $0x98] sm:$0xff] }
 0x182   : > { %1224 = vperm.xlu0 %6705, %v934_v32   ;;  %v4347_v32 = vld [vmem:[%s9334_s4 + $0xc0] sm:$0xff] }
 0x183   : > { %3386 = vmatmul.mubr.bf16.gmra.mrb[48].mxu0 %v6877_v38  ;;  %1209 = vperm.xlu1 %6706, %v931_v1   ;;  %v939_v38 = vld [vmem:[%s9332_s2 + $0x1e8] sm:$0xff] }
 0x184   : > { %2840 = vmatmul.mubr.bf16.gmra.mrb[112].mxu1 %v6880_v52  ;;  %3395 = vmatprep.mubr.bf16.mxu0 %v6881_v15  ;;  %v6923_v52 = vld [vmem:[%s9331_s1 + $0x474] ss:$28 sps:$4 sm:$0xff]   ;;  %v6926_v15 = vld [vmem:[%s9331_s1 + $0x46c] ss:$28 sps:$4 sm:$0xff]  }
 0x185   : > { %2849 = vmatprep.mubr.bf16.mxu1 %v6884_v54  ;;  %v941_v54 = vld [vmem:[%s9332_s2 + $0x1f8] sm:$0xff]  ;;  %v4344_v1 = vld [vmem:[%s9334_s4 + $0xa8] sm:$0xff] }
 0x186   : > { %1234 = vperm.xlu0 %6705, %v936_v3   ;;  %v4349_v3 = vld [vmem:[%s9334_s4 + $0xd0] sm:$0xff] }
 0x187   : > { %1219 = vperm.xlu1 %6706, %v933_v40   ;;  %v4346_v40 = vld [vmem:[%s9334_s4 + $0xb8] sm:$0xff] }
 0x18a   : > { %1244 = vperm.xlu0 %6705, %v938_v44   ;;  %v4351_v44 = vld [vmem:[%s9334_s4 + $0xe0] sm:$0xff] }
 0x18b   : > { %3396 = vmatmul.mubr.bf16.gmra.mrb[52].mxu0 %v6883_v24  ;;  %1229 = vperm.xlu1 %6706, %v935_v42   ;;  %v4326_v24 = vld [vmem:[%s9334_s4 + $0x18] sm:$0xff] }
 0x18c   : > { %2850 = vmatmul.mubr.bf16.gmra.mrb[116].mxu1 %v6886_v0  ;;  %3405 = vmatprep.mubr.bf16.mxu0 %v6887_v34  ;;  %v4333_v0 = vld [vmem:[%s9334_s4 + $0x50] sm:$0xff]  ;;  %v6934_v34 = vld [vmem:[%s9331_s1 + $0x4a0] ss:$28 sps:$4 sm:$0xff]  }
 0x18d   : > { %2859 = vmatprep.mubr.bf16.mxu1 %v6890_v2  ;;  %v6935_v2 = vld [vmem:[%s9331_s1 + $0x4e4] ss:$28 sps:$4 sm:$0xff]  }
 0x18e   : > { %1254 = vperm.xlu0 %6705, %v940_v46  }
 0x18f   : > { %1239 = vperm.xlu1 %6706, %v937_v11   ;;  %v6964_v11 = vld [vmem:[%s9331_s1 + $0x5b8] ss:$28 sps:$4 sm:$0xff]  }
 0x192   : > { %4357 = vperm.xlu0 %6705, %v4323_v13   ;;  %v6965_v13 = vld [vmem:[%s9331_s1 + $0x5fc] ss:$28 sps:$4 sm:$0xff]  }
 0x193   : > { %3406 = vmatmul.mubr.bf16.gmra.mrb[56].mxu0 %v6889_v35  ;;  %1249 = vperm.xlu1 %6706, %v939_v38   ;;  %v6937_v35 = vld [vmem:[%s9331_s1 + $0x4e0] ss:$28 sps:$4 sm:$0xff]  }
 0x194   : > { %2860 = vmatmul.mubr.bf16.gmra.mrb[120].mxu1 %v6892_v39  ;;  %3415 = vmatprep.mubr.bf16.mxu0 %v6893_v41  ;;  %v6940_v39 = vld [vmem:[%s9331_s1 + $0x4d8] ss:$28 sps:$4 sm:$0xff]  }
 0x195   : > { %2869 = vmatprep.mubr.bf16.mxu1 %v6896_v45  ;;  %v6941_v41 = vld [vmem:[%s9331_s1 + $0x51c] ss:$28 sps:$4 sm:$0xff]   ;;  %v6944_v45 = vld [vmem:[%s9331_s1 + $0x514] ss:$28 sps:$4 sm:$0xff]  }
 0x196   : > { %4367 = vperm.xlu0 %6705, %v4325_v58   ;;  %v4350_v38 = vld [vmem:[%s9334_s4 + $0xd8] sm:$0xff]  ;;  %v5382_v58 = vld [vmem:[#allocation2] sm:$0x1] }
 0x197   : > { %1259 = vperm.xlu1 %6706, %v941_v54   ;;  %v6967_v54 = vld [vmem:[%s9331_s1 + $0x5f8] ss:$28 sps:$4 sm:$0xff]  }
 0x19a   : > { %4377 = vperm.xlu0 %6705, %v4327_v19   ;;  %v4352_v19 = vld [vmem:[%s9334_s4 + $0xe8] sm:$0xff] }
 0x19b   : > { %3416 = vmatmul.mubr.bf16.gmra.mrb[60].mxu0 %v6895_v43  ;;  %4362 = vperm.xlu1 %6706, %v4324_v21   ;;  %v6943_v43 = vld [vmem:[%s9331_s1 + $0x518] ss:$28 sps:$4 sm:$0xff]   ;;  %v6970_v21 = vld [vmem:[%s9331_s1 + $0x5f0] ss:$28 sps:$4 sm:$0xff]  }
 0x19c   : > { %2870 = vmatmul.mubr.bf16.gmra.mrb[124].mxu1 %v6898_v49  ;;  %3425 = vmatprep.mubr.bf16.mxu0 %v6899_v50  ;;  %v6946_v49 = vld [vmem:[%s9331_s1 + $0x510] ss:$28 sps:$4 sm:$0xff]  }
 0x19d   : > { %3072 = vmatprep.mubr.bf16.mxu1 %v6904_v28  ;;  %v6947_v50 = vld [vmem:[%s9331_s1 + $0x554] ss:$28 sps:$4 sm:$0xff]   ;;  %v6950_v28 = vld [vmem:[%s9331_s1 + $0x54c] ss:$28 sps:$4 sm:$0xff]  }
 0x19e   : > { %4387 = vperm.xlu0 %6705, %v4329_v22   ;;  %v6971_v22 = vld [vmem:[%s9331_s1 + $0x634] ss:$28 sps:$4 sm:$0xff]  }
 0x19f   : > { %4372 = vperm.xlu1 %6706, %v4326_v24  }
 0x1a2   : > { %4397 = vperm.xlu0 %6705, %v4331_v26  }
 0x1a3   : > { %3426 = vmatmul.mubr.bf16.gmra.mrb[64].mxu0 %v6901_v55  ;;  %4382 = vperm.xlu1 %6706, %v4328_v33   ;;  %v6949_v55 = vld [vmem:[%s9331_s1 + $0x550] ss:$28 sps:$4 sm:$0xff]  }
 0x1a4   : > { %3073 = vmatmul.mubr.bf16.vlgmr.msra.gmra.mrb[64].mxu1 %v6902_v63  ;;  %3435 = vmatprep.mubr.bf16.mxu0 %v6905_v57  ;;  %v6952_v63 = vld [vmem:[%s9331_s1 + $0x548] ss:$28 sps:$4 sm:$0xff]  }
 0x1a5   : > { %3082 = vmatprep.mubr.bf16.mxu1 %v6908_v29  ;;  %v6953_v57 = vld [vmem:[%s9331_s1 + $0x58c] ss:$28 sps:$4 sm:$0xff]   ;;  %v6956_v29 = vld [vmem:[%s9331_s1 + $0x584] ss:$28 sps:$4 sm:$0xff]  }
 0x1a6   : > { %4407 = vperm.xlu0 %6705, %v4333_v0   ;;  %v6976_v0 = vld [vmem:[%s9331_s1 + $0x628] ss:$28 sps:$4 sm:$0xff]  }
 0x1a7   : > { %4392 = vperm.xlu1 %6706, %v4330_v25  }
 0x1aa   : > { %4417 = vperm.xlu0 %6705, %v4335_v27  }
 0x1ab   : > { %3436 = vmatmul.mubr.bf16.gmra.mrb[68].mxu0 %v6907_v62  ;;  %4402 = vperm.xlu1 %6706, %v4332_v16   ;;  %v6955_v62 = vld [vmem:[%s9331_s1 + $0x588] ss:$28 sps:$4 sm:$0xff]  }
 0x1ac   : > { %3083 = vmatmul.mubr.bf16.gmra.mrb[68].mxu1 %v6910_v4  ;;  %3445 = vmatprep.mubr.bf16.mxu0 %v6911_v18  ;;  %v6958_v4 = vld [vmem:[%s9331_s1 + $0x580] ss:$28 sps:$4 sm:$0xff]  }
 0x1ad   : > { %3092 = vmatprep.mubr.bf16.mxu1 %v6914_v20  ;;  %v6959_v18 = vld [vmem:[%s9331_s1 + $0x5c4] ss:$28 sps:$4 sm:$0xff]   ;;  %v6962_v20 = vld [vmem:[%s9331_s1 + $0x5bc] ss:$28 sps:$4 sm:$0xff]  }
 0x1ae   : > { %4427 = vperm.xlu0 %6705, %v4337_v37   ;;  %v6979_v37 = vld [vmem:[%s9331_s1 + $0x668] ss:$28 sps:$4 sm:$0xff]  }
 0x1af   : > { %4412 = vperm.xlu1 %6706, %v4334_v14  }
 0x1b2   : > { %4437 = vperm.xlu0 %6705, %v4339_v48   ;;  %v6986_v48 = vld [vmem:[%s9331_s1 + $0x69c] ss:$28 sps:$4 sm:$0xff]  }
 0x1b3   : > { %3446 = vmatmul.mubr.bf16.gmra.mrb[72].mxu0 %v6913_v6  ;;  %4422 = vperm.xlu1 %6706, %v4336_v47   ;;  %v8446_v6 = vpop.f32.mrb[0].mxu1 }
 0x1b4   : > { %3093 = vmatmul.mubr.bf16.gmra.mrb[72].mxu1 %v6916_v7  ;;  %3455 = vmatprep.mubr.bf16.mxu0 %v6917_v8  ;;  %v8448_v42 = vpop.f32.mrb[1].mxu1  ;;  %v6961_v7 = vld [vmem:[%s9331_s1 + $0x5c0] ss:$28 sps:$4 sm:$0xff]   ;;  %v4348_v8 = vld [vmem:[%s9334_s4 + $0xc8] sm:$0xff] }
 0x1b5   : > { %3102 = vmatprep.mubr.bf16.mxu1 %v6920_v36  ;;  %v8450_v46 = vpop.f32.mrb[2].mxu1  ;;  %v4353_v36 = vld [vmem:[%s9334_s4 + $0xf0] sm:$0xff] }
 0x1b6   : > { %4447 = vperm.xlu0 %6705, %v4341_v17  }
 0x1b7   : > { %4432 = vperm.xlu1 %6706, %v4338_v51   ;;  %v6988_v51 = vld [vmem:[%s9331_s1 + $0x698] ss:$28 sps:$4 sm:$0xff]  }
 0x1ba   : > { %4457 = vperm.xlu0 %6705, %v4343_v30   ;;  %v6989_v30 = vld [vmem:[%s9331_s1 + $0x6dc] ss:$28 sps:$4 sm:$0xff]  }
 0x1bb   : > { %3456 = vmatmul.mubr.bf16.gmra.mrb[76].mxu0 %v6919_v5  ;;  %4442 = vperm.xlu1 %6706, %v4340_v56   ;;  %v6968_v5 = vld [vmem:[%s9331_s1 + $0x5f4] ss:$28 sps:$4 sm:$0xff]  }
 0x1bc   : > { %3103 = vmatmul.mubr.bf16.gmra.mrb[76].mxu1 %v6922_v60  ;;  %3465 = vmatprep.mubr.bf16.mxu0 %v6923_v52  ;;  %v8473_v60 = vpop.f32.mrb[3].mxu1  ;;  %v6992_v56 = vld [vmem:[%s9331_s1 + $0x6d4] ss:$28 sps:$4 sm:$0xff]  }
 0x1bd   : > { %3112 = vmatprep.mubr.bf16.mxu1 %v6926_v15  ;;  %v8475_v52 = vpop.f32.mrb[4].mxu1 }
 0x1be   : > { %4467 = vperm.xlu0 %6705, %v4345_v61   ;;  %v8477_v15 = vpop.f32.mrb[5].mxu1 }
 0x1bf   : > { %4452 = vperm.xlu1 %6706, %v4342_v59  }
 0x1c2   : > { %4477 = vperm.xlu0 %6705, %v4347_v32  }
 0x1c3   : > { %3466 = vmatmul.mubr.bf16.gmra.mrb[80].mxu0 %v6925_v53  ;;  %4462 = vperm.xlu1 %6706, %v4344_v1   ;;  %v8485_v53 = vpop.f32.mrb[6].mxu1 }
 0x1c4   : > { %3113 = vmatmul.mubr.bf16.gmra.mrb[80].mxu1 %v6928_v23  ;;  %3475 = vmatprep.mubr.bf16.mxu0 %v6929_v10  ;;  %v6974_v23 = vld [vmem:[%s9331_s1 + $0x62c] ss:$28 sps:$4 sm:$0xff]   ;;  %v4354_v10 = vld [vmem:[%s9334_s4 + $0xf8] sm:$0xff] }
 0x1c5   : > { %3122 = vmatprep.mubr.bf16.mxu1 %v6932_v12  ;;  %v8499_v12 = vpop.f32.mrb[7].mxu1 }
 0x1c6   : > { %4487 = vperm.xlu0 %6705, %v4349_v3   ;;  %v8501_v24 = vpop.f32.mrb[8].mxu1  ;;  %v6994_v3 = vld [vmem:[%s9331_s1 + $0x6d0] ss:$28 sps:$4 sm:$0xff]  }
 0x1c7   : > { %4472 = vperm.xlu1 %6706, %v4346_v40   ;;  %v8503_v26 = vpop.f32.mrb[9].mxu1 }
 0x1c8   : > { %v8508_v33 = vpop.f32.mrb[10].mxu1 }
 0x1ca   : > { %4497 = vperm.xlu0 %6705, %v4351_v44  }
 0x1cb   : > { %3476 = vmatmul.mubr.bf16.gmra.mrb[84].mxu0 %v6931_v31  ;;  %4482 = vperm.xlu1 %6706, %v4348_v8   ;;  %v6973_v31 = vld [vmem:[%s9331_s1 + $0x630] ss:$28 sps:$4 sm:$0xff]  }
 0x1cc   : > { %3123 = vmatmul.mubr.bf16.gmra.mrb[84].mxu1 %v6934_v34  ;;  %3485 = vmatprep.mubr.bf16.mxu0 %v6935_v2  ;;  %v6977_v34 = vld [vmem:[%s9331_s1 + $0x66c] ss:$28 sps:$4 sm:$0xff]   ;;  %v8516_v2 = vpop.f32.mrb[11].mxu1 }
 0x1cd   : > { %3132 = vmatprep.mubr.bf16.mxu1 %v6938_v9  ;;  %v6980_v9 = vld [vmem:[%s9331_s1 + $0x664] ss:$28 sps:$4 sm:$0xff]   ;;  %v8521_v25 = vpop.f32.mrb[12].mxu1 }
 0x1ce   : > { %4507 = vperm.xlu0 %6705, %v4353_v36   ;;  %v8523_v27 = vpop.f32.mrb[13].mxu1 }
 0x1cf   : > { %4492 = vperm.xlu1 %6706, %v4350_v38  }
 0x1d2   : > { %5385 = vperm.xlu0 %6705, %v5382_v58  }
 0x1d3   : > { %3486 = vmatmul.mubr.bf16.gmra.mrb[88].mxu0 %v6937_v35  ;;  %4502 = vperm.xlu1 %6706, %v4352_v19   ;;  %v8525_v35 = vpop.f32.mrb[14].mxu1 }
 0x1d4   : > { %3133 = vmatmul.mubr.bf16.gmra.mrb[88].mxu1 %v6940_v39  ;;  %3495 = vmatprep.mubr.bf16.mxu0 %v6941_v41  ;;  %v8527_v16 = vpop.f32.mrb[15].mxu1  ;;  %v6982_v41 = vld [vmem:[%s9331_s1 + $0x660] ss:$28 sps:$4 sm:$0xff]  }
 0x1d5   : > { %3142 = vmatprep.mubr.bf16.mxu1 %v6944_v45  ;;  %v8532_v39 = vpop.f32.mrb[16].mxu1  ;;  %v6983_v45 = vld [vmem:[%s9331_s1 + $0x6a4] ss:$28 sps:$4 sm:$0xff]  }
 0x1d6   : > { %v8540_v14 = vpop.f32.mrb[17].mxu1 }
 0x1d7   : > { %4512 = vperm.xlu1 %6706, %v4354_v10   ;;  %v6997_v10 = vld [vmem:[%s9331_s1 + $0x88] ss:$28 sps:$4 sm:$0xff]  }
 0x1db   : > { %3496 = vmatmul.mubr.bf16.gmra.mrb[92].mxu0 %v6943_v43  ;;  %v8545_v43 = vpop.f32.mrb[18].mxu1 }
 0x1dc   : > { %3143 = vmatmul.mubr.bf16.gmra.mrb[92].mxu1 %v6946_v49  ;;  %3505 = vmatprep.mubr.bf16.mxu0 %v6947_v50  ;;  %v8547_v47 = vpop.f32.mrb[19].mxu1  ;;  %v6985_v50 = vld [vmem:[%s9331_s1 + $0x6a0] ss:$28 sps:$4 sm:$0xff]  }
 0x1dd   : > { %3152 = vmatprep.mubr.bf16.mxu1 %v6950_v28  ;;  %v8549_v17 = vpop.f32.mrb[20].mxu1 }
 0x1de   : > { %v8551_v49 = vpop.f32.mrb[21].mxu1 }
 0x1df   : > { %v8556_v28 = vpop.f32.mrb[22].mxu1 }
 0x1e3   : > { %3506 = vmatmul.mubr.bf16.gmra.mrb[96].mxu0 %v6949_v55  ;;  %v8564_v55 = vpop.f32.mrb[23].mxu1 }
 0x1e4   : > { %3153 = vmatmul.mubr.bf16.gmra.mrb[96].mxu1 %v6952_v63  ;;  %3515 = vmatprep.mubr.bf16.mxu0 %v6953_v57  ;;  %v8569_v61 = vpop.f32.mrb[24].mxu1 }
 0x1e5   : > { %3162 = vmatprep.mubr.bf16.mxu1 %v6956_v29  ;;  %v8571_v63 = vpop.f32.mrb[25].mxu1 }
 0x1e6   : > { %v8573_v57 = vpop.f32.mrb[26].mxu1 }
 0x1e7   : > { %v8575_v29 = vpop.f32.mrb[27].mxu1 }
 0x1e8   : > { %v8577_v59 = vpop.f32.mrb[28].mxu1 }
 0x1e9   : > { %v8579_v32 = vpop.f32.mrb[29].mxu1 }
 0x1ea   : > { %v8584_v1 = vpop.f32.mrb[30].mxu1 }
 0x1eb   : > { %3516 = vmatmul.mubr.bf16.gmra.mrb[100].mxu0 %v6955_v62  ;;  %v6991_v62 = vld [vmem:[%s9331_s1 + $0x6d8] ss:$28 sps:$4 sm:$0xff]  }
 0x1ec   : > { %3163 = vmatmul.mubr.bf16.gmra.mrb[100].mxu1 %v6958_v4  ;;  %3525 = vmatprep.mubr.bf16.mxu0 %v6959_v18  ;;  %v6995_v4 = vld [vmem:[%s9331_s1 + $0x18] ss:$28 sps:$4 sm:$0xff]   ;;  %v8592_v18 = vpop.f32.mrb[31].mxu1 }
 0x1ed   : > { %3172 = vmatprep.mubr.bf16.mxu1 %v6962_v20  ;;  %v8594_v20 = vpop.f32.mrb[32].mxu1 }
 0x1ee   : > { %v8596_v40 = vpop.f32.mrb[33].mxu1 }
 0x1ef   : > { %v8598_v44 = vpop.f32.mrb[34].mxu1 }
 0x1f3   : > { %3526 = vmatmul.mubr.bf16.gmra.mrb[104].mxu0 %v6961_v7  ;;  %v8601_v7 = vpop.f32.mrb[35].mxu1 }
 0x1f4   : > { %3173 = vmatmul.mubr.bf16.gmra.mrb[104].mxu1 %v6964_v11  ;;  %3535 = vmatprep.mubr.bf16.mxu0 %v6965_v13  ;;  %v8603_v8 = vpop.f32.mrb[36].mxu1  ;;  %v6996_v13 = vld [vmem:[%s9331_s1 + $0x50] ss:$28 sps:$4 sm:$0xff]  }
 0x1f5   : > { %3182 = vmatprep.mubr.bf16.mxu1 %v6968_v5  ;;  %v8605_v36 = vpop.f32.mrb[37].mxu1 }
 0x1f6   : > { %v8607_v11 = vpop.f32.mrb[38].mxu1 }
 0x1f7   : > { %v8612_v5 = vpop.f32.mrb[39].mxu1 }
 0x1f8   : > { %v8614_v38 = vpop.f32.mrb[40].mxu1 }
 0x1f9   : > { %v8616_v58 = vpop.f32.mrb[41].mxu1 }
 0x1fa   : > { %9340 = vst [vmem:[#allocation6_spill] sm:$0xff] %v8616_v58 }
 0x1fb   : > { %3536 = vmatmul.mubr.bf16.gmra.mrb[108].mxu0 %v6967_v54  ;;  %v8619_v54 = vpop.f32.mrb[42].mxu1 }
 0x1fc   : > { %3183 = vmatmul.mubr.bf16.gmra.mrb[108].mxu1 %v6970_v21  ;;  %3545 = vmatprep.mubr.bf16.mxu0 %v6971_v22  ;;  %9341 = vst [vmem:[#allocation7_spill] sm:$0xff] %v8619_v54  ;;  %v8622_v19 = vpop.f32.mrb[43].mxu1 }
 0x1fd   : > { %3192 = vmatprep.mubr.bf16.mxu1 %v6974_v23  ;;  %9342 = vst [vmem:[#allocation8_spill] sm:$0xff] %v8622_v19  ;;  %v8624_v21 = vpop.f32.mrb[44].mxu1 }
 0x1fe   : > { %9343 = vst [vmem:[#allocation9_spill] sm:$0xff] %v8624_v21  ;;  %v8626_v22 = vpop.f32.mrb[45].mxu1 }
 0x1ff   : > { %9344 = vst [vmem:[#allocation10_spill] sm:$0xff] %v8626_v22  ;;  %v8628_v23 = vpop.f32.mrb[46].mxu1 }
 0x200   : > { %9345 = vst [vmem:[#allocation11_spill] sm:$0xff] %v8628_v23 }
 0x203   : > { %3546 = vmatmul.mubr.bf16.gmra.mrb[112].mxu0 %v6973_v31  ;;  %v8633_v31 = vpop.f32.mrb[47].mxu1 }
 0x204   : > { %3193 = vmatmul.mubr.bf16.gmra.mrb[112].mxu1 %v6976_v0  ;;  %3555 = vmatprep.mubr.bf16.mxu0 %v6977_v34  ;;  %9346 = vst [vmem:[#allocation12_spill] sm:$0xff] %v8633_v31  ;;  %v8635_v0 = vpop.f32.mrb[48].mxu1 }
 0x205   : > { %3202 = vmatprep.mubr.bf16.mxu1 %v6980_v9  ;;  %9347 = vst [vmem:[#allocation13_spill] sm:$0xff] %v8635_v0  ;;  %v8637_v34 = vpop.f32.mrb[49].mxu1 }
 0x206   : > { %9348 = vst [vmem:[#allocation14_spill] sm:$0xff] %v8637_v34  ;;  %v8640_v9 = vpop.f32.mrb[50].mxu1 }
 0x207   : > { %9349 = vst [vmem:[#allocation15_spill] sm:$0xff] %v8640_v9 }
 0x20b   : > { %3556 = vmatmul.mubr.bf16.gmra.mrb[116].mxu0 %v6979_v37  ;;  %v8643_v37 = vpop.f32.mrb[51].mxu1 }
 0x20c   : > { %3203 = vmatmul.mubr.bf16.gmra.mrb[116].mxu1 %v6982_v41  ;;  %3565 = vmatprep.mubr.bf16.mxu0 %v6983_v45  ;;  %9350 = vst [vmem:[#allocation16_spill] sm:$0xff] %v8643_v37  ;;  %v8645_v41 = vpop.f32.mrb[52].mxu1 }
 0x20d   : > { %3212 = vmatprep.mubr.bf16.mxu1 %v6986_v48  ;;  %9351 = vst [vmem:[#allocation17_spill] sm:$0xff] %v8645_v41  ;;  %v8647_v45 = vpop.f32.mrb[53].mxu1 }
 0x20e   : > { %9352 = vst [vmem:[#allocation18_spill] sm:$0xff] %v8647_v45  ;;  %v8649_v48 = vpop.f32.mrb[54].mxu1 }
 0x20f   : > { %9353 = vst [vmem:[#allocation19_spill] sm:$0xff] %v8649_v48 }
 0x213   : > { %3566 = vmatmul.mubr.bf16.gmra.mrb[120].mxu0 %v6985_v50  ;;  %v6998_v50 = vld [vmem:[%s9331_s1 + $0xc0] ss:$28 sps:$4 sm:$0xff]  }
 0x214   : > { %3213 = vmatmul.mubr.bf16.gmra.mrb[120].mxu1 %v6988_v51  ;;  %3575 = vmatprep.mubr.bf16.mxu0 %v6989_v30  ;;  %v8654_v51 = vpop.f32.mrb[55].mxu1 }
 0x215   : > { %3222 = vmatprep.mubr.bf16.mxu1 %v6992_v56  ;;  %9354 = vst [vmem:[#allocation20_spill] sm:$0xff] %v8654_v51  ;;  %v8656_v30 = vpop.f32.mrb[56].mxu1 }
 0x216   : > { %9355 = vst [vmem:[#allocation21_spill] sm:$0xff] %v8656_v30  ;;  %v8658_v56 = vpop.f32.mrb[57].mxu1  ;;  %v6999_v30 = vld [vmem:[%s9331_s1 + $0xf8] ss:$28 sps:$4 sm:$0xff]  }
 0x217   : > { %9356 = vst [vmem:[#allocation22_spill] sm:$0xff] %v8658_v56 }
 0x21b   : > { %3576 = vmatmul.mubr.bf16.gmra.mrb[124].mxu0 %v6991_v62  ;;  %v8661_v62 = vpop.f32.mrb[58].mxu1 }
 0x21c   : > { %3223 = vmatmul.mubr.bf16.gmra.mrb[124].mxu1 %v6994_v3  ;;  %5919 = vmatprep.mubr.msk.bf16.mxu0 %vm2382_vm0, %v6995_v4  ;;  %9357 = vst [vmem:[#allocation23_spill] sm:$0xff] %v8661_v62  ;;  %v8664_v3 = vpop.f32.mrb[59].mxu1 }
 0x21d   : > { %9358 = vst [vmem:[#allocation24_spill] sm:$0xff] %v8664_v3 }
 0x223   : > { %5920 = vmatmul.mubr.msk.bf16.vlgmr.msra.gmra.mrb[0].mxu0 %vm2382_vm0, %v6995_v4  ;;  %v8666_v4 = vpop.f32.mrb[60].mxu1 }
 0x224   : > { %5921 = vmatprep.mubr.msk.bf16.mxu0 %vm2382_vm0, %v6996_v13  ;;  %9359 = vst [vmem:[#allocation25_spill] sm:$0xff] %v8666_v4 }
 0x22b   : > { %5922 = vmatmul.mubr.msk.bf16.gmra.mrb[4].mxu0 %vm2382_vm0, %v6996_v13  ;;  %v8668_v13 = vpop.f32.mrb[61].mxu1 }
 0x22c   : > { %5923 = vmatprep.mubr.msk.bf16.mxu0 %vm2382_vm0, %v6997_v10  ;;  %9360 = vst [vmem:[#allocation26_spill] sm:$0xff] %v8668_v13  ;;  %v8670_v48 = vpop.f32.mrb[62].mxu1 }
 0x22d   : > { %9361 = vst [vmem:[#allocation27_spill] sm:$0xff] %v8670_v48  ;;  %v8675_v51 = vpop.f32.mrb[63].mxu1  ;;  %v7001_v48 = vld [vmem:[%s9331_s1 + $0x168] ss:$28 sps:$4 sm:$0xff]  }
 0x22e   : > { %9362 = vst [vmem:[#allocation28_spill] sm:$0xff] %v8675_v51 }
 0x233   : > { %5924 = vmatmul.mubr.msk.bf16.gmra.mrb[8].mxu0 %vm2382_vm0, %v6997_v10  ;;  %v7000_v10 = vld [vmem:[%s9331_s1 + $0x130] ss:$28 sps:$4 sm:$0xff]  }
 0x234   : > { %5925 = vmatprep.mubr.msk.bf16.mxu0 %vm2382_vm0, %v6998_v50 }
 0x23b   : > { %5926 = vmatmul.mubr.msk.bf16.gmra.mrb[12].mxu0 %vm2382_vm0, %v6998_v50  ;;  %v7002_v50 = vld [vmem:[%s9331_s1 + $0x1a0] ss:$28 sps:$4 sm:$0xff]  }
 0x23c   : > { %5927 = vmatprep.mubr.msk.bf16.mxu0 %vm2382_vm0, %v6999_v30 }
 0x243   : > { %5928 = vmatmul.mubr.msk.bf16.gmra.mrb[16].mxu0 %vm2382_vm0, %v6999_v30  ;;  %v7003_v30 = vld [vmem:[%s9331_s1 + $0x1d8] ss:$28 sps:$4 sm:$0xff]  }
 0x244   : > { %5929 = vmatprep.mubr.msk.bf16.mxu0 %vm2382_vm0, %v7000_v10 }
 0x24b   : > { %5930 = vmatmul.mubr.msk.bf16.gmra.mrb[20].mxu0 %vm2382_vm0, %v7000_v10  ;;  %v7004_v10 = vld [vmem:[%s9331_s1 + $0x210] ss:$28 sps:$4 sm:$0xff]  }
 0x24c   : > { %5931 = vmatprep.mubr.msk.bf16.mxu0 %vm2382_vm0, %v7001_v48 }
 0x253   : > { %5932 = vmatmul.mubr.msk.bf16.gmra.mrb[24].mxu0 %vm2382_vm0, %v7001_v48  ;;  %v7005_v48 = vld [vmem:[%s9331_s1 + $0x248] ss:$28 sps:$4 sm:$0xff]  }
 0x254   : > { %5933 = vmatprep.mubr.msk.bf16.mxu0 %vm2382_vm0, %v7002_v50 }
 0x25b   : > { %5934 = vmatmul.mubr.msk.bf16.gmra.mrb[28].mxu0 %vm2382_vm0, %v7002_v50  ;;  %v7006_v50 = vld [vmem:[%s9331_s1 + $0x280] ss:$28 sps:$4 sm:$0xff]  }
 0x25c   : > { %5935 = vmatprep.mubr.msk.bf16.mxu0 %vm2382_vm0, %v7003_v30 }
 0x263   : > { %5936 = vmatmul.mubr.msk.bf16.gmra.mrb[32].mxu0 %vm2382_vm0, %v7003_v30  ;;  %v7007_v30 = vld [vmem:[%s9331_s1 + $0x2b8] ss:$28 sps:$4 sm:$0xff]  }
 0x264   : > { %5937 = vmatprep.mubr.msk.bf16.mxu0 %vm2382_vm0, %v7004_v10 }
 0x26b   : > { %5938 = vmatmul.mubr.msk.bf16.gmra.mrb[36].mxu0 %vm2382_vm0, %v7004_v10 }
 0x26c   : > { %5939 = vmatprep.mubr.msk.bf16.mxu0 %vm2382_vm0, %v7005_v48 }
 0x273   : > { %5940 = vmatmul.mubr.msk.bf16.gmra.mrb[40].mxu0 %vm2382_vm0, %v7005_v48  ;;  %v7008_v48 = vld [vmem:[%s9331_s1 + $0x2f0] ss:$28 sps:$4 sm:$0xff]  }
 0x274   : > { %5941 = vmatprep.mubr.msk.bf16.mxu0 %vm2382_vm0, %v7006_v50 }
 0x277   : > { %v8714_v51 = vpop.f32.mrb[64].mxu1 }
 0x278   : > { %9363 = vst [vmem:[#allocation29_spill] sm:$0xff] %v8714_v51  ;;  %v8719_v13 = vpop.f32.mrb[65].mxu1 }
 0x279   : > { %9364 = vst [vmem:[#allocation30_spill] sm:$0xff] %v8719_v13  ;;  %v8721_v4 = vpop.f32.mrb[66].mxu1 }
 0x27a   : > { %9365 = vst [vmem:[#allocation31_spill] sm:$0xff] %v8721_v4  ;;  %v8723_v10 = vpop.f32.mrb[67].mxu1 }
 0x27b   : > { %9366 = vst [vmem:[#allocation32_spill] sm:$0xff] %v8723_v10  ;;  %5942 = vmatmul.mubr.msk.bf16.gmra.mrb[44].mxu0 %vm2382_vm0, %v7006_v50  ;;  %v7009_v50 = vld [vmem:[%s9331_s1 + $0x328] ss:$28 sps:$4 sm:$0xff]  }
 0x27c   : > { %5943 = vmatprep.mubr.msk.bf16.mxu0 %vm2382_vm0, %v7007_v30 }
 0x27f   : > { %v8727_v3 = vpop.f32.mrb[68].mxu1 }
 0x280   : > { %9367 = vst [vmem:[#allocation33_spill] sm:$0xff] %v8727_v3  ;;  %v8732_v51 = vpop.f32.mrb[69].mxu1 }
 0x281   : > { %9368 = vst [vmem:[#allocation34_spill] sm:$0xff] %v8732_v51  ;;  %v8734_v62 = vpop.f32.mrb[70].mxu1 }
 0x282   : > { %9369 = vst [vmem:[#allocation35_spill] sm:$0xff] %v8734_v62  ;;  %v8736_v56 = vpop.f32.mrb[71].mxu1 }
 0x283   : > { %9370 = vst [vmem:[#allocation36_spill] sm:$0xff] %v8736_v56  ;;  %5944 = vmatmul.mubr.msk.bf16.gmra.mrb[48].mxu0 %vm2382_vm0, %v7007_v30  ;;  %v7010_v30 = vld [vmem:[%s9331_s1 + $0x360] ss:$28 sps:$4 sm:$0xff]  }
 0x284   : > { %5945 = vmatprep.mubr.msk.bf16.mxu0 %vm2382_vm0, %v7008_v48 }
 0x287   : > { %v8740_v10 = vpop.f32.mrb[72].mxu1 }
 0x288   : > { %9371 = vst [vmem:[#allocation37_spill] sm:$0xff] %v8740_v10  ;;  %v8745_v3 = vpop.f32.mrb[73].mxu1 }
 0x289   : > { %9372 = vst [vmem:[#allocation38_spill] sm:$0xff] %v8745_v3  ;;  %v8747_v4 = vpop.f32.mrb[74].mxu1 }
 0x28a   : > { %9373 = vst [vmem:[#allocation39_spill] sm:$0xff] %v8747_v4  ;;  %v8749_v13 = vpop.f32.mrb[75].mxu1 }
 0x28b   : > { %9374 = vst [vmem:[#allocation40_spill] sm:$0xff] %v8749_v13  ;;  %5946 = vmatmul.mubr.msk.bf16.gmra.mrb[52].mxu0 %vm2382_vm0, %v7008_v48  ;;  %v7011_v48 = vld [vmem:[%s9331_s1 + $0x398] ss:$28 sps:$4 sm:$0xff]  }
 0x28c   : > { %5947 = vmatprep.mubr.msk.bf16.mxu0 %vm2382_vm0, %v7009_v50 }
 0x28f   : > { %v8753_v56 = vpop.f32.mrb[76].mxu1 }
 0x290   : > { %9375 = vst [vmem:[#allocation41_spill] sm:$0xff] %v8753_v56  ;;  %v8758_v10 = vpop.f32.mrb[77].mxu1 }
 0x291   : > { %9376 = vst [vmem:[#allocation42_spill] sm:$0xff] %v8758_v10  ;;  %v8760_v62 = vpop.f32.mrb[78].mxu1 }
 0x292   : > { %9377 = vst [vmem:[#allocation43_spill] sm:$0xff] %v8760_v62  ;;  %v8762_v51 = vpop.f32.mrb[79].mxu1 }
 0x293   : > { %9378 = vst [vmem:[#allocation44_spill] sm:$0xff] %v8762_v51  ;;  %5948 = vmatmul.mubr.msk.bf16.gmra.mrb[56].mxu0 %vm2382_vm0, %v7009_v50  ;;  %v7012_v50 = vld [vmem:[%s9331_s1 + $0x3d0] ss:$28 sps:$4 sm:$0xff]  }
 0x294   : > { %5949 = vmatprep.mubr.msk.bf16.mxu0 %vm2382_vm0, %v7010_v30 }
 0x297   : > { %v8766_v13 = vpop.f32.mrb[80].mxu1 }
 0x298   : > { %9379 = vst [vmem:[#allocation45_spill] sm:$0xff] %v8766_v13  ;;  %v8771_v56 = vpop.f32.mrb[81].mxu1 }
 0x299   : > { %9380 = vst [vmem:[#allocation46_spill] sm:$0xff] %v8771_v56  ;;  %v8773_v4 = vpop.f32.mrb[82].mxu1 }
 0x29a   : > { %9381 = vst [vmem:[#allocation47_spill] sm:$0xff] %v8773_v4  ;;  %v8775_v3 = vpop.f32.mrb[83].mxu1 }
 0x29b   : > { %9382 = vst [vmem:[#allocation48_spill] sm:$0xff] %v8775_v3  ;;  %5950 = vmatmul.mubr.msk.bf16.gmra.mrb[60].mxu0 %vm2382_vm0, %v7010_v30  ;;  %v7013_v30 = vld [vmem:[%s9331_s1 + $0x408] ss:$28 sps:$4 sm:$0xff]  }
 0x29c   : > { %5951 = vmatprep.mubr.msk.bf16.mxu0 %vm2382_vm0, %v7011_v48 }
 0x29f   : > { %v8779_v51 = vpop.f32.mrb[84].mxu1 }
 0x2a0   : > { %9383 = vst [vmem:[#allocation49_spill] sm:$0xff] %v8779_v51  ;;  %v8784_v13 = vpop.f32.mrb[85].mxu1 }
 0x2a1   : > { %9384 = vst [vmem:[#allocation50_spill] sm:$0xff] %v8784_v13  ;;  %v8786_v62 = vpop.f32.mrb[86].mxu1 }
 0x2a2   : > { %9385 = vst [vmem:[#allocation51_spill] sm:$0xff] %v8786_v62  ;;  %v8788_v10 = vpop.f32.mrb[87].mxu1 }
 0x2a3   : > { %9386 = vst [vmem:[#allocation52_spill] sm:$0xff] %v8788_v10  ;;  %5952 = vmatmul.mubr.msk.bf16.gmra.mrb[64].mxu0 %vm2382_vm0, %v7011_v48  ;;  %v7014_v48 = vld [vmem:[%s9331_s1 + $0x440] ss:$28 sps:$4 sm:$0xff]  }
 0x2a4   : > { %5953 = vmatprep.mubr.msk.bf16.mxu0 %vm2382_vm0, %v7012_v50 }
 0x2a7   : > { %v8792_v3 = vpop.f32.mrb[88].mxu1 }
 0x2a8   : > { %9387 = vst [vmem:[#allocation53_spill] sm:$0xff] %v8792_v3  ;;  %v8797_v51 = vpop.f32.mrb[89].mxu1 }
 0x2a9   : > { %9388 = vst [vmem:[#allocation54_spill] sm:$0xff] %v8797_v51  ;;  %v8799_v4 = vpop.f32.mrb[90].mxu1 }
 0x2aa   : > { %9389 = vst [vmem:[#allocation55_spill] sm:$0xff] %v8799_v4  ;;  %v8801_v56 = vpop.f32.mrb[91].mxu1 }
 0x2ab   : > { %9390 = vst [vmem:[#allocation56_spill] sm:$0xff] %v8801_v56  ;;  %5954 = vmatmul.mubr.msk.bf16.gmra.mrb[68].mxu0 %vm2382_vm0, %v7012_v50  ;;  %v7015_v50 = vld [vmem:[%s9331_s1 + $0x478] ss:$28 sps:$4 sm:$0xff]  }
 0x2ac   : > { %5955 = vmatprep.mubr.msk.bf16.mxu0 %vm2382_vm0, %v7013_v30 }
 0x2af   : > { %v8805_v10 = vpop.f32.mrb[92].mxu1 }
 0x2b0   : > { %9391 = vst [vmem:[#allocation57_spill] sm:$0xff] %v8805_v10  ;;  %v8810_v3 = vpop.f32.mrb[93].mxu1 }
 0x2b1   : > { %9392 = vst [vmem:[#allocation58_spill] sm:$0xff] %v8810_v3  ;;  %v8812_v62 = vpop.f32.mrb[94].mxu1 }
 0x2b2   : > { %9393 = vst [vmem:[#allocation59_spill] sm:$0xff] %v8812_v62  ;;  %v8814_v13 = vpop.f32.mrb[95].mxu1 }
 0x2b3   : > { %9394 = vst [vmem:[#allocation60_spill] sm:$0xff] %v8814_v13  ;;  %5956 = vmatmul.mubr.msk.bf16.gmra.mrb[72].mxu0 %vm2382_vm0, %v7013_v30  ;;  %v7016_v30 = vld [vmem:[%s9331_s1 + $0x4b0] ss:$28 sps:$4 sm:$0xff]  }
 0x2b4   : > { %5957 = vmatprep.mubr.msk.bf16.mxu0 %vm2382_vm0, %v7014_v48 }
 0x2b7   : > { %v8818_v56 = vpop.f32.mrb[96].mxu1 }
 0x2b8   : > { %9395 = vst [vmem:[#allocation61_spill] sm:$0xff] %v8818_v56  ;;  %v8823_v10 = vpop.f32.mrb[97].mxu1 }
 0x2b9   : > { %9396 = vst [vmem:[#allocation62_spill] sm:$0xff] %v8823_v10  ;;  %v8825_v4 = vpop.f32.mrb[98].mxu1 }
 0x2ba   : > { %9397 = vst [vmem:[#allocation63_spill] sm:$0xff] %v8825_v4  ;;  %v8827_v51 = vpop.f32.mrb[99].mxu1 }
 0x2bb   : > { %9398 = vst [vmem:[#allocation64_spill] sm:$0xff] %v8827_v51  ;;  %5958 = vmatmul.mubr.msk.bf16.gmra.mrb[76].mxu0 %vm2382_vm0, %v7014_v48  ;;  %v7017_v48 = vld [vmem:[%s9331_s1 + $0x4e8] ss:$28 sps:$4 sm:$0xff]  }
 0x2bc   : > { %5959 = vmatprep.mubr.msk.bf16.mxu0 %vm2382_vm0, %v7015_v50 }
 0x2bf   : > { %v8831_v13 = vpop.f32.mrb[100].mxu1 }
 0x2c0   : > { %9399 = vst [vmem:[#allocation65_spill] sm:$0xff] %v8831_v13  ;;  %v8836_v56 = vpop.f32.mrb[101].mxu1 }
 0x2c1   : > { %9400 = vst [vmem:[#allocation66_spill] sm:$0xff] %v8836_v56  ;;  %v8838_v62 = vpop.f32.mrb[102].mxu1 }
 0x2c2   : > { %9401 = vst [vmem:[#allocation67_spill] sm:$0xff] %v8838_v62  ;;  %v8840_v3 = vpop.f32.mrb[103].mxu1 }
 0x2c3   : > { %9402 = vst [vmem:[#allocation68_spill] sm:$0xff] %v8840_v3  ;;  %5960 = vmatmul.mubr.msk.bf16.gmra.mrb[80].mxu0 %vm2382_vm0, %v7015_v50  ;;  %v7018_v50 = vld [vmem:[%s9331_s1 + $0x520] ss:$28 sps:$4 sm:$0xff]  }
 0x2c4   : > { %5961 = vmatprep.mubr.msk.bf16.mxu0 %vm2382_vm0, %v7016_v30 }
 0x2c7   : > { %v8844_v51 = vpop.f32.mrb[104].mxu1 }
 0x2c8   : > { %9403 = vst [vmem:[#allocation69_spill] sm:$0xff] %v8844_v51  ;;  %v8849_v13 = vpop.f32.mrb[105].mxu1 }
 0x2c9   : > { %9404 = vst [vmem:[#allocation70_spill] sm:$0xff] %v8849_v13  ;;  %v8851_v4 = vpop.f32.mrb[106].mxu1 }
 0x2ca   : > { %9405 = vst [vmem:[#allocation71_spill] sm:$0xff] %v8851_v4  ;;  %v8853_v10 = vpop.f32.mrb[107].mxu1 }
 0x2cb   : > { %9406 = vst [vmem:[#allocation72_spill] sm:$0xff] %v8853_v10  ;;  %5962 = vmatmul.mubr.msk.bf16.gmra.mrb[84].mxu0 %vm2382_vm0, %v7016_v30  ;;  %v7019_v30 = vld [vmem:[%s9331_s1 + $0x558] ss:$28 sps:$4 sm:$0xff]  }
 0x2cc   : > { %5963 = vmatprep.mubr.msk.bf16.mxu0 %vm2382_vm0, %v7017_v48 }
 0x2cf   : > { %v8857_v3 = vpop.f32.mrb[108].mxu1 }
 0x2d0   : > { %9407 = vst [vmem:[#allocation73_spill] sm:$0xff] %v8857_v3  ;;  %v8862_v51 = vpop.f32.mrb[109].mxu1 }
 0x2d1   : > { %9408 = vst [vmem:[#allocation74_spill] sm:$0xff] %v8862_v51  ;;  %v8864_v62 = vpop.f32.mrb[110].mxu1 }
 0x2d2   : > { %9409 = vst [vmem:[#allocation75_spill] sm:$0xff] %v8864_v62  ;;  %v8866_v56 = vpop.f32.mrb[111].mxu1 }
 0x2d3   : > { %9410 = vst [vmem:[#allocation76_spill] sm:$0xff] %v8866_v56  ;;  %5964 = vmatmul.mubr.msk.bf16.gmra.mrb[88].mxu0 %vm2382_vm0, %v7017_v48  ;;  %v7020_v48 = vld [vmem:[%s9331_s1 + $0x590] ss:$28 sps:$4 sm:$0xff]  }
 0x2d4   : > { %5965 = vmatprep.mubr.msk.bf16.mxu0 %vm2382_vm0, %v7018_v50 }
 0x2d7   : > { %v8870_v10 = vpop.f32.mrb[112].mxu1 }
 0x2d8   : > { %9411 = vst [vmem:[#allocation77_spill] sm:$0xff] %v8870_v10  ;;  %v8875_v3 = vpop.f32.mrb[113].mxu1 }
 0x2d9   : > { %9412 = vst [vmem:[#allocation78_spill] sm:$0xff] %v8875_v3  ;;  %v8877_v4 = vpop.f32.mrb[114].mxu1 }
 0x2da   : > { %9413 = vst [vmem:[#allocation79_spill] sm:$0xff] %v8877_v4  ;;  %v8879_v13 = vpop.f32.mrb[115].mxu1 }
 0x2db   : > { %9414 = vst [vmem:[#allocation80_spill] sm:$0xff] %v8879_v13  ;;  %5966 = vmatmul.mubr.msk.bf16.gmra.mrb[92].mxu0 %vm2382_vm0, %v7018_v50 }
 0x2dc   : > { %5967 = vmatprep.mubr.msk.bf16.mxu0 %vm2382_vm0, %v7019_v30 }
 0x2df   : > { %v8883_v56 = vpop.f32.mrb[116].mxu1 }
 0x2e0   : > { %9415 = vst [vmem:[#allocation81_spill] sm:$0xff] %v8883_v56  ;;  %v8888_v10 = vpop.f32.mrb[117].mxu1  ;;  %v7021_v56 = vld [vmem:[%s9331_s1 + $0x5c8] ss:$28 sps:$4 sm:$0xff]  }
 0x2e1   : > { %9416 = vst [vmem:[#allocation82_spill] sm:$0xff] %v8888_v10  ;;  %v8890_v62 = vpop.f32.mrb[118].mxu1 }
 0x2e2   : > { %9417 = vst [vmem:[#allocation83_spill] sm:$0xff] %v8890_v62  ;;  %v8892_v51 = vpop.f32.mrb[119].mxu1 }
 0x2e3   : > { %9418 = vst [vmem:[#allocation84_spill] sm:$0xff] %v8892_v51  ;;  %5968 = vmatmul.mubr.msk.bf16.gmra.mrb[96].mxu0 %vm2382_vm0, %v7019_v30  ;;  %v945_v51 = vpop.permute.xlu0 %944 }
 0x2e4   : > { %5969 = vmatprep.mubr.msk.bf16.mxu0 %vm2382_vm0, %v7020_v48 }
 0x2e7   : > { %v8896_v13 = vpop.f32.mrb[120].mxu1 }
 0x2e8   : > { %9419 = vst [vmem:[#allocation85_spill] sm:$0xff] %v8896_v13  ;;  %v8898_v50 = vpop.f32.mrb[121].mxu1 }
 0x2e9   : > { %9420 = vst [vmem:[#allocation86_spill] sm:$0xff] %v8898_v50  ;;  %v8903_v4 = vpop.f32.mrb[122].mxu1  ;;  %v7022_v50 = vld [vmem:[%s9331_s1 + $0x600] ss:$28 sps:$4 sm:$0xff]  }
 0x2ea   : > { %9421 = vst [vmem:[#allocation87_spill] sm:$0xff] %v8903_v4  ;;  %v8905_v3 = vpop.f32.mrb[123].mxu1  ;;  %v955_v4 = vpop.permute.xlu1 %954 }
 0x2eb   : > { %9422 = vst [vmem:[#allocation88_spill] sm:$0xff] %v8905_v3  ;;  %5970 = vmatmul.mubr.msk.bf16.gmra.mrb[100].mxu0 %vm2382_vm0, %v7020_v48  ;;  %v950_v3 = vpop.permute.xlu0 %949  ;;  %v2562_v48 = vadd.f32 %v8446_v6, %v945_v51 }
 0x2ec   : > { %5971 = vmatprep.mubr.msk.bf16.mxu0 %vm2382_vm0, %v7021_v56  ;;  %v2568_v9 = vadd.f32 %v8473_v60, %v950_v3 }
 0x2ef   : > { %v8909_v30 = vpop.f32.mrb[124].mxu1 }
 0x2f0   : > { %9423 = vst [vmem:[#allocation89_spill] sm:$0xff] %v8909_v30  ;;  %v8911_v62 = vpop.f32.mrb[125].mxu1  ;;  %v2564_v30 = vadd.f32 %v8448_v42, %v945_v51  ;;  %v7029_v42 = vld [vmem:[%s9333_s3 + $0x4] ss:$16 sps:$4 sm:$0xff]  }
 0x2f1   : > { %9424 = vst [vmem:[#allocation90_spill] sm:$0xff] %v8911_v62  ;;  %v8916_v13 = vpop.f32.mrb[126].mxu1  ;;  %v2566_v62 = vadd.f32 %v8450_v46, %v950_v3  ;;  %v960_v46 = vpop.permute.xlu1 %959  ;;  %4867 = vmatprep.mubr.bf16.mxu1 %v7029_v42 }
 0x2f2   : > { %9425 = vst [vmem:[#allocation91_spill] sm:$0xff] %v8916_v13  ;;  %v8918_v10 = vpop.f32.mrb[127].mxu1  ;;  %v2576_v3 = vadd.f32 %v8485_v53, %v960_v46  ;;  %v2578_v21 = vadd.f32 %v8499_v12, %v960_v46  ;;  %v965_v53 = vpop.permute.xlu0 %964 }
 0x2f3   : > { %9426 = vst [vmem:[#allocation92_spill] sm:$0xff] %v8918_v10  ;;  %5972 = vmatmul.mubr.msk.bf16.gmra.mrb[104].mxu0 %vm2382_vm0, %v7021_v56  ;;  %v7023_v56 = vld [vmem:[%s9331_s1 + $0x638] ss:$28 sps:$4 sm:$0xff]   ;;  %v2582_v12 = vadd.f32 %v8501_v24, %v965_v53  ;;  %v2584_v46 = vadd.f32 %v8503_v26, %v965_v53  ;;  %v7025_v24 = vld [vmem:[%s9331_s1 + $0x6a8] ss:$28 sps:$4 sm:$0xff]  }
 0x2f4   : > { %5973 = vmatprep.mubr.msk.bf16.mxu0 %vm2382_vm0, %v7022_v50 }
 0x2f5   : > { %v970_v42 = vpop.permute.xlu1 %969 }
 0x2f6   : > { %v3620_v45 = vpop.f32.mrb[0].mxu0 }
 0x2f7   : > { %v6016_v41 = vadd.f32 %v3620_v45, %v2562_v48  ;;  %v3622_v37 = vpop.f32.mrb[1].mxu0 }
 0x2f8   : > { %v6018_v13 = vadd.f32 %v3622_v37, %v2564_v30  ;;  %v3624_v34 = vpop.f32.mrb[2].mxu0  ;;  %v2572_v37 = vadd.f32 %v8475_v52, %v955_v4  ;;  %v7024_v52 = vld [vmem:[%s9331_s1 + $0x670] ss:$28 sps:$4 sm:$0xff]  }
 0x2f9   : > { %v3939_v10 = vmul.f32 0.2, %v6016_v41  ;;  %v6020_v0 = vadd.f32 %v3624_v34, %v2566_v62  ;;  %v3626_v31 = vpop.f32.mrb[3].mxu0  ;;  %v2574_v34 = vadd.f32 %v8477_v15, %v955_v4 }
 0x2fa   : > { %v3940_v6 = vmul.f32 0.2, %v6018_v13  ;;  %v6022_v23 = vadd.f32 %v3626_v31, %v2568_v9 }
 0x2fb   : > { %v3941_v22 = vmul.f32 0.2, %v6020_v0  ;;  %5974 = vmatmul.mubr.msk.bf16.gmra.mrb[108].mxu0 %vm2382_vm0, %v7022_v50  ;;  %v4067_v45 = vmax.f32 %v6016_v41, %v3939_v10 }
 0x2fc   : > { %v3942_v60 = vmul.f32 0.2, %v6022_v23  ;;  %5975 = vmatprep.mubr.msk.bf16.mxu0 %vm2382_vm0, %v7023_v56  ;;  %v4068_v62 = vmax.f32 %v6018_v13, %v3940_v6 }
 0x2fd   : > { %v4069_v51 = vmax.f32 %v6020_v0, %v3941_v22 }
 0x2fe   : > { %v4070_v31 = vmax.f32 %v6022_v23, %v3942_v60  ;;  %v3630_v9 = vpop.f32.mrb[4].mxu0 }
 0x2ff   : > { %v4195_v50 = vpack.c.bf16 %v4069_v51, %v4067_v45  ;;  %v6024_v30 = vadd.f32 %v3630_v9, %v2572_v37  ;;  %v3632_v48 = vpop.f32.mrb[5].mxu0  ;;  %v2588_v51 = vadd.f32 %v8516_v2, %v970_v42 }
 0x300   : > { %v6026_v19 = vadd.f32 %v3632_v48, %v2574_v34  ;;  %v3634_v54 = vpop.f32.mrb[6].mxu0  ;;  %v4196_v58 = vpack.c.bf16 %v4070_v31, %v4068_v62 }
 0x301   : > { %v3943_v22 = vmul.f32 0.2, %v6024_v30  ;;  %v6028_v0 = vadd.f32 %v3634_v54, %v2576_v3  ;;  %v3636_v15 = vpop.f32.mrb[7].mxu0 }
 0x302   : > { %v3944_v41 = vmul.f32 0.2, %v6026_v19  ;;  %v6030_v23 = vadd.f32 %v3636_v15, %v2578_v21  ;;  %4835 = vmatprep.subr.bf16.mxu1 %v4196_v58  ;;  %v2586_v58 = vadd.f32 %v8508_v33, %v970_v42  ;;  %v975_v33 = vpop.permute.xlu0 %974  ;;  %v980_v15 = vpop.permute.xlu1 %979 }
 0x303   : > { %v3945_v4 = vmul.f32 0.2, %v6028_v0  ;;  %5976 = vmatmul.mubr.msk.bf16.gmra.mrb[112].mxu0 %vm2382_vm0, %v7023_v56  ;;  %4836 = vmatpush1.bf16.msra.mxu1 %v4195_v50  ;;  %v4071_v10 = vmax.f32 %v6024_v30, %v3943_v22  ;;  %v2592_v2 = vadd.f32 %v8521_v25, %v975_v33  ;;  %v7026_v25 = vld [vmem:[%s9331_s1 + $0x6e0] ss:$28 sps:$4 sm:$0xff]  }
 0x304   : > { %v3946_v13 = vmul.f32 0.2, %v6030_v23  ;;  %5977 = vmatprep.mubr.msk.bf16.mxu0 %vm2382_vm0, %v7024_v52  ;;  %v4072_v54 = vmax.f32 %v6026_v19, %v3944_v41  ;;  %v2594_v41 = vadd.f32 %v8523_v27, %v975_v33 }
 0x305   : > { %v4073_v6 = vmax.f32 %v6028_v0, %v3945_v4 }
 0x306   : > { %v4074_v60 = vmax.f32 %v6030_v23, %v3946_v13  ;;  %v3640_v37 = vpop.f32.mrb[8].mxu0  ;;  %v2596_v13 = vadd.f32 %v8525_v35, %v980_v15  ;;  %v985_v35 = vpop.permute.xlu0 %984 }
 0x307   : > { %v4197_v21 = vpack.c.bf16 %v4073_v6, %v4071_v10  ;;  %v6032_v45 = vadd.f32 %v3640_v37, %v2582_v12  ;;  %v3642_v56 = vpop.f32.mrb[9].mxu0  ;;  %v2598_v6 = vadd.f32 %v8527_v16, %v980_v15  ;;  %v2602_v16 = vadd.f32 %v8532_v39, %v985_v35 }
 0x308   : > { %v6034_v34 = vadd.f32 %v3642_v56, %v2584_v46  ;;  %v3644_v62 = vpop.f32.mrb[10].mxu0  ;;  %v4198_v31 = vpack.c.bf16 %v4074_v60, %v4072_v54 }
 0x309   : > { %v3947_v9 = vmul.f32 0.2, %v6032_v45  ;;  %v6036_v3 = vadd.f32 %v3644_v62, %v2586_v58  ;;  %v3646_v26 = vpop.f32.mrb[11].mxu0  ;;  %v990_v62 = vpop.permute.xlu1 %989 }
 0x30a   : > { %v3948_v19 = vmul.f32 0.2, %v6034_v34  ;;  %v6038_v50 = vadd.f32 %v3646_v26, %v2588_v51  ;;  %4837 = vmatprep.subr.bf16.mxu1 %v4198_v31  ;;  %v2604_v31 = vadd.f32 %v8540_v14, %v985_v35  ;;  %v2608_v33 = vadd.f32 %v8547_v47, %v990_v62 }
 0x30b   : > { %v3949_v30 = vmul.f32 0.2, %v6036_v3  ;;  %5978 = vmatmul.mubr.msk.bf16.gmra.mrb[116].mxu0 %vm2382_vm0, %v7024_v52  ;;  %4838 = vmatpush1.bf16.msra.mxu1 %v4197_v21  ;;  %v4075_v22 = vmax.f32 %v6032_v45, %v3947_v9 }
 0x30c   : > { %v3950_v48 = vmul.f32 0.2, %v6038_v50  ;;  %5979 = vmatprep.mubr.msk.bf16.mxu0 %vm2382_vm0, %v7025_v24  ;;  %v4076_v23 = vmax.f32 %v6034_v34, %v3948_v19  ;;  %v2606_v19 = vadd.f32 %v8545_v43, %v990_v62 }
 0x30d   : > { %v4077_v0 = vmax.f32 %v6036_v3, %v3949_v30  ;;  %v1000_v47 = vpop.permute.xlu1 %999 }
 0x30e   : > { %v4078_v4 = vmax.f32 %v6038_v50, %v3950_v48  ;;  %v3650_v53 = vpop.f32.mrb[12].mxu0 }
 0x30f   : > { %v4199_v12 = vpack.c.bf16 %v4077_v0, %v4075_v22  ;;  %v6040_v10 = vadd.f32 %v3650_v53, %v2592_v2  ;;  %v3652_v52 = vpop.f32.mrb[13].mxu0 }
 0x310   : > { %v6042_v42 = vadd.f32 %v3652_v52, %v2594_v41  ;;  %v3654_v46 = vpop.f32.mrb[14].mxu0  ;;  %v4200_v54 = vpack.c.bf16 %v4078_v4, %v4076_v23  ;;  %v995_v4 = vpop.permute.xlu0 %994 }
 0x311   : > { %v3951_v60 = vmul.f32 0.2, %v6040_v10  ;;  %v6044_v37 = vadd.f32 %v3654_v46, %v2596_v13  ;;  %v3656_v27 = vpop.f32.mrb[15].mxu0  ;;  %v2612_v53 = vadd.f32 %v8549_v17, %v995_v4  ;;  %v2616_v46 = vadd.f32 %v8556_v28, %v1000_v47 }
 0x312   : > { %v3952_v58 = vmul.f32 0.2, %v6042_v42  ;;  %v6046_v21 = vadd.f32 %v3656_v27, %v2598_v6  ;;  %4839 = vmatprep.subr.bf16.mxu1 %v4200_v54 }
 0x313   : > { %v3953_v45 = vmul.f32 0.2, %v6044_v37  ;;  %5980 = vmatmul.mubr.msk.bf16.gmra.mrb[120].mxu0 %vm2382_vm0, %v7025_v24  ;;  %4840 = vmatpush1.bf16.msra.mxu1 %v4199_v12  ;;  %v4079_v51 = vmax.f32 %v6040_v10, %v3951_v60  ;;  %v2614_v10 = vadd.f32 %v8551_v49, %v995_v4 }
 0x314   : > { %v3954_v56 = vmul.f32 0.2, %v6046_v21  ;;  %5981 = vmatprep.mubr.msk.bf16.mxu0 %vm2382_vm0, %v7026_v25  ;;  %v4080_v9 = vmax.f32 %v6042_v42, %v3952_v58 }
 0x315   : > { %v4081_v34 = vmax.f32 %v6044_v37, %v3953_v45 }
 0x316   : > { %v4082_v3 = vmax.f32 %v6046_v21, %v3954_v56  ;;  %v3660_v26 = vpop.f32.mrb[16].mxu0 }
 0x317   : > { %v4201_v50 = vpack.c.bf16 %v4081_v34, %v4079_v51  ;;  %v6048_v30 = vadd.f32 %v3660_v26, %v2602_v16  ;;  %v3662_v24 = vpop.f32.mrb[17].mxu0  ;;  %v1005_v51 = vpop.permute.xlu0 %1004 }
 0x318   : > { %v6050_v48 = vadd.f32 %v3662_v24, %v2604_v31  ;;  %v3664_v2 = vpop.f32.mrb[18].mxu0  ;;  %v4202_v22 = vpack.c.bf16 %v4082_v3, %v4080_v9  ;;  %v2622_v28 = vadd.f32 %v8569_v61, %v1005_v51  ;;  %v1010_v9 = vpop.permute.xlu1 %1009 }
 0x319   : > { %v3955_v0 = vmul.f32 0.2, %v6048_v30  ;;  %v6052_v39 = vadd.f32 %v3664_v2, %v2606_v19  ;;  %v3666_v15 = vpop.f32.mrb[19].mxu0 }
 0x31a   : > { %v3956_v41 = vmul.f32 0.2, %v6050_v48  ;;  %v6054_v23 = vadd.f32 %v3666_v15, %v2608_v33  ;;  %4841 = vmatprep.subr.bf16.mxu1 %v4202_v22 }
 0x31b   : > { %v3957_v14 = vmul.f32 0.2, %v6052_v39  ;;  %5982 = vmatmul.mubr.msk.bf16.gmra.mrb[124].mxu0 %vm2382_vm0, %v7026_v25  ;;  %4842 = vmatpush1.bf16.msra.mxu1 %v4201_v50  ;;  %v4083_v13 = vmax.f32 %v6048_v30, %v3955_v0  ;;  %v2618_v25 = vadd.f32 %v8564_v55, %v1000_v47  ;;  %v2624_v55 = vadd.f32 %v8571_v63, %v1005_v51 }
 0x31c   : > { %v3958_v43 = vmul.f32 0.2, %v6054_v23  ;;  %v4084_v52 = vmax.f32 %v6050_v48, %v3956_v41  ;;  %v2626_v50 = vadd.f32 %v8573_v57, %v1010_v9  ;;  %v2628_v48 = vadd.f32 %v8575_v29, %v1010_v9 }
 0x31d   : > { %v4085_v12 = vmax.f32 %v6052_v39, %v3957_v14  ;;  %v1015_v14 = vpop.permute.xlu0 %1014 }
 0x31e   : > { %v4086_v6 = vmax.f32 %v6054_v23, %v3958_v43  ;;  %v3670_v42 = vpop.f32.mrb[20].mxu0  ;;  %v2632_v57 = vadd.f32 %v8577_v59, %v1015_v14  ;;  %v2634_v29 = vadd.f32 %v8579_v32, %v1015_v14 }
 0x31f   : > { %v4203_v54 = vpack.c.bf16 %v4085_v12, %v4083_v13  ;;  %v6056_v60 = vadd.f32 %v3670_v42, %v2612_v53  ;;  %v3672_v37 = vpop.f32.mrb[21].mxu0  ;;  %v1020_v13 = vpop.permute.xlu1 %1019 }
 0x320   : > { %v6058_v27 = vadd.f32 %v3672_v37, %v2614_v10  ;;  %v3674_v58 = vpop.f32.mrb[22].mxu0  ;;  %v4204_v21 = vpack.c.bf16 %v4086_v6, %v4084_v52  ;;  %v2636_v52 = vadd.f32 %v8584_v1, %v1020_v13 }
 0x321   : > { %v3959_v45 = vmul.f32 0.2, %v6056_v60  ;;  %v6060_v17 = vadd.f32 %v3674_v58, %v2616_v46  ;;  %v3676_v35 = vpop.f32.mrb[23].mxu0 }
 0x322   : > { %v3960_v56 = vmul.f32 0.2, %v6058_v27  ;;  %v6062_v16 = vadd.f32 %v3676_v35, %v2618_v25  ;;  %4843 = vmatprep.subr.bf16.mxu1 %v4204_v21 }
 0x323   : > { %v3961_v49 = vmul.f32 0.2, %v6060_v17  ;;  %4844 = vmatpush1.bf16.msra.mxu1 %v4203_v54  ;;  %v4087_v62 = vmax.f32 %v6056_v60, %v3959_v45  ;;  %v2638_v54 = vadd.f32 %v8592_v18, %v1020_v13 }
 0x324   : > { %v3962_v34 = vmul.f32 0.2, %v6062_v16  ;;  %v4088_v3 = vmax.f32 %v6058_v27, %v3960_v56 }
 0x325   : > { %v4089_v31 = vmax.f32 %v6060_v17, %v3961_v49  ;;  %v1025_v17 = vpop.permute.xlu0 %1024  ;;  %v1030_v49 = vpop.permute.xlu1 %1029 }
 0x326   : > { %v4090_v26 = vmax.f32 %v6062_v16, %v3962_v34  ;;  %v3680_v19 = vpop.f32.mrb[24].mxu0  ;;  %v2642_v1 = vadd.f32 %v8594_v20, %v1025_v17  ;;  %v2644_v18 = vadd.f32 %v8596_v40, %v1025_v17 }
 0x327   : > { %v4205_v30 = vpack.c.bf16 %v4089_v31, %v4087_v62  ;;  %v6064_v24 = vadd.f32 %v3680_v19, %v2622_v28  ;;  %v3682_v33 = vpop.f32.mrb[25].mxu0  ;;  %v2646_v62 = vadd.f32 %v8598_v44, %v1030_v49 }
 0x328   : > { %v6066_v2 = vadd.f32 %v3682_v33, %v2624_v55  ;;  %v3684_v22 = vpop.f32.mrb[26].mxu0  ;;  %v4206_v0 = vpack.c.bf16 %v4090_v26, %v4088_v3  ;;  %v2648_v3 = vadd.f32 %v8601_v7, %v1030_v49 }
 0x329   : > { %v3963_v39 = vmul.f32 0.2, %v6064_v24  ;;  %v6068_v61 = vadd.f32 %v3684_v22, %v2626_v50  ;;  %v3686_v15 = vpop.f32.mrb[27].mxu0 }
 0x32a   : > { %v3964_v41 = vmul.f32 0.2, %v6066_v2  ;;  %v6070_v23 = vadd.f32 %v3686_v15, %v2628_v48  ;;  %4845 = vmatprep.subr.bf16.mxu1 %v4206_v0 }
 0x32b   : > { %v3965_v63 = vmul.f32 0.2, %v6068_v61  ;;  %4846 = vmatpush1.bf16.msra.mxu1 %v4205_v30  ;;  %v4091_v43 = vmax.f32 %v6064_v24, %v3963_v39 }
 0x32c   : > { %v3966_v4 = vmul.f32 0.2, %v6070_v23  ;;  %v4092_v12 = vmax.f32 %v6066_v2, %v3964_v41  ;;  %v1035_v2 = vpop.permute.xlu0 %1034 }
 0x32d   : > { %v4093_v53 = vmax.f32 %v6068_v61, %v3965_v63  ;;  %v2652_v44 = vadd.f32 %v8603_v8, %v1035_v2  ;;  %v1040_v61 = vpop.permute.xlu1 %1039  ;;  %v2654_v7 = vadd.f32 %v8605_v36, %v1035_v2 }
 0x32e   : > { %v4094_v47 = vmax.f32 %v6070_v23, %v3966_v4  ;;  %v3690_v10 = vpop.f32.mrb[28].mxu0  ;;  %v2656_v63 = vadd.f32 %v8607_v11, %v1040_v61 }
 0x32f   : > { %v4207_v6 = vpack.c.bf16 %v4093_v53, %v4091_v43  ;;  %v6072_v42 = vadd.f32 %v3690_v10, %v2632_v57  ;;  %v3692_v46 = vpop.f32.mrb[29].mxu0  ;;  %v2658_v43 = vadd.f32 %v8612_v5, %v1040_v61 }
 0x330   : > { %v6074_v60 = vadd.f32 %v3692_v46, %v2634_v29  ;;  %v3694_v37 = vpop.f32.mrb[30].mxu0  ;;  %v4208_v25 = vpack.c.bf16 %v4094_v47, %v4092_v12 }
 0x331   : > { %v3967_v27 = vmul.f32 0.2, %v6072_v42  ;;  %v6076_v59 = vadd.f32 %v3694_v37, %v2636_v52  ;;  %v3696_v58 = vpop.f32.mrb[31].mxu0  ;;  %v9427_v37 = vld [vmem:[#allocation6_spill] sm:$0xff] }
 0x332   : > { %v3968_v21 = vmul.f32 0.2, %v6074_v60  ;;  %v6078_v45 = vadd.f32 %v3696_v58, %v2638_v54  ;;  %4847 = vmatprep.subr.bf16.mxu1 %v4208_v25  ;;  %v9428_v58 = vld [vmem:[#allocation7_spill] sm:$0xff] }
 0x333   : > { %v3969_v32 = vmul.f32 0.2, %v6076_v59  ;;  %4848 = vmatpush1.bf16.msra.mxu1 %v4207_v6  ;;  %v4095_v56 = vmax.f32 %v6072_v42, %v3967_v27  ;;  %v1045_v6 = vpop.permute.xlu0 %1044 }
 0x334   : > { %v3970_v35 = vmul.f32 0.2, %v6078_v45  ;;  %v4096_v51 = vmax.f32 %v6074_v60, %v3968_v21  ;;  %v2662_v11 = vadd.f32 %v8614_v38, %v1045_v6  ;;  %v1050_v60 = vpop.permute.xlu1 %1049  ;;  %v2664_v5 = vadd.f32 %v9427_v37, %v1045_v6 }
 0x335   : > { %v4097_v16 = vmax.f32 %v6076_v59, %v3969_v32  ;;  %v2666_v21 = vadd.f32 %v9428_v58, %v1050_v60 }
 0x336   : > { %v4098_v34 = vmax.f32 %v6078_v45, %v3970_v35  ;;  %v3700_v28 = vpop.f32.mrb[32].mxu0  ;;  %v9429_v35 = vld [vmem:[#allocation8_spill] sm:$0xff] }
 0x337   : > { %v4209_v31 = vpack.c.bf16 %v4097_v16, %v4095_v56  ;;  %v6080_v9 = vadd.f32 %v3700_v28, %v2642_v1  ;;  %v3702_v55 = vpop.f32.mrb[33].mxu0  ;;  %v2668_v1 = vadd.f32 %v9429_v35, %v1050_v60 }
 0x338   : > { %v6082_v26 = vadd.f32 %v3702_v55, %v2644_v18  ;;  %v3704_v19 = vpop.f32.mrb[34].mxu0  ;;  %v4210_v50 = vpack.c.bf16 %v4098_v34, %v4096_v51  ;;  %v9430_v55 = vld [vmem:[#allocation9_spill] sm:$0xff] }
 0x339   : > { %v3971_v30 = vmul.f32 0.2, %v6080_v9  ;;  %v6084_v20 = vadd.f32 %v3704_v19, %v2646_v62  ;;  %v3706_v24 = vpop.f32.mrb[35].mxu0 }
 0x33a   : > { %v3972_v33 = vmul.f32 0.2, %v6082_v26  ;;  %v6086_v48 = vadd.f32 %v3706_v24, %v2648_v3  ;;  %4849 = vmatprep.subr.bf16.mxu1 %v4210_v50  ;;  %v1060_v50 = vpop.permute.xlu1 %1059 }
 0x33b   : > { %v3973_v40 = vmul.f32 0.2, %v6084_v20  ;;  %4850 = vmatpush1.bf16.msra.mxu1 %v4209_v31  ;;  %v4099_v0 = vmax.f32 %v6080_v9, %v3971_v30  ;;  %v1055_v31 = vpop.permute.xlu0 %1054  ;;  %v9431_v30 = vld [vmem:[#allocation10_spill] sm:$0xff] }
 0x33c   : > { %v3974_v22 = vmul.f32 0.2, %v6086_v48  ;;  %v4100_v15 = vmax.f32 %v6082_v26, %v3972_v33  ;;  %v2672_v3 = vadd.f32 %v9430_v55, %v1055_v31 }
 0x33d   : > { %v4101_v39 = vmax.f32 %v6084_v20, %v3973_v40  ;;  %v2674_v20 = vadd.f32 %v9431_v30, %v1055_v31  ;;  %v9432_v40 = vld [vmem:[#allocation11_spill] sm:$0xff] }
 0x33e   : > { %v4102_v41 = vmax.f32 %v6086_v48, %v3974_v22  ;;  %v3710_v23 = vpop.f32.mrb[36].mxu0  ;;  %v2676_v2 = vadd.f32 %v9432_v40, %v1060_v50 }
 0x33f   : > { %v4211_v14 = vpack.c.bf16 %v4101_v39, %v4099_v0  ;;  %v6088_v4 = vadd.f32 %v3710_v23, %v2652_v44  ;;  %v3712_v57 = vpop.f32.mrb[37].mxu0  ;;  %v9433_v39 = vld [vmem:[#allocation12_spill] sm:$0xff] }
 0x340   : > { %v6090_v53 = vadd.f32 %v3712_v57, %v2654_v7  ;;  %v3714_v13 = vpop.f32.mrb[38].mxu0  ;;  %v4212_v29 = vpack.c.bf16 %v4102_v41, %v4100_v15  ;;  %v2678_v61 = vadd.f32 %v9433_v39, %v1060_v50 }
 0x341   : > { %v3975_v12 = vmul.f32 0.2, %v6088_v4  ;;  %v6092_v8 = vadd.f32 %v3714_v13, %v2656_v63  ;;  %v3716_v47 = vpop.f32.mrb[39].mxu0 }
 0x342   : > { %v3976_v10 = vmul.f32 0.2, %v6090_v53  ;;  %v6094_v52 = vadd.f32 %v3716_v47, %v2658_v43  ;;  %4851 = vmatprep.subr.bf16.mxu1 %v4212_v29  ;;  %v9434_v29 = vld [vmem:[#allocation13_spill] sm:$0xff] }
 0x343   : > { %v3977_v36 = vmul.f32 0.2, %v6092_v8  ;;  %4852 = vmatpush1.bf16.msra.mxu1 %v4211_v14  ;;  %v4103_v46 = vmax.f32 %v6088_v4, %v3975_v12 }
 0x344   : > { %v3978_v42 = vmul.f32 0.2, %v6094_v52  ;;  %v4104_v25 = vmax.f32 %v6090_v53, %v3976_v10  ;;  %v1065_v53 = vpop.permute.xlu0 %1064  ;;  %v1070_v10 = vpop.permute.xlu1 %1069 }
 0x345   : > { %v4105_v54 = vmax.f32 %v6092_v8, %v3977_v36  ;;  %v2682_v12 = vadd.f32 %v9434_v29, %v1065_v53 }
 0x346   : > { %v4106_v27 = vmax.f32 %v6094_v52, %v3978_v42  ;;  %v3720_v59 = vpop.f32.mrb[40].mxu0  ;;  %v9435_v52 = vld [vmem:[#allocation14_spill] sm:$0xff] }
 0x347   : > { %v4213_v45 = vpack.c.bf16 %v4105_v54, %v4103_v46  ;;  %v6096_v32 = vadd.f32 %v3720_v59, %v2662_v11  ;;  %v3722_v17 = vpop.f32.mrb[41].mxu0  ;;  %v2684_v36 = vadd.f32 %v9435_v52, %v1065_v53  ;;  %v9436_v46 = vld [vmem:[#allocation15_spill] sm:$0xff] }
 0x348   : > { %v6098_v56 = vadd.f32 %v3722_v17, %v2664_v5  ;;  %v3724_v16 = vpop.f32.mrb[42].mxu0  ;;  %v4214_v49 = vpack.c.bf16 %v4106_v27, %v4104_v25  ;;  %v2686_v54 = vadd.f32 %v9436_v46, %v1070_v10  ;;  %v9437_v25 = vld [vmem:[#allocation16_spill] sm:$0xff] }
 0x349   : > { %v3979_v18 = vmul.f32 0.2, %v6096_v32  ;;  %v6100_v38 = vadd.f32 %v3724_v16, %v2666_v21  ;;  %v3726_v51 = vpop.f32.mrb[43].mxu0  ;;  %v2688_v27 = vadd.f32 %v9437_v25, %v1070_v10  ;;  %v1075_v16 = vpop.permute.xlu0 %1074 }
 0x34a   : > { %v3980_v34 = vmul.f32 0.2, %v6098_v56  ;;  %v6102_v28 = vadd.f32 %v3726_v51, %v2668_v1  ;;  %4853 = vmatprep.subr.bf16.mxu1 %v4214_v49 }
 0x34b   : > { %v3981_v62 = vmul.f32 0.2, %v6100_v38  ;;  %4854 = vmatpush1.bf16.msra.mxu1 %v4213_v45  ;;  %v4107_v26 = vmax.f32 %v6096_v32, %v3979_v18  ;;  %v9438_v18 = vld [vmem:[#allocation17_spill] sm:$0xff] }
 0x34c   : > { %v3982_v9 = vmul.f32 0.2, %v6102_v28  ;;  %v4108_v24 = vmax.f32 %v6098_v56, %v3980_v34 }
 0x34d   : > { %v4109_v19 = vmax.f32 %v6100_v38, %v3981_v62  ;;  %v2692_v38 = vadd.f32 %v9438_v18, %v1075_v16  ;;  %v9439_v62 = vld [vmem:[#allocation18_spill] sm:$0xff] }
 0x34e   : > { %v4110_v33 = vmax.f32 %v6102_v28, %v3982_v9  ;;  %v3730_v48 = vpop.f32.mrb[44].mxu0  ;;  %v1080_v28 = vpop.permute.xlu1 %1079  ;;  %v2694_v31 = vadd.f32 %v9439_v62, %v1075_v16 }
 0x34f   : > { %v4215_v22 = vpack.c.bf16 %v4109_v19, %v4107_v26  ;;  %v6104_v44 = vadd.f32 %v3730_v48, %v2672_v3  ;;  %v3732_v0 = vpop.f32.mrb[45].mxu0  ;;  %v9440_v26 = vld [vmem:[#allocation19_spill] sm:$0xff] }
 0x350   : > { %v6106_v7 = vadd.f32 %v3732_v0, %v2674_v20  ;;  %v3734_v15 = vpop.f32.mrb[46].mxu0  ;;  %v4216_v41 = vpack.c.bf16 %v4110_v33, %v4108_v24  ;;  %v2696_v19 = vadd.f32 %v9440_v26, %v1080_v28  ;;  %v9441_v24 = vld [vmem:[#allocation20_spill] sm:$0xff] }
 0x351   : > { %v3983_v23 = vmul.f32 0.2, %v6104_v44  ;;  %v6108_v63 = vadd.f32 %v3734_v15, %v2676_v2  ;;  %v3736_v14 = vpop.f32.mrb[47].mxu0  ;;  %v2698_v33 = vadd.f32 %v9441_v24, %v1080_v28  ;;  %v1085_v15 = vpop.permute.xlu0 %1084 }
 0x352   : > { %v3984_v4 = vmul.f32 0.2, %v6106_v7  ;;  %v6110_v57 = vadd.f32 %v3736_v14, %v2678_v61  ;;  %4855 = vmatprep.subr.bf16.mxu1 %v4216_v41 }
 0x353   : > { %v3985_v43 = vmul.f32 0.2, %v6108_v63  ;;  %4856 = vmatpush1.bf16.msra.mxu1 %v4215_v22  ;;  %v4111_v8 = vmax.f32 %v6104_v44, %v3983_v23  ;;  %v9442_v23 = vld [vmem:[#allocation21_spill] sm:$0xff] }
 0x354   : > { %v3986_v13 = vmul.f32 0.2, %v6110_v57  ;;  %v4112_v6 = vmax.f32 %v6106_v7, %v3984_v4 }
 0x355   : > { %v4113_v47 = vmax.f32 %v6108_v63, %v3985_v43  ;;  %v2702_v63 = vadd.f32 %v9442_v23, %v1085_v15  ;;  %v9443_v43 = vld [vmem:[#allocation22_spill] sm:$0xff] }
 0x356   : > { %v4114_v42 = vmax.f32 %v6110_v57, %v3986_v13  ;;  %v3740_v11 = vpop.f32.mrb[48].mxu0  ;;  %v1090_v57 = vpop.permute.xlu1 %1089  ;;  %v2704_v53 = vadd.f32 %v9443_v43, %v1085_v15 }
 0x357   : > { %v4217_v60 = vpack.c.bf16 %v4113_v47, %v4111_v8  ;;  %v6112_v37 = vadd.f32 %v3740_v11, %v2682_v12  ;;  %v3742_v5 = vpop.f32.mrb[49].mxu0  ;;  %v9444_v8 = vld [vmem:[#allocation23_spill] sm:$0xff] }
 0x358   : > { %v6114_v59 = vadd.f32 %v3742_v5, %v2684_v36  ;;  %v3744_v58 = vpop.f32.mrb[50].mxu0  ;;  %v4218_v21 = vpack.c.bf16 %v4114_v42, %v4112_v6  ;;  %v2706_v47 = vadd.f32 %v9444_v8, %v1090_v57  ;;  %v9445_v6 = vld [vmem:[#allocation24_spill] sm:$0xff] }
 0x359   : > { %v3987_v45 = vmul.f32 0.2, %v6112_v37  ;;  %v6116_v32 = vadd.f32 %v3744_v58, %v2686_v54  ;;  %v3746_v17 = vpop.f32.mrb[51].mxu0  ;;  %v2708_v42 = vadd.f32 %v9445_v6, %v1090_v57  ;;  %v1095_v58 = vpop.permute.xlu0 %1094 }
 0x35a   : > { %v3988_v35 = vmul.f32 0.2, %v6114_v59  ;;  %v6118_v1 = vadd.f32 %v3746_v17, %v2688_v27  ;;  %4857 = vmatprep.subr.bf16.mxu1 %v4218_v21 }
 0x35b   : > { %v3989_v56 = vmul.f32 0.2, %v6116_v32  ;;  %4858 = vmatpush1.bf16.msra.mxu1 %v4217_v60  ;;  %v4115_v51 = vmax.f32 %v6112_v37, %v3987_v45  ;;  %v9446_v45 = vld [vmem:[#allocation25_spill] sm:$0xff] }
 0x35c   : > { %v3990_v49 = vmul.f32 0.2, %v6118_v1  ;;  %v4116_v9 = vmax.f32 %v6114_v59, %v3988_v35 }
 0x35d   : > { %v4117_v34 = vmax.f32 %v6116_v32, %v3989_v56  ;;  %v2712_v32 = vadd.f32 %v9446_v45, %v1095_v58  ;;  %v9447_v56 = vld [vmem:[#allocation26_spill] sm:$0xff] }
 0x35e   : > { %v4118_v55 = vmax.f32 %v6118_v1, %v3990_v49  ;;  %v3750_v3 = vpop.f32.mrb[52].mxu0  ;;  %v1100_v1 = vpop.permute.xlu1 %1099  ;;  %v2714_v16 = vadd.f32 %v9447_v56, %v1095_v58 }
 0x35f   : > { %v4219_v50 = vpack.c.bf16 %v4117_v34, %v4115_v51  ;;  %v6120_v30 = vadd.f32 %v3750_v3, %v2692_v38  ;;  %v3752_v20 = vpop.f32.mrb[53].mxu0  ;;  %v9448_v51 = vld [vmem:[#allocation27_spill] sm:$0xff] }
 0x360   : > { %v6122_v48 = vadd.f32 %v3752_v20, %v2694_v31  ;;  %v3754_v40 = vpop.f32.mrb[54].mxu0  ;;  %v4220_v2 = vpack.c.bf16 %v4118_v55, %v4116_v9  ;;  %v2716_v34 = vadd.f32 %v9448_v51, %v1100_v1  ;;  %v9449_v9 = vld [vmem:[#allocation28_spill] sm:$0xff] }
 0x361   : > { %v3991_v22 = vmul.f32 0.2, %v6120_v30  ;;  %v6124_v44 = vadd.f32 %v3754_v40, %v2696_v19  ;;  %v3756_v0 = vpop.f32.mrb[55].mxu0  ;;  %v2718_v55 = vadd.f32 %v9449_v9, %v1100_v1  ;;  %v1105_v40 = vpop.permute.xlu0 %1104  ;;  %v9456_v1 = vld [vmem:[#allocation35_spill] sm:$0xff] }
 0x362   : > { %v3992_v39 = vmul.f32 0.2, %v6122_v48  ;;  %v6126_v61 = vadd.f32 %v3756_v0, %v2698_v33  ;;  %4859 = vmatprep.subr.bf16.mxu1 %v4220_v2 }
 0x363   : > { %v3993_v7 = vmul.f32 0.2, %v6124_v44  ;;  %4860 = vmatpush1.bf16.msra.mxu1 %v4219_v50  ;;  %v4119_v14 = vmax.f32 %v6120_v30, %v3991_v22  ;;  %v9450_v22 = vld [vmem:[#allocation29_spill] sm:$0xff] }
 0x364   : > { %v3994_v41 = vmul.f32 0.2, %v6126_v61  ;;  %v4120_v13 = vmax.f32 %v6122_v48, %v3992_v39 }
 0x365   : > { %v4121_v4 = vmax.f32 %v6124_v44, %v3993_v7  ;;  %v6143_v44 = vadd.f32 %v9450_v22, %v1105_v40  ;;  %v9451_v7 = vld [vmem:[#allocation30_spill] sm:$0xff] }
 0x366   : > { %v4122_v29 = vmax.f32 %v6126_v61, %v3994_v41  ;;  %v3760_v12 = vpop.f32.mrb[56].mxu0  ;;  %v1110_v61 = vpop.permute.xlu1 %1109  ;;  %v6145_v15 = vadd.f32 %v9451_v7, %v1105_v40 }
 0x367   : > { %v4221_v10 = vpack.c.bf16 %v4121_v4, %v4119_v14  ;;  %v6128_v52 = vadd.f32 %v3760_v12, %v2702_v63  ;;  %v3762_v36 = vpop.f32.mrb[57].mxu0  ;;  %v9452_v14 = vld [vmem:[#allocation31_spill] sm:$0xff] }
 0x368   : > { %v6130_v11 = vadd.f32 %v3762_v36, %v2704_v53  ;;  %v3764_v46 = vpop.f32.mrb[58].mxu0  ;;  %v4222_v54 = vpack.c.bf16 %v4122_v29, %v4120_v13  ;;  %v6147_v4 = vadd.f32 %v9452_v14, %v1110_v61  ;;  %v9453_v13 = vld [vmem:[#allocation32_spill] sm:$0xff] }
 0x369   : > { %v3995_v60 = vmul.f32 0.2, %v6128_v52  ;;  %v6132_v37 = vadd.f32 %v3764_v46, %v2706_v47  ;;  %v3766_v5 = vpop.f32.mrb[59].mxu0  ;;  %v6149_v29 = vadd.f32 %v9453_v13, %v1110_v61 }
 0x36a   : > { %v3996_v25 = vmul.f32 0.2, %v6130_v11  ;;  %v6134_v27 = vadd.f32 %v3766_v5, %v2708_v42  ;;  %4861 = vmatprep.subr.bf16.mxu1 %v4222_v54  ;;  %v7030_v54 = vld [vmem:[%s9333_s3 + $0x24] ss:$16 sps:$4 sm:$0xff]   ;;  %v1120_v58 = vpop.permute.xlu1 %1119 }
 0x36b   : > { %v3997_v59 = vmul.f32 0.2, %v6132_v37  ;;  %4862 = vmatpush1.bf16.msra.mxu1 %v4221_v10  ;;  %v4123_v17 = vmax.f32 %v6128_v52, %v3995_v60  ;;  %v1115_v60 = vpop.permute.xlu0 %1114  ;;  %v9454_v5 = vld [vmem:[#allocation33_spill] sm:$0xff]  ;;  %v6155_v56 = vadd.f32 %v9456_v1, %v1120_v58 }
 0x36c   : > { %v3998_v21 = vmul.f32 0.2, %v6134_v27  ;;  %v4124_v49 = vmax.f32 %v6130_v11, %v3996_v25  ;;  %v7027_v11 = vld [vmem:[%s9333_s3] ss:$16 sps:$4 sm:$0xff]   ;;  %v6151_v25 = vadd.f32 %v9454_v5, %v1115_v60 }
 0x36d   : > { %v4125_v35 = vmax.f32 %v6132_v37, %v3997_v59 }
 0x36e   : > { %v4126_v18 = vmax.f32 %v6134_v27, %v3998_v21  ;;  %v3770_v38 = vpop.f32.mrb[60].mxu0  ;;  %v9455_v21 = vld [vmem:[#allocation34_spill] sm:$0xff]  ;;  %v1130_v22 = vpop.permute.xlu1 %1129 }
 0x36f   : > { %v4223_v28 = vpack.c.bf16 %v4125_v35, %v4123_v17  ;;  %v6136_v62 = vadd.f32 %v3770_v38, %v2712_v32  ;;  %v3772_v31 = vpop.f32.mrb[61].mxu0  ;;  %v6153_v45 = vadd.f32 %v9455_v21, %v1115_v60  ;;  %v9457_v38 = vld [vmem:[#allocation36_spill] sm:$0xff] }
 0x370   : > { %v6138_v3 = vadd.f32 %v3772_v31, %v2714_v16  ;;  %v3774_v26 = vpop.f32.mrb[62].mxu0  ;;  %v4224_v19 = vpack.c.bf16 %v4126_v18, %v4124_v49  ;;  %v6157_v51 = vadd.f32 %v9457_v38, %v1120_v58 }
 0x371   : > { %v3999_v50 = vmul.f32 0.2, %v6136_v62  ;;  %v6140_v30 = vadd.f32 %v3774_v26, %v2716_v34  ;;  %v3776_v20 = vpop.f32.mrb[63].mxu0 }
 0x372   : > { %v4000_v24 = vmul.f32 0.2, %v6138_v3  ;;  %v6142_v33 = vadd.f32 %v3776_v20, %v2718_v55  ;;  %4863 = vmatprep.subr.bf16.mxu1 %v4224_v19  ;;  %v7032_v19 = vld [vmem:[%s9333_s3 + $0x20] ss:$16 sps:$4 sm:$0xff]   ;;  %v1125_v20 = vpop.permute.xlu0 %1124  ;;  %v1140_v5 = vpop.permute.xlu1 %1139 }
 0x373   : > { %v4001_v48 = vmul.f32 0.2, %v6140_v30  ;;  %4864 = vmatpush1.bf16.msra.mxu1 %v4223_v28  ;;  %v4127_v0 = vmax.f32 %v6136_v62, %v3999_v50 }
 0x374   : > { %v4002_v2 = vmul.f32 0.2, %v6142_v33  ;;  %v4128_v41 = vmax.f32 %v6138_v3, %v4000_v24 }
 0x375   : > { %v4129_v39 = vmax.f32 %v6140_v30, %v4001_v48  ;;  %v7033_v30 = vld [vmem:[%s9333_s3 + $0x44] ss:$16 sps:$4 sm:$0xff]  }
 0x376   : > { %v4130_v23 = vmax.f32 %v6142_v33, %v4002_v2  ;;  %v3780_v63 = vpop.f32.mrb[64].mxu0  ;;  %v9458_v33 = vld [vmem:[#allocation37_spill] sm:$0xff] }
 0x377   : > { %v4225_v57 = vpack.c.bf16 %v4129_v39, %v4127_v0  ;;  %v6144_v43 = vadd.f32 %v6143_v44, %v3780_v63  ;;  %v3782_v53 = vpop.f32.mrb[65].mxu0  ;;  %v6159_v48 = vadd.f32 %v9458_v33, %v1125_v20  ;;  %v9459_v44 = vld [vmem:[#allocation38_spill] sm:$0xff]  ;;  %v1150_v33 = vpop.permute.xlu1 %1149 }
 0x378   : > { %v6146_v12 = vadd.f32 %v6145_v15, %v3782_v53  ;;  %v3784_v8 = vpop.f32.mrb[66].mxu0  ;;  %v4226_v47 = vpack.c.bf16 %v4130_v23, %v4128_v41  ;;  %v6161_v0 = vadd.f32 %v9459_v44, %v1125_v20  ;;  %v9460_v15 = vld [vmem:[#allocation39_spill] sm:$0xff] }
 0x379   : > { %v4003_v10 = vmul.f32 0.2, %v6144_v43  ;;  %v6148_v52 = vadd.f32 %v6147_v4, %v3784_v8  ;;  %v3786_v36 = vpop.f32.mrb[67].mxu0  ;;  %v6163_v41 = vadd.f32 %v9460_v15, %v1130_v22  ;;  %v9461_v4 = vld [vmem:[#allocation40_spill] sm:$0xff] }
 0x37a   : > { %v4004_v6 = vmul.f32 0.2, %v6146_v12  ;;  %v6150_v42 = vadd.f32 %v6149_v29, %v3786_v36  ;;  %4865 = vmatprep.subr.bf16.mxu1 %v4226_v47 }
 0x37b   : > { %v4005_v46 = vmul.f32 0.2, %v6148_v52  ;;  %4866 = vmatpush1.bf16.msra.mxu1 %v4225_v57  ;;  %v4131_v27 = vmax.f32 %v6144_v43, %v4003_v10  ;;  %v6165_v57 = vadd.f32 %v9461_v4, %v1130_v22 }
 0x37c   : > { %v4006_v37 = vmul.f32 0.2, %v6150_v42  ;;  %v4132_v32 = vmax.f32 %v6146_v12, %v4004_v6  ;;  %v7036_v6 = vld [vmem:[%s9333_s3 + $0x64] ss:$16 sps:$4 sm:$0xff]  }
 0x37d   : > { %v4133_v59 = vmax.f32 %v6148_v52, %v4005_v46  ;;  %v7035_v52 = vld [vmem:[%s9333_s3 + $0x40] ss:$16 sps:$4 sm:$0xff]  }
 0x37e   : > { %v4134_v17 = vmax.f32 %v6150_v42, %v4006_v37  ;;  %v3790_v35 = vpop.f32.mrb[68].mxu0  ;;  %4868 = vmatmul.mubr.bf16.vlgmr.msra.gmra.mrb[128].mxu1 %v7027_v11  ;;  %v1135_v42 = vpop.permute.xlu0 %1134  ;;  %v9462_v46 = vld [vmem:[#allocation41_spill] sm:$0xff] }
 0x37f   : > { %v4227_v16 = vpack.c.bf16 %v4133_v59, %v4131_v27  ;;  %v6152_v49 = vadd.f32 %v6151_v25, %v3790_v35  ;;  %v3792_v18 = vpop.f32.mrb[69].mxu0  ;;  %4877 = vmatprep.mubr.bf16.mxu1 %v7030_v54  ;;  %v6167_v54 = vadd.f32 %v9462_v46, %v1135_v42  ;;  %v9463_v25 = vld [vmem:[#allocation42_spill] sm:$0xff]  ;;  %v1160_v46 = vpop.permute.xlu1 %1159 }
 0x380   : > { %v6154_v34 = vadd.f32 %v6153_v45, %v3792_v18  ;;  %v3794_v28 = vpop.f32.mrb[70].mxu0  ;;  %v4228_v62 = vpack.c.bf16 %v4134_v17, %v4132_v32  ;;  %v6169_v27 = vadd.f32 %v9463_v25, %v1135_v42  ;;  %v9464_v45 = vld [vmem:[#allocation43_spill] sm:$0xff] }
 0x381   : > { %v4007_v31 = vmul.f32 0.2, %v6152_v49  ;;  %v6156_v9 = vadd.f32 %v6155_v56, %v3794_v28  ;;  %v3796_v55 = vpop.f32.mrb[71].mxu0  ;;  %v6171_v32 = vadd.f32 %v9464_v45, %v1140_v5  ;;  %v9465_v56 = vld [vmem:[#allocation44_spill] sm:$0xff] }
 0x382   : > { %v4008_v3 = vmul.f32 0.2, %v6154_v34  ;;  %v6158_v26 = vadd.f32 %v6157_v51, %v3796_v55  ;;  %5028 = vmatprep.subr.bf16.mxu1 %v4228_v62 }
 0x383   : > { %v4009_v50 = vmul.f32 0.2, %v6156_v9  ;;  %5029 = vmatpush1.bf16.msra.mxu1 %v4227_v16  ;;  %v4135_v40 = vmax.f32 %v6152_v49, %v4007_v31  ;;  %v6173_v16 = vadd.f32 %v9465_v56, %v1140_v5 }
 0x384   : > { %v4010_v24 = vmul.f32 0.2, %v6158_v26  ;;  %v4136_v39 = vmax.f32 %v6154_v34, %v4008_v3  ;;  %v7039_v3 = vld [vmem:[%s9333_s3 + $0x84] ss:$16 sps:$4 sm:$0xff]  }
 0x385   : > { %v4137_v2 = vmax.f32 %v6156_v9, %v4009_v50  ;;  %v7038_v9 = vld [vmem:[%s9333_s3 + $0x60] ss:$16 sps:$4 sm:$0xff]  }
 0x386   : > { %v4138_v61 = vmax.f32 %v6158_v26, %v4010_v24  ;;  %v3800_v7 = vpop.f32.mrb[72].mxu0  ;;  %4878 = vmatmul.mubr.bf16.gmra.mrb[132].mxu1 %v7032_v19  ;;  %v1145_v26 = vpop.permute.xlu0 %1144  ;;  %v9466_v50 = vld [vmem:[#allocation45_spill] sm:$0xff] }
 0x387   : > { %v4229_v23 = vpack.c.bf16 %v4137_v2, %v4135_v40  ;;  %v6160_v63 = vadd.f32 %v6159_v48, %v3800_v7  ;;  %v3802_v14 = vpop.f32.mrb[73].mxu0  ;;  %4887 = vmatprep.mubr.bf16.mxu1 %v7033_v30  ;;  %v6175_v30 = vadd.f32 %v9466_v50, %v1145_v26  ;;  %v9467_v48 = vld [vmem:[#allocation46_spill] sm:$0xff]  ;;  %v1170_v50 = vpop.permute.xlu1 %1169 }
 0x388   : > { %v6162_v43 = vadd.f32 %v6161_v0, %v3802_v14  ;;  %v3804_v53 = vpop.f32.mrb[74].mxu0  ;;  %v4230_v13 = vpack.c.bf16 %v4138_v61, %v4136_v39  ;;  %v6177_v40 = vadd.f32 %v9467_v48, %v1145_v26  ;;  %v9468_v0 = vld [vmem:[#allocation47_spill] sm:$0xff] }
 0x389   : > { %v4011_v29 = vmul.f32 0.2, %v6160_v63  ;;  %v6164_v12 = vadd.f32 %v6163_v41, %v3804_v53  ;;  %v3806_v8 = vpop.f32.mrb[75].mxu0  ;;  %v6179_v39 = vadd.f32 %v9468_v0, %v1150_v33  ;;  %v9469_v41 = vld [vmem:[#allocation48_spill] sm:$0xff] }
 0x38a   : > { %v4012_v47 = vmul.f32 0.2, %v6162_v43  ;;  %v6166_v10 = vadd.f32 %v6165_v57, %v3806_v8  ;;  %5030 = vmatprep.subr.bf16.mxu1 %v4230_v13 }
 0x38b   : > { %v4013_v36 = vmul.f32 0.2, %v6164_v12  ;;  %5031 = vmatpush1.bf16.msra.mxu1 %v4229_v23  ;;  %v4139_v60 = vmax.f32 %v6160_v63, %v4011_v29  ;;  %v6181_v23 = vadd.f32 %v9469_v41, %v1150_v33 }
 0x38c   : > { %v4014_v11 = vmul.f32 0.2, %v6166_v10  ;;  %v4140_v59 = vmax.f32 %v6162_v43, %v4012_v47  ;;  %v7042_v47 = vld [vmem:[%s9333_s3 + $0xa4] ss:$16 sps:$4 sm:$0xff]  }
 0x38d   : > { %v4141_v37 = vmax.f32 %v6164_v12, %v4013_v36  ;;  %v7041_v12 = vld [vmem:[%s9333_s3 + $0x80] ss:$16 sps:$4 sm:$0xff]  }
 0x38e   : > { %v4142_v58 = vmax.f32 %v6166_v10, %v4014_v11  ;;  %v3810_v21 = vpop.f32.mrb[76].mxu0  ;;  %4888 = vmatmul.mubr.bf16.gmra.mrb[136].mxu1 %v7035_v52  ;;  %v1155_v10 = vpop.permute.xlu0 %1154  ;;  %v9470_v36 = vld [vmem:[#allocation49_spill] sm:$0xff] }
 0x38f   : > { %v4231_v17 = vpack.c.bf16 %v4141_v37, %v4139_v60  ;;  %v6168_v35 = vadd.f32 %v6167_v54, %v3810_v21  ;;  %v3812_v1 = vpop.f32.mrb[77].mxu0  ;;  %4897 = vmatprep.mubr.bf16.mxu1 %v7036_v6  ;;  %v6183_v6 = vadd.f32 %v9470_v36, %v1155_v10  ;;  %v9471_v54 = vld [vmem:[#allocation50_spill] sm:$0xff]  ;;  %v1180_v36 = vpop.permute.xlu1 %1179 }
 0x390   : > { %v6170_v49 = vadd.f32 %v6169_v27, %v3812_v1  ;;  %v3814_v18 = vpop.f32.mrb[78].mxu0  ;;  %v4232_v38 = vpack.c.bf16 %v4142_v58, %v4140_v59  ;;  %v6185_v60 = vadd.f32 %v9471_v54, %v1155_v10  ;;  %v9472_v27 = vld [vmem:[#allocation51_spill] sm:$0xff] }
 0x391   : > { %v4015_v51 = vmul.f32 0.2, %v6168_v35  ;;  %v6172_v34 = vadd.f32 %v6171_v32, %v3814_v18  ;;  %v3816_v28 = vpop.f32.mrb[79].mxu0  ;;  %v6187_v59 = vadd.f32 %v9472_v27, %v1160_v46  ;;  %v9473_v32 = vld [vmem:[#allocation52_spill] sm:$0xff] }
 0x392   : > { %v4016_v62 = vmul.f32 0.2, %v6170_v49  ;;  %v6174_v31 = vadd.f32 %v6173_v16, %v3816_v28  ;;  %5032 = vmatprep.subr.bf16.mxu1 %v4232_v38 }
 0x393   : > { %v4017_v55 = vmul.f32 0.2, %v6172_v34  ;;  %5033 = vmatpush1.bf16.msra.mxu1 %v4231_v17  ;;  %v4143_v20 = vmax.f32 %v6168_v35, %v4015_v51  ;;  %v6189_v17 = vadd.f32 %v9473_v32, %v1160_v46 }
 0x394   : > { %v4018_v19 = vmul.f32 0.2, %v6174_v31  ;;  %v4144_v2 = vmax.f32 %v6170_v49, %v4016_v62  ;;  %v7045_v62 = vld [vmem:[%s9333_s3 + $0xc4] ss:$16 sps:$4 sm:$0xff]  }
 0x395   : > { %v4145_v24 = vmax.f32 %v6172_v34, %v4017_v55  ;;  %v7044_v34 = vld [vmem:[%s9333_s3 + $0xa0] ss:$16 sps:$4 sm:$0xff]  }
 0x396   : > { %v4146_v22 = vmax.f32 %v6174_v31, %v4018_v19  ;;  %v3820_v44 = vpop.f32.mrb[80].mxu0  ;;  %4898 = vmatmul.mubr.bf16.gmra.mrb[140].mxu1 %v7038_v9  ;;  %v1165_v31 = vpop.permute.xlu0 %1164  ;;  %v9474_v55 = vld [vmem:[#allocation53_spill] sm:$0xff] }
 0x397   : > { %v4233_v61 = vpack.c.bf16 %v4145_v24, %v4143_v20  ;;  %v6176_v7 = vadd.f32 %v6175_v30, %v3820_v44  ;;  %v3822_v15 = vpop.f32.mrb[81].mxu0  ;;  %4907 = vmatprep.mubr.bf16.mxu1 %v7039_v3  ;;  %v6191_v3 = vadd.f32 %v9474_v55, %v1165_v31  ;;  %v9475_v30 = vld [vmem:[#allocation54_spill] sm:$0xff]  ;;  %v1190_v55 = vpop.permute.xlu1 %1189 }
 0x398   : > { %v6178_v63 = vadd.f32 %v6177_v40, %v3822_v15  ;;  %v3824_v14 = vpop.f32.mrb[82].mxu0  ;;  %v4234_v4 = vpack.c.bf16 %v4146_v22, %v4144_v2  ;;  %v6193_v20 = vadd.f32 %v9475_v30, %v1165_v31  ;;  %v9476_v40 = vld [vmem:[#allocation55_spill] sm:$0xff] }
 0x399   : > { %v4019_v57 = vmul.f32 0.2, %v6176_v7  ;;  %v6180_v43 = vadd.f32 %v6179_v39, %v3824_v14  ;;  %v3826_v53 = vpop.f32.mrb[83].mxu0  ;;  %v6195_v2 = vadd.f32 %v9476_v40, %v1170_v50  ;;  %v9477_v39 = vld [vmem:[#allocation56_spill] sm:$0xff] }
 0x39a   : > { %v4020_v13 = vmul.f32 0.2, %v6178_v63  ;;  %v6182_v29 = vadd.f32 %v6181_v23, %v3826_v53  ;;  %5034 = vmatprep.subr.bf16.mxu1 %v4234_v4 }
 0x39b   : > { %v4021_v8 = vmul.f32 0.2, %v6180_v43  ;;  %5035 = vmatpush1.bf16.msra.mxu1 %v4233_v61  ;;  %v4147_v42 = vmax.f32 %v6176_v7, %v4019_v57  ;;  %v6197_v61 = vadd.f32 %v9477_v39, %v1170_v50 }
 0x39c   : > { %v4022_v52 = vmul.f32 0.2, %v6182_v29  ;;  %v4148_v37 = vmax.f32 %v6178_v63, %v4020_v13  ;;  %v7048_v13 = vld [vmem:[%s9333_s3 + $0xe4] ss:$16 sps:$4 sm:$0xff]  }
 0x39d   : > { %v4149_v11 = vmax.f32 %v6180_v43, %v4021_v8  ;;  %v7047_v43 = vld [vmem:[%s9333_s3 + $0xc0] ss:$16 sps:$4 sm:$0xff]  }
 0x39e   : > { %v4150_v5 = vmax.f32 %v6182_v29, %v4022_v52  ;;  %v3830_v25 = vpop.f32.mrb[84].mxu0  ;;  %4908 = vmatmul.mubr.bf16.gmra.mrb[144].mxu1 %v7041_v12  ;;  %v1175_v29 = vpop.permute.xlu0 %1174  ;;  %v9478_v8 = vld [vmem:[#allocation57_spill] sm:$0xff] }
 0x39f   : > { %v4235_v58 = vpack.c.bf16 %v4149_v11, %v4147_v42  ;;  %v6184_v21 = vadd.f32 %v6183_v6, %v3830_v25  ;;  %v3832_v45 = vpop.f32.mrb[85].mxu0  ;;  %4917 = vmatprep.mubr.bf16.mxu1 %v7042_v47  ;;  %v6199_v47 = vadd.f32 %v9478_v8, %v1175_v29  ;;  %v9479_v6 = vld [vmem:[#allocation58_spill] sm:$0xff]  ;;  %v1200_v8 = vpop.permute.xlu1 %1199 }
 0x3a0   : > { %v6186_v35 = vadd.f32 %v6185_v60, %v3832_v45  ;;  %v3834_v1 = vpop.f32.mrb[86].mxu0  ;;  %v4236_v56 = vpack.c.bf16 %v4150_v5, %v4148_v37  ;;  %v6201_v42 = vadd.f32 %v9479_v6, %v1175_v29  ;;  %v9480_v60 = vld [vmem:[#allocation59_spill] sm:$0xff] }
 0x3a1   : > { %v4023_v16 = vmul.f32 0.2, %v6184_v21  ;;  %v6188_v49 = vadd.f32 %v6187_v59, %v3834_v1  ;;  %v3836_v18 = vpop.f32.mrb[87].mxu0  ;;  %v6203_v37 = vadd.f32 %v9480_v60, %v1180_v36  ;;  %v9481_v59 = vld [vmem:[#allocation60_spill] sm:$0xff] }
 0x3a2   : > { %v4024_v38 = vmul.f32 0.2, %v6186_v35  ;;  %v6190_v51 = vadd.f32 %v6189_v17, %v3836_v18  ;;  %5036 = vmatprep.subr.bf16.mxu1 %v4236_v56 }
 0x3a3   : > { %v4025_v28 = vmul.f32 0.2, %v6188_v49  ;;  %5037 = vmatpush1.bf16.msra.mxu1 %v4235_v58  ;;  %v4151_v26 = vmax.f32 %v6184_v21, %v4023_v16  ;;  %v6205_v58 = vadd.f32 %v9481_v59, %v1180_v36 }
 0x3a4   : > { %v4026_v9 = vmul.f32 0.2, %v6190_v51  ;;  %v4152_v24 = vmax.f32 %v6186_v35, %v4024_v38  ;;  %v7051_v38 = vld [vmem:[%s9333_s3 + $0x104] ss:$16 sps:$4 sm:$0xff]  }
 0x3a5   : > { %v4153_v19 = vmax.f32 %v6188_v49, %v4025_v28  ;;  %v7050_v49 = vld [vmem:[%s9333_s3 + $0xe0] ss:$16 sps:$4 sm:$0xff]  }
 0x3a6   : > { %v4154_v33 = vmax.f32 %v6190_v51, %v4026_v9  ;;  %v3840_v48 = vpop.f32.mrb[88].mxu0  ;;  %4918 = vmatmul.mubr.bf16.gmra.mrb[148].mxu1 %v7044_v34  ;;  %v1185_v51 = vpop.permute.xlu0 %1184  ;;  %v9482_v28 = vld [vmem:[#allocation61_spill] sm:$0xff] }
 0x3a7   : > { %v4237_v22 = vpack.c.bf16 %v4153_v19, %v4151_v26  ;;  %v6192_v44 = vadd.f32 %v6191_v3, %v3840_v48  ;;  %v3842_v0 = vpop.f32.mrb[89].mxu0  ;;  %4927 = vmatprep.mubr.bf16.mxu1 %v7045_v62  ;;  %v6207_v62 = vadd.f32 %v9482_v28, %v1185_v51  ;;  %v9483_v3 = vld [vmem:[#allocation62_spill] sm:$0xff]  ;;  %v1210_v28 = vpop.permute.xlu1 %1209 }
 0x3a8   : > { %v6194_v7 = vadd.f32 %v6193_v20, %v3842_v0  ;;  %v3844_v15 = vpop.f32.mrb[90].mxu0  ;;  %v4238_v41 = vpack.c.bf16 %v4154_v33, %v4152_v24  ;;  %v6209_v26 = vadd.f32 %v9483_v3, %v1185_v51  ;;  %v9484_v20 = vld [vmem:[#allocation63_spill] sm:$0xff] }
 0x3a9   : > { %v4027_v23 = vmul.f32 0.2, %v6192_v44  ;;  %v6196_v63 = vadd.f32 %v6195_v2, %v3844_v15  ;;  %v3846_v14 = vpop.f32.mrb[91].mxu0  ;;  %v6211_v24 = vadd.f32 %v9484_v20, %v1190_v55  ;;  %v9485_v2 = vld [vmem:[#allocation64_spill] sm:$0xff] }
 0x3aa   : > { %v4028_v4 = vmul.f32 0.2, %v6194_v7  ;;  %v6198_v57 = vadd.f32 %v6197_v61, %v3846_v14  ;;  %5038 = vmatprep.subr.bf16.mxu1 %v4238_v41 }
 0x3ab   : > { %v4029_v53 = vmul.f32 0.2, %v6196_v63  ;;  %5039 = vmatpush1.bf16.msra.mxu1 %v4237_v22  ;;  %v4155_v10 = vmax.f32 %v6192_v44, %v4027_v23  ;;  %v6213_v22 = vadd.f32 %v9485_v2, %v1190_v55 }
 0x3ac   : > { %v4030_v12 = vmul.f32 0.2, %v6198_v57  ;;  %v4156_v11 = vmax.f32 %v6194_v7, %v4028_v4  ;;  %v7054_v4 = vld [vmem:[%s9333_s3 + $0x124] ss:$16 sps:$4 sm:$0xff]  }
 0x3ad   : > { %v4157_v52 = vmax.f32 %v6196_v63, %v4029_v53  ;;  %v7053_v63 = vld [vmem:[%s9333_s3 + $0x100] ss:$16 sps:$4 sm:$0xff]  }
 0x3ae   : > { %v4158_v46 = vmax.f32 %v6198_v57, %v4030_v12  ;;  %v3850_v54 = vpop.f32.mrb[92].mxu0  ;;  %4928 = vmatmul.mubr.bf16.gmra.mrb[152].mxu1 %v7047_v43  ;;  %v1195_v57 = vpop.permute.xlu0 %1194  ;;  %v9486_v53 = vld [vmem:[#allocation65_spill] sm:$0xff] }
 0x3af   : > { %v4239_v5 = vpack.c.bf16 %v4157_v52, %v4155_v10  ;;  %v6200_v25 = vadd.f32 %v6199_v47, %v3850_v54  ;;  %v3852_v27 = vpop.f32.mrb[93].mxu0  ;;  %4937 = vmatprep.mubr.bf16.mxu1 %v7048_v13  ;;  %v6215_v13 = vadd.f32 %v9486_v53, %v1195_v57  ;;  %v9487_v47 = vld [vmem:[#allocation66_spill] sm:$0xff]  ;;  %v1220_v53 = vpop.permute.xlu1 %1219 }
 0x3b0   : > { %v6202_v21 = vadd.f32 %v6201_v42, %v3852_v27  ;;  %v3854_v45 = vpop.f32.mrb[94].mxu0  ;;  %v4240_v32 = vpack.c.bf16 %v4158_v46, %v4156_v11  ;;  %v6217_v10 = vadd.f32 %v9487_v47, %v1195_v57  ;;  %v9488_v42 = vld [vmem:[#allocation67_spill] sm:$0xff] }
 0x3b1   : > { %v4031_v17 = vmul.f32 0.2, %v6200_v25  ;;  %v6204_v35 = vadd.f32 %v6203_v37, %v3854_v45  ;;  %v3856_v1 = vpop.f32.mrb[95].mxu0  ;;  %v6219_v11 = vadd.f32 %v9488_v42, %v1200_v8  ;;  %v9489_v37 = vld [vmem:[#allocation68_spill] sm:$0xff] }
 0x3b2   : > { %v4032_v56 = vmul.f32 0.2, %v6202_v21  ;;  %v6206_v16 = vadd.f32 %v6205_v58, %v3856_v1  ;;  %5040 = vmatprep.subr.bf16.mxu1 %v4240_v32 }
 0x3b3   : > { %v4033_v18 = vmul.f32 0.2, %v6204_v35  ;;  %5041 = vmatpush1.bf16.msra.mxu1 %v4239_v5  ;;  %v4159_v31 = vmax.f32 %v6200_v25, %v4031_v17  ;;  %v6221_v5 = vadd.f32 %v9489_v37, %v1200_v8 }
 0x3b4   : > { %v4034_v34 = vmul.f32 0.2, %v6206_v16  ;;  %v4160_v19 = vmax.f32 %v6202_v21, %v4032_v56  ;;  %v7057_v56 = vld [vmem:[%s9333_s3 + $0x144] ss:$16 sps:$4 sm:$0xff]  }
 0x3b5   : > { %v4161_v9 = vmax.f32 %v6204_v35, %v4033_v18  ;;  %v7056_v35 = vld [vmem:[%s9333_s3 + $0x120] ss:$16 sps:$4 sm:$0xff]  }
 0x3b6   : > { %v4162_v50 = vmax.f32 %v6206_v16, %v4034_v34  ;;  %v3860_v30 = vpop.f32.mrb[96].mxu0  ;;  %4938 = vmatmul.mubr.bf16.gmra.mrb[156].mxu1 %v7050_v49  ;;  %v1205_v16 = vpop.permute.xlu0 %1204  ;;  %v9490_v18 = vld [vmem:[#allocation69_spill] sm:$0xff] }
 0x3b7   : > { %v4241_v33 = vpack.c.bf16 %v4161_v9, %v4159_v31  ;;  %v6208_v48 = vadd.f32 %v6207_v62, %v3860_v30  ;;  %v3862_v40 = vpop.f32.mrb[97].mxu0  ;;  %4947 = vmatprep.mubr.bf16.mxu1 %v7051_v38  ;;  %v6223_v38 = vadd.f32 %v9490_v18, %v1205_v16  ;;  %v9491_v62 = vld [vmem:[#allocation70_spill] sm:$0xff]  ;;  %v1230_v18 = vpop.permute.xlu1 %1229 }
 0x3b8   : > { %v6210_v44 = vadd.f32 %v6209_v26, %v3862_v40  ;;  %v3864_v0 = vpop.f32.mrb[98].mxu0  ;;  %v4242_v39 = vpack.c.bf16 %v4162_v50, %v4160_v19  ;;  %v6225_v31 = vadd.f32 %v9491_v62, %v1205_v16  ;;  %v9492_v26 = vld [vmem:[#allocation71_spill] sm:$0xff] }
 0x3b9   : > { %v4035_v61 = vmul.f32 0.2, %v6208_v48  ;;  %v6212_v7 = vadd.f32 %v6211_v24, %v3864_v0  ;;  %v3866_v15 = vpop.f32.mrb[99].mxu0  ;;  %v6227_v19 = vadd.f32 %v9492_v26, %v1210_v28  ;;  %v9493_v24 = vld [vmem:[#allocation72_spill] sm:$0xff] }
 0x3ba   : > { %v4036_v41 = vmul.f32 0.2, %v6210_v44  ;;  %v6214_v23 = vadd.f32 %v6213_v22, %v3866_v15  ;;  %5042 = vmatprep.subr.bf16.mxu1 %v4242_v39 }
 0x3bb   : > { %v4037_v14 = vmul.f32 0.2, %v6212_v7  ;;  %5043 = vmatpush1.bf16.msra.mxu1 %v4241_v33  ;;  %v4163_v29 = vmax.f32 %v6208_v48, %v4035_v61  ;;  %v6229_v33 = vadd.f32 %v9493_v24, %v1210_v28 }
 0x3bc   : > { %v4038_v43 = vmul.f32 0.2, %v6214_v23  ;;  %v4164_v52 = vmax.f32 %v6210_v44, %v4036_v41  ;;  %v7060_v41 = vld [vmem:[%s9333_s3 + $0x164] ss:$16 sps:$4 sm:$0xff]  }
 0x3bd   : > { %v4165_v12 = vmax.f32 %v6212_v7, %v4037_v14  ;;  %v7059_v7 = vld [vmem:[%s9333_s3 + $0x140] ss:$16 sps:$4 sm:$0xff]  }
 0x3be   : > { %v4166_v36 = vmax.f32 %v6214_v23, %v4038_v43  ;;  %v3870_v6 = vpop.f32.mrb[100].mxu0  ;;  %4948 = vmatmul.mubr.bf16.gmra.mrb[160].mxu1 %v7053_v63  ;;  %v1215_v23 = vpop.permute.xlu0 %1214  ;;  %v9494_v14 = vld [vmem:[#allocation73_spill] sm:$0xff] }
 0x3bf   : > { %v4243_v46 = vpack.c.bf16 %v4165_v12, %v4163_v29  ;;  %v6216_v54 = vadd.f32 %v6215_v13, %v3870_v6  ;;  %v3872_v60 = vpop.f32.mrb[101].mxu0  ;;  %4957 = vmatprep.mubr.bf16.mxu1 %v7054_v4  ;;  %v6231_v4 = vadd.f32 %v9494_v14, %v1215_v23  ;;  %v9495_v13 = vld [vmem:[#allocation74_spill] sm:$0xff]  ;;  %v1240_v14 = vpop.permute.xlu1 %1239 }
 0x3c0   : > { %v6218_v25 = vadd.f32 %v6217_v10, %v3872_v60  ;;  %v3874_v27 = vpop.f32.mrb[102].mxu0  ;;  %v4244_v59 = vpack.c.bf16 %v4166_v36, %v4164_v52  ;;  %v6233_v29 = vadd.f32 %v9495_v13, %v1215_v23  ;;  %v9496_v10 = vld [vmem:[#allocation75_spill] sm:$0xff] }
 0x3c1   : > { %v4039_v58 = vmul.f32 0.2, %v6216_v54  ;;  %v6220_v21 = vadd.f32 %v6219_v11, %v3874_v27  ;;  %v3876_v45 = vpop.f32.mrb[103].mxu0  ;;  %v6235_v52 = vadd.f32 %v9496_v10, %v1220_v53  ;;  %v9497_v11 = vld [vmem:[#allocation76_spill] sm:$0xff] }
 0x3c2   : > { %v4040_v32 = vmul.f32 0.2, %v6218_v25  ;;  %v6222_v17 = vadd.f32 %v6221_v5, %v3876_v45  ;;  %5044 = vmatprep.subr.bf16.mxu1 %v4244_v59 }
 0x3c3   : > { %v4041_v1 = vmul.f32 0.2, %v6220_v21  ;;  %5045 = vmatpush1.bf16.msra.mxu1 %v4243_v46  ;;  %v4167_v51 = vmax.f32 %v6216_v54, %v4039_v58  ;;  %v6237_v46 = vadd.f32 %v9497_v11, %v1220_v53 }
 0x3c4   : > { %v4042_v49 = vmul.f32 0.2, %v6222_v17  ;;  %v4168_v9 = vmax.f32 %v6218_v25, %v4040_v32  ;;  %v7063_v32 = vld [vmem:[%s9333_s3 + $0x184] ss:$16 sps:$4 sm:$0xff]  }
 0x3c5   : > { %v4169_v34 = vmax.f32 %v6220_v21, %v4041_v1  ;;  %v7062_v21 = vld [vmem:[%s9333_s3 + $0x160] ss:$16 sps:$4 sm:$0xff]  }
 0x3c6   : > { %v4170_v55 = vmax.f32 %v6222_v17, %v4042_v49  ;;  %v3880_v3 = vpop.f32.mrb[104].mxu0  ;;  %4958 = vmatmul.mubr.bf16.gmra.mrb[164].mxu1 %v7056_v35  ;;  %v1225_v17 = vpop.permute.xlu0 %1224  ;;  %v9498_v1 = vld [vmem:[#allocation77_spill] sm:$0xff] }
 0x3c7   : > { %v4245_v50 = vpack.c.bf16 %v4169_v34, %v4167_v51  ;;  %v6224_v30 = vadd.f32 %v6223_v38, %v3880_v3  ;;  %v3882_v20 = vpop.f32.mrb[105].mxu0  ;;  %4967 = vmatprep.mubr.bf16.mxu1 %v7057_v56  ;;  %v6239_v56 = vadd.f32 %v9498_v1, %v1225_v17  ;;  %v9499_v38 = vld [vmem:[#allocation78_spill] sm:$0xff]  ;;  %v1250_v1 = vpop.permute.xlu1 %1249 }
 0x3c8   : > { %v6226_v48 = vadd.f32 %v6225_v31, %v3882_v20  ;;  %v3884_v40 = vpop.f32.mrb[106].mxu0  ;;  %v4246_v2 = vpack.c.bf16 %v4170_v55, %v4168_v9  ;;  %v6241_v51 = vadd.f32 %v9499_v38, %v1225_v17  ;;  %v9500_v31 = vld [vmem:[#allocation79_spill] sm:$0xff] }
 0x3c9   : > { %v4043_v22 = vmul.f32 0.2, %v6224_v30  ;;  %v6228_v44 = vadd.f32 %v6227_v19, %v3884_v40  ;;  %v3886_v0 = vpop.f32.mrb[107].mxu0  ;;  %v6243_v9 = vadd.f32 %v9500_v31, %v1230_v18  ;;  %v9501_v19 = vld [vmem:[#allocation80_spill] sm:$0xff] }
 0x3ca   : > { %v4044_v39 = vmul.f32 0.2, %v6226_v48  ;;  %v6230_v61 = vadd.f32 %v6229_v33, %v3886_v0  ;;  %5046 = vmatprep.subr.bf16.mxu1 %v4246_v2 }
 0x3cb   : > { %v4045_v15 = vmul.f32 0.2, %v6228_v44  ;;  %5047 = vmatpush1.bf16.msra.mxu1 %v4245_v50  ;;  %v4171_v57 = vmax.f32 %v6224_v30, %v4043_v22  ;;  %v6245_v50 = vadd.f32 %v9501_v19, %v1230_v18 }
 0x3cc   : > { %v4046_v63 = vmul.f32 0.2, %v6230_v61  ;;  %v4172_v12 = vmax.f32 %v6226_v48, %v4044_v39  ;;  %v7066_v39 = vld [vmem:[%s9333_s3 + $0x1a4] ss:$16 sps:$4 sm:$0xff]  }
 0x3cd   : > { %v4173_v43 = vmax.f32 %v6228_v44, %v4045_v15  ;;  %v7065_v44 = vld [vmem:[%s9333_s3 + $0x180] ss:$16 sps:$4 sm:$0xff]  }
 0x3ce   : > { %v4174_v8 = vmax.f32 %v6230_v61, %v4046_v63  ;;  %v3890_v47 = vpop.f32.mrb[108].mxu0  ;;  %4968 = vmatmul.mubr.bf16.gmra.mrb[168].mxu1 %v7059_v7  ;;  %v1235_v61 = vpop.permute.xlu0 %1234  ;;  %v9502_v15 = vld [vmem:[#allocation81_spill] sm:$0xff] }
 0x3cf   : > { %v4247_v36 = vpack.c.bf16 %v4173_v43, %v4171_v57  ;;  %v6232_v6 = vadd.f32 %v6231_v4, %v3890_v47  ;;  %v3892_v42 = vpop.f32.mrb[109].mxu0  ;;  %4977 = vmatprep.mubr.bf16.mxu1 %v7060_v41  ;;  %v6247_v41 = vadd.f32 %v9502_v15, %v1235_v61  ;;  %v9503_v4 = vld [vmem:[#allocation82_spill] sm:$0xff]  ;;  %v1260_v15 = vpop.permute.xlu1 %1259 }
 0x3d0   : > { %v6234_v54 = vadd.f32 %v6233_v29, %v3892_v42  ;;  %v3894_v60 = vpop.f32.mrb[110].mxu0  ;;  %v4248_v37 = vpack.c.bf16 %v4174_v8, %v4172_v12  ;;  %v6249_v57 = vadd.f32 %v9503_v4, %v1235_v61  ;;  %v9504_v29 = vld [vmem:[#allocation83_spill] sm:$0xff] }
 0x3d1   : > { %v4047_v5 = vmul.f32 0.2, %v6232_v6  ;;  %v6236_v25 = vadd.f32 %v6235_v52, %v3894_v60  ;;  %v3896_v27 = vpop.f32.mrb[111].mxu0  ;;  %v6251_v12 = vadd.f32 %v9504_v29, %v1240_v14  ;;  %v9505_v52 = vld [vmem:[#allocation84_spill] sm:$0xff] }
 0x3d2   : > { %v4048_v59 = vmul.f32 0.2, %v6234_v54  ;;  %v6238_v58 = vadd.f32 %v6237_v46, %v3896_v27  ;;  %5048 = vmatprep.subr.bf16.mxu1 %v4248_v37 }
 0x3d3   : > { %v4049_v45 = vmul.f32 0.2, %v6236_v25  ;;  %5049 = vmatpush1.bf16.msra.mxu1 %v4247_v36  ;;  %v4175_v16 = vmax.f32 %v6232_v6, %v4047_v5  ;;  %v6253_v36 = vadd.f32 %v9505_v52, %v1240_v14 }
 0x3d4   : > { %v4050_v35 = vmul.f32 0.2, %v6238_v58  ;;  %v4176_v34 = vmax.f32 %v6234_v54, %v4048_v59  ;;  %v7069_v59 = vld [vmem:[%s9333_s3 + $0x1c4] ss:$16 sps:$4 sm:$0xff]  }
 0x3d5   : > { %v4177_v49 = vmax.f32 %v6236_v25, %v4049_v45  ;;  %v7068_v25 = vld [vmem:[%s9333_s3 + $0x1a0] ss:$16 sps:$4 sm:$0xff]  }
 0x3d6   : > { %v4178_v28 = vmax.f32 %v6238_v58, %v4050_v35  ;;  %v3900_v62 = vpop.f32.mrb[112].mxu0  ;;  %4978 = vmatmul.mubr.bf16.gmra.mrb[172].mxu1 %v7062_v21  ;;  %v1245_v58 = vpop.permute.xlu0 %1244  ;;  %v9506_v45 = vld [vmem:[#allocation85_spill] sm:$0xff] }
 0x3d7   : > { %v4249_v55 = vpack.c.bf16 %v4177_v49, %v4175_v16  ;;  %v6240_v3 = vadd.f32 %v6239_v56, %v3900_v62  ;;  %v3902_v26 = vpop.f32.mrb[113].mxu0  ;;  %4987 = vmatprep.mubr.bf16.mxu1 %v7063_v32  ;;  %v6255_v32 = vadd.f32 %v9506_v45, %v1245_v58  ;;  %v9507_v56 = vld [vmem:[#allocation86_spill] sm:$0xff] }
 0x3d8   : > { %v6242_v30 = vadd.f32 %v6241_v51, %v3902_v26  ;;  %v3904_v20 = vpop.f32.mrb[114].mxu0  ;;  %v4250_v24 = vpack.c.bf16 %v4178_v28, %v4176_v34  ;;  %v6257_v16 = vadd.f32 %v9507_v56, %v1245_v58  ;;  %v9508_v51 = vld [vmem:[#allocation87_spill] sm:$0xff]  ;;  %v7083_v56 = vld [vmem:[%s9333_s3 + $0x48] ss:$16 sps:$4 sm:$0xff]  }
 0x3d9   : > { %v4051_v33 = vmul.f32 0.2, %v6240_v3  ;;  %v6244_v48 = vadd.f32 %v6243_v9, %v3904_v20  ;;  %v3906_v40 = vpop.f32.mrb[115].mxu0  ;;  %v6259_v34 = vadd.f32 %v9508_v51, %v1250_v1  ;;  %v9509_v9 = vld [vmem:[#allocation88_spill] sm:$0xff] }
 0x3da   : > { %v4052_v2 = vmul.f32 0.2, %v6242_v30  ;;  %v6246_v22 = vadd.f32 %v6245_v50, %v3906_v40  ;;  %5050 = vmatprep.subr.bf16.mxu1 %v4250_v24  ;;  %v7090_v51 = vld [vmem:[%s9333_s3 + $0xac] ss:$16 sps:$4 sm:$0xff]  }
 0x3db   : > { %v4053_v0 = vmul.f32 0.2, %v6244_v48  ;;  %5051 = vmatpush1.bf16.msra.mxu1 %v4249_v55  ;;  %v4179_v23 = vmax.f32 %v6240_v3, %v4051_v33  ;;  %v6261_v55 = vadd.f32 %v9509_v9, %v1250_v1  ;;  %v7081_v1 = vld [vmem:[%s9333_s3 + $0x4c] ss:$16 sps:$4 sm:$0xff]   ;;  %v7098_v9 = vld [vmem:[%s9333_s3 + $0xe8] ss:$16 sps:$4 sm:$0xff]  }
 0x3dc   : > { %v4054_v7 = vmul.f32 0.2, %v6246_v22  ;;  %v4180_v43 = vmax.f32 %v6242_v30, %v4052_v2  ;;  %v7072_v2 = vld [vmem:[%s9333_s3 + $0x1e4] ss:$16 sps:$4 sm:$0xff]  }
 0x3dd   : > { %v4181_v63 = vmax.f32 %v6244_v48, %v4053_v0  ;;  %v7071_v48 = vld [vmem:[%s9333_s3 + $0x1c0] ss:$16 sps:$4 sm:$0xff]  }
 0x3de   : > { %v4182_v53 = vmax.f32 %v6246_v22, %v4054_v7  ;;  %v3910_v13 = vpop.f32.mrb[116].mxu0  ;;  %4988 = vmatmul.mubr.bf16.gmra.mrb[176].mxu1 %v7065_v44  ;;  %v1255_v22 = vpop.permute.xlu0 %1254  ;;  %v9510_v0 = vld [vmem:[#allocation89_spill] sm:$0xff] }
 0x3df   : > { %v4251_v8 = vpack.c.bf16 %v4181_v63, %v4179_v23  ;;  %v6248_v47 = vadd.f32 %v6247_v41, %v3910_v13  ;;  %v3912_v10 = vpop.f32.mrb[117].mxu0  ;;  %4997 = vmatprep.mubr.bf16.mxu1 %v7066_v39  ;;  %v6263_v39 = vadd.f32 %v9510_v0, %v1255_v22  ;;  %v9511_v41 = vld [vmem:[#allocation90_spill] sm:$0xff] }
 0x3e0   : > { %v6250_v6 = vadd.f32 %v6249_v57, %v3912_v10  ;;  %v3914_v42 = vpop.f32.mrb[118].mxu0  ;;  %v4252_v11 = vpack.c.bf16 %v4182_v53, %v4180_v43  ;;  %v6265_v23 = vadd.f32 %v9511_v41, %v1255_v22  ;;  %v9512_v57 = vld [vmem:[#allocation91_spill] sm:$0xff] }
 0x3e1   : > { %v4055_v46 = vmul.f32 0.2, %v6248_v47  ;;  %v6252_v54 = vadd.f32 %v6251_v12, %v3914_v42  ;;  %v3916_v60 = vpop.f32.mrb[119].mxu0  ;;  %v6267_v43 = vadd.f32 %v9512_v57, %v1260_v15  ;;  %v9513_v12 = vld [vmem:[#allocation92_spill] sm:$0xff] }
 0x3e2   : > { %v4056_v37 = vmul.f32 0.2, %v6250_v6  ;;  %v6254_v5 = vadd.f32 %v6253_v36, %v3916_v60  ;;  %5052 = vmatprep.subr.bf16.mxu1 %v4252_v11  ;;  %v7117_v22 = vld [vmem:[%s9333_s3 + $0x1cc] ss:$16 sps:$4 sm:$0xff]  }
 0x3e3   : > { %v4057_v27 = vmul.f32 0.2, %v6252_v54  ;;  %5053 = vmatpush1.bf16.msra.mxu1 %v4251_v8  ;;  %v4183_v17 = vmax.f32 %v6248_v47, %v4055_v46  ;;  %v6269_v8 = vadd.f32 %v9513_v12, %v1260_v15  ;;  %v7120_v0 = vld [vmem:[%s9333_s3 + $0x1ec] ss:$16 sps:$4 sm:$0xff]   ;;  %v5388_v15 = vlaneseq }
 0x3e4   : > { %v4058_v21 = vmul.f32 0.2, %v6254_v5  ;;  %v4184_v49 = vmax.f32 %v6250_v6, %v4056_v37  ;;  %v7077_v37 = vld [vmem:[%s9333_s3 + $0xc] ss:$16 sps:$4 sm:$0xff]  }
 0x3e5   : > { %v4185_v35 = vmax.f32 %v6252_v54, %v4057_v27  ;;  %v7074_v54 = vld [vmem:[%s9333_s3 + $0x1e0] ss:$16 sps:$4 sm:$0xff]   ;;  %vm5490_vm1 = vcmp.lt.s32.totalorder %v5388_v15, 256 }
 0x3e6   : > { %v4186_v18 = vmax.f32 %v6254_v5, %v4058_v21  ;;  %v3920_v38 = vpop.f32.mrb[120].mxu0  ;;  %4998 = vmatmul.mubr.bf16.gmra.mrb[180].mxu1 %v7068_v25  ;;  %v9272_v12 = vld.sshfl [vmem:[%s9335_s5] sm:$0x11 pattern:$0x75316420] }
 0x3e7   : > { %v4253_v28 = vpack.c.bf16 %v4185_v35, %v4183_v17  ;;  %v6256_v62 = vadd.f32 %v6255_v32, %v3920_v38  ;;  %v3922_v31 = vpop.f32.mrb[121].mxu0  ;;  %5007 = vmatprep.mubr.bf16.mxu1 %v7069_v59  ;;  %v7075_v32 = vld [vmem:[%s9333_s3 + $0x8] ss:$16 sps:$4 sm:$0xff]   ;;  %v7078_v17 = vld [vmem:[%s9333_s3 + $0x2c] ss:$16 sps:$4 sm:$0xff]  }
 0x3e8   : > { %v6258_v3 = vadd.f32 %v6257_v16, %v3922_v31  ;;  %v3924_v26 = vpop.f32.mrb[122].mxu0  ;;  %v4254_v19 = vpack.c.bf16 %v4186_v18, %v4184_v49  ;;  %v7080_v35 = vld [vmem:[%s9333_s3 + $0x28] ss:$16 sps:$4 sm:$0xff]   ;;  %v7084_v16 = vld [vmem:[%s9333_s3 + $0x6c] ss:$16 sps:$4 sm:$0xff]  }
 0x3e9   : > { %v4059_v50 = vmul.f32 0.2, %v6256_v62  ;;  %v6260_v30 = vadd.f32 %v6259_v34, %v3924_v26  ;;  %v3926_v20 = vpop.f32.mrb[123].mxu0  ;;  %v7086_v49 = vld [vmem:[%s9333_s3 + $0x68] ss:$16 sps:$4 sm:$0xff]  }
 0x3ea   : > { %v4060_v24 = vmul.f32 0.2, %v6258_v3  ;;  %v6262_v33 = vadd.f32 %v6261_v55, %v3926_v20  ;;  %5054 = vmatprep.subr.bf16.mxu1 %v4254_v19  ;;  %v7087_v18 = vld [vmem:[%s9333_s3 + $0x8c] ss:$16 sps:$4 sm:$0xff]   ;;  %v7089_v38 = vld [vmem:[%s9333_s3 + $0x88] ss:$16 sps:$4 sm:$0xff]  }
 0x3eb   : > { %v4061_v40 = vmul.f32 0.2, %v6260_v30  ;;  %5055 = vmatpush1.bf16.msra.mxu1 %v4253_v28  ;;  %v4187_v61 = vmax.f32 %v6256_v62, %v4059_v50  ;;  %v7092_v34 = vld [vmem:[%s9333_s3 + $0xa8] ss:$16 sps:$4 sm:$0xff]   ;;  %v7093_v28 = vld [vmem:[%s9333_s3 + $0xcc] ss:$16 sps:$4 sm:$0xff]  }
 0x3ec   : > { %v4062_v44 = vmul.f32 0.2, %v6262_v33  ;;  %v4188_v63 = vmax.f32 %v6258_v3, %v4060_v24  ;;  %v7095_v62 = vld [vmem:[%s9333_s3 + $0xc8] ss:$16 sps:$4 sm:$0xff]   ;;  %v7096_v31 = vld [vmem:[%s9333_s3 + $0xec] ss:$16 sps:$4 sm:$0xff]  }
 0x3ed   : > { %v4189_v7 = vmax.f32 %v6260_v30, %v4061_v40  ;;  %v7099_v55 = vld [vmem:[%s9333_s3 + $0x10c] ss:$16 sps:$4 sm:$0xff]   ;;  %v7101_v3 = vld [vmem:[%s9333_s3 + $0x108] ss:$16 sps:$4 sm:$0xff]  }
 0x3ee   : > { %v4190_v14 = vmax.f32 %v6262_v33, %v4062_v44  ;;  %v3930_v4 = vpop.f32.mrb[124].mxu0  ;;  %5008 = vmatmul.mubr.bf16.gmra.mrb[184].mxu1 %v7071_v48  ;;  %v7102_v26 = vld [vmem:[%s9333_s3 + $0x12c] ss:$16 sps:$4 sm:$0xff]   ;;  %v7104_v19 = vld [vmem:[%s9333_s3 + $0x128] ss:$16 sps:$4 sm:$0xff]  }
 0x3ef   : > { %v4255_v53 = vpack.c.bf16 %v4189_v7, %v4187_v61  ;;  %v6264_v13 = vadd.f32 %v6263_v39, %v3930_v4  ;;  %v3932_v29 = vpop.f32.mrb[125].mxu0  ;;  %5017 = vmatprep.mubr.bf16.mxu1 %v7072_v2  ;;  %v7105_v50 = vld [vmem:[%s9333_s3 + $0x14c] ss:$16 sps:$4 sm:$0xff]   ;;  %v7107_v30 = vld [vmem:[%s9333_s3 + $0x148] ss:$16 sps:$4 sm:$0xff]  }
 0x3f0   : > { %v6266_v47 = vadd.f32 %v6265_v23, %v3932_v29  ;;  %v3934_v10 = vpop.f32.mrb[126].mxu0  ;;  %v4256_v52 = vpack.c.bf16 %v4190_v14, %v4188_v63  ;;  %v7108_v20 = vld [vmem:[%s9333_s3 + $0x16c] ss:$16 sps:$4 sm:$0xff]   ;;  %v7110_v24 = vld [vmem:[%s9333_s3 + $0x168] ss:$16 sps:$4 sm:$0xff]   ;;  %v9264_v23 = vshrl.u32 %v5388_v15, 7  ;;  %v4358_v63 = vpop.permute.xlu0 %4357 }
 0x3f1   : > { %v4063_v36 = vmul.f32 0.2, %v6264_v13  ;;  %v6268_v6 = vadd.f32 %v6267_v43, %v3934_v10  ;;  %v3936_v42 = vpop.f32.mrb[127].mxu0  ;;  %v7111_v33 = vld [vmem:[%s9333_s3 + $0x18c] ss:$16 sps:$4 sm:$0xff]  }
 0x3f2   : > { %v4064_v11 = vmul.f32 0.2, %v6266_v47  ;;  %v6270_v46 = vadd.f32 %v6269_v8, %v3936_v42  ;;  %5056 = vmatprep.subr.bf16.mxu1 %v4256_v52  ;;  %v7113_v48 = vld [vmem:[%s9333_s3 + $0x188] ss:$16 sps:$4 sm:$0xff]   ;;  %v7114_v40 = vld [vmem:[%s9333_s3 + $0x1ac] ss:$16 sps:$4 sm:$0xff]   ;;  %v5400_v52 = vcombine.high %v9272_v12, %v9272_v12 }
 0x3f3   : > { %v4065_v60 = vmul.f32 0.2, %v6268_v6  ;;  %5057 = vmatpush1.bf16.msra.mxu1 %v4255_v53  ;;  %v4191_v25 = vmax.f32 %v6264_v13, %v4063_v36  ;;  %v7116_v2 = vld [vmem:[%s9333_s3 + $0x1a8] ss:$16 sps:$4 sm:$0xff]   ;;  %v7196_v61 = vmov 1966171168   ;;  %v4363_v53 = vpop.permute.xlu1 %4362 }
 0x3f4   : > { %v4066_v5 = vmul.f32 0.2, %v6270_v46  ;;  %v4192_v59 = vmax.f32 %v6266_v47, %v4064_v11  ;;  %v7119_v44 = vld [vmem:[%s9333_s3 + $0x1c8] ss:$16 sps:$4 sm:$0xff]   ;;  %v5402_v7 = vunpack.c.l.s4 %v7196_v61 }
 0x3f5   : > { %v4193_v27 = vmax.f32 %v6268_v6, %v4065_v60  ;;  %v7122_v39 = vld [vmem:[%s9333_s3 + $0x1e8] ss:$16 sps:$4 sm:$0xff]  }
 0x3f6   : > { %v4194_v58 = vmax.f32 %v6270_v46, %v4066_v5  ;;  %5018 = vmatmul.mubr.bf16.gmra.mrb[188].mxu1 %v7074_v54  ;;  %v5403_v41 = vunpack.c.0.s8 %v5402_v7 }
 0x3f7   : > { %v4257_v21 = vpack.c.bf16 %v4193_v27, %v4191_v25  ;;  %5060 = vmatprep.mubr.bf16.mxu1 %v7077_v37  ;;  %v4368_v37 = vpop.permute.xlu0 %4367 }
 0x3f8   : > { %v4258_v45 = vpack.c.bf16 %v4194_v58, %v4192_v59  ;;  %v9267_v4 = vsub.s32 %v5403_v41, %v9264_v23 }
 0x3fa   : > { %5058 = vmatprep.subr.bf16.mxu1 %v4258_v45  ;;  %v5414_v11 = vrot.slane %v5400_v52, %v9267_v4  ;;  %v4373_v45 = vpop.permute.xlu1 %4372 }
 0x3fb   : > { %5059 = vmatpush1.bf16.msra.mxu1 %v4257_v21 }
 0x3fe   : > { %5061 = vmatmul.mubr.bf16.vlgmr.msra.gmra.mrb[128].mxu1 %v7075_v32 }
 0x3ff   : > { %5070 = vmatprep.mubr.bf16.mxu1 %v7078_v17 }
 0x406   : > { %5071 = vmatmul.mubr.bf16.gmra.mrb[132].mxu1 %v7080_v35 }
 0x407   : > { %5080 = vmatprep.mubr.bf16.mxu1 %v7081_v1 }
 0x40e   : > { %5081 = vmatmul.mubr.bf16.gmra.mrb[136].mxu1 %v7083_v56 }
 0x40f   : > { %5090 = vmatprep.mubr.bf16.mxu1 %v7084_v16 }
 0x416   : > { %5091 = vmatmul.mubr.bf16.gmra.mrb[140].mxu1 %v7086_v49 }
 0x417   : > { %5100 = vmatprep.mubr.bf16.mxu1 %v7087_v18 }
 0x41e   : > { %5101 = vmatmul.mubr.bf16.gmra.mrb[144].mxu1 %v7089_v38 }
 0x41f   : > { %5110 = vmatprep.mubr.bf16.mxu1 %v7090_v51 }
 0x426   : > { %5111 = vmatmul.mubr.bf16.gmra.mrb[148].mxu1 %v7092_v34 }
 0x427   : > { %5120 = vmatprep.mubr.bf16.mxu1 %v7093_v28 }
 0x42e   : > { %5121 = vmatmul.mubr.bf16.gmra.mrb[152].mxu1 %v7095_v62  ;;  %v4378_v62 = vpop.permute.xlu0 %4377 }
 0x42f   : > { %5130 = vmatprep.mubr.bf16.mxu1 %v7096_v31 }
 0x432   : > { %v4388_v7 = vpop.permute.xlu0 %4387 }
 0x436   : > { %5131 = vmatmul.mubr.bf16.gmra.mrb[156].mxu1 %v7098_v9 }
 0x437   : > { %5140 = vmatprep.mubr.bf16.mxu1 %v7099_v55 }
 0x43e   : > { %5141 = vmatmul.mubr.bf16.gmra.mrb[160].mxu1 %v7101_v3 }
 0x43f   : > { %5150 = vmatprep.mubr.bf16.mxu1 %v7102_v26 }
 0x446   : > { %5151 = vmatmul.mubr.bf16.gmra.mrb[164].mxu1 %v7104_v19 }
 0x447   : > { %5160 = vmatprep.mubr.bf16.mxu1 %v7105_v50  ;;  %v4383_v50 = vpop.permute.xlu1 %4382 }
 0x44e   : > { %5161 = vmatmul.mubr.bf16.gmra.mrb[168].mxu1 %v7107_v30 }
 0x44f   : > { %5170 = vmatprep.mubr.bf16.mxu1 %v7108_v20 }
 0x456   : > { %5171 = vmatmul.mubr.bf16.gmra.mrb[172].mxu1 %v7110_v24 }
 0x457   : > { %5180 = vmatprep.mubr.bf16.mxu1 %v7111_v33 }
 0x45e   : > { %5181 = vmatmul.mubr.bf16.gmra.mrb[176].mxu1 %v7113_v48 }
 0x45f   : > { %5190 = vmatprep.mubr.bf16.mxu1 %v7114_v40 }
 0x466   : > { %5191 = vmatmul.mubr.bf16.gmra.mrb[180].mxu1 %v7116_v2 }
 0x467   : > { %5200 = vmatprep.mubr.bf16.mxu1 %v7117_v22 }
 0x46e   : > { %5201 = vmatmul.mubr.bf16.gmra.mrb[184].mxu1 %v7119_v44 }
 0x46f   : > { %5210 = vmatprep.mubr.bf16.mxu1 %v7120_v0 }
 0x476   : > { %5211 = vmatmul.mubr.bf16.gmra.mrb[188].mxu1 %v7122_v39 }
 0x477   : > { %5449 = vmatprep.mubr.bf16.mxu1 %v5414_v11 }
 0x4d1   : > { %v5062_v14 = vpop.f32.mrb[128].mxu1 }
 0x4d2   : > { %v6271_v57 = vadd.f32 %v5062_v14, %v4358_v63  ;;  %v5064_v43 = vpop.f32.mrb[129].mxu1 }
 0x4d3   : > { %v6272_v13 = vadd.f32 %v5064_v43, %v4358_v63  ;;  %v5066_v29 = vpop.f32.mrb[130].mxu1 }
 0x4d4   : > { %v5221_v8 = vmul.f32 0.2, %v6271_v57  ;;  %v6273_v47 = vadd.f32 %v5066_v29, %v4363_v53  ;;  %v5068_v10 = vpop.f32.mrb[131].mxu1 }
 0x4d5   : > { %v5222_v36 = vmul.f32 0.2, %v6272_v13  ;;  %v6274_v6 = vadd.f32 %v5068_v10, %v4363_v53 }
 0x4d6   : > { %v5223_v42 = vmul.f32 0.2, %v6273_v47  ;;  %v5285_v54 = vmax.f32 %v6271_v57, %v5221_v8 }
 0x4d7   : > { %v5224_v46 = vmul.f32 0.2, %v6274_v6  ;;  %v5286_v5 = vmax.f32 %v6272_v13, %v5222_v36  ;;  %v4393_v13 = vpop.permute.xlu1 %4392 }
 0x4d8   : > { %v5287_v60 = vmax.f32 %v6273_v47, %v5223_v42 }
 0x4d9   : > { %v5288_v25 = vmax.f32 %v6274_v6, %v5224_v46  ;;  %v5072_v27 = vpop.f32.mrb[132].mxu1 }
 0x4da   : > { %v5349_v59 = vpack.c.bf16 %v5287_v60, %v5285_v54  ;;  %v6275_v58 = vadd.f32 %v5072_v27, %v4368_v37  ;;  %v5074_v21 = vpop.f32.mrb[133].mxu1 }
 0x4db   : > { %v6276_v32 = vadd.f32 %v5074_v21, %v4368_v37  ;;  %v5076_v17 = vpop.f32.mrb[134].mxu1  ;;  %v5350_v35 = vpack.c.bf16 %v5288_v25, %v5286_v5  ;;  %v4398_v37 = vpop.permute.xlu0 %4397 }
 0x4dc   : > { %v5225_v1 = vmul.f32 0.2, %v6275_v58  ;;  %v6277_v56 = vadd.f32 %v5076_v17, %v4373_v45  ;;  %v5078_v16 = vpop.f32.mrb[135].mxu1 }
 0x4dd   : > { %v5226_v49 = vmul.f32 0.2, %v6276_v32  ;;  %v6278_v18 = vadd.f32 %v5078_v16, %v4373_v45  ;;  %5417 = vmatprep.subr.bf16.mxu1 %v5350_v35  ;;  %v4403_v45 = vpop.permute.xlu1 %4402 }
 0x4de   : > { %v5227_v38 = vmul.f32 0.2, %v6277_v56  ;;  %5418 = vmatpush1.bf16.msra.mxu1 %v5349_v59  ;;  %v5289_v34 = vmax.f32 %v6275_v58, %v5225_v1 }
 0x4df   : > { %v5228_v51 = vmul.f32 0.2, %v6278_v18  ;;  %v5290_v31 = vmax.f32 %v6276_v32, %v5226_v49 }
 0x4e0   : > { %v5291_v28 = vmax.f32 %v6277_v56, %v5227_v38 }
 0x4e1   : > { %v5292_v9 = vmax.f32 %v6278_v18, %v5228_v51  ;;  %v5082_v55 = vpop.f32.mrb[136].mxu1 }
 0x4e2   : > { %v5351_v3 = vpack.c.bf16 %v5291_v28, %v5289_v34  ;;  %v6279_v26 = vadd.f32 %v5082_v55, %v4378_v62  ;;  %v5084_v19 = vpop.f32.mrb[137].mxu1 }
 0x4e3   : > { %v6280_v30 = vadd.f32 %v5084_v19, %v4378_v62  ;;  %v5086_v20 = vpop.f32.mrb[138].mxu1  ;;  %v5352_v24 = vpack.c.bf16 %v5292_v9, %v5290_v31  ;;  %v4408_v62 = vpop.permute.xlu0 %4407 }
 0x4e4   : > { %v5229_v33 = vmul.f32 0.2, %v6279_v26  ;;  %v6281_v48 = vadd.f32 %v5086_v20, %v4383_v50  ;;  %v5088_v40 = vpop.f32.mrb[139].mxu1 }
 0x4e5   : > { %v5230_v2 = vmul.f32 0.2, %v6280_v30  ;;  %v6282_v22 = vadd.f32 %v5088_v40, %v4383_v50  ;;  %5419 = vmatprep.subr.bf16.mxu1 %v5352_v24  ;;  %v4413_v50 = vpop.permute.xlu1 %4412 }
 0x4e6   : > { %v5231_v44 = vmul.f32 0.2, %v6281_v48  ;;  %5420 = vmatpush1.bf16.msra.mxu1 %v5351_v3  ;;  %v5293_v39 = vmax.f32 %v6279_v26, %v5229_v33 }
 0x4e7   : > { %v5232_v0 = vmul.f32 0.2, %v6282_v22  ;;  %v5294_v41 = vmax.f32 %v6280_v30, %v5230_v2 }
 0x4e8   : > { %v5295_v61 = vmax.f32 %v6281_v48, %v5231_v44 }
 0x4e9   : > { %v5296_v63 = vmax.f32 %v6282_v22, %v5232_v0  ;;  %v5092_v14 = vpop.f32.mrb[140].mxu1 }
 0x4ea   : > { %v5353_v57 = vpack.c.bf16 %v5295_v61, %v5293_v39  ;;  %v6283_v43 = vadd.f32 %v5092_v14, %v4388_v7  ;;  %v5094_v53 = vpop.f32.mrb[141].mxu1 }
 0x4eb   : > { %v6284_v29 = vadd.f32 %v5094_v53, %v4388_v7  ;;  %v5096_v8 = vpop.f32.mrb[142].mxu1  ;;  %v5354_v47 = vpack.c.bf16 %v5296_v63, %v5294_v41  ;;  %v4418_v7 = vpop.permute.xlu0 %4417 }
 0x4ec   : > { %v5233_v10 = vmul.f32 0.2, %v6283_v43  ;;  %v6285_v52 = vadd.f32 %v5096_v8, %v4393_v13  ;;  %v5098_v36 = vpop.f32.mrb[143].mxu1 }
 0x4ed   : > { %v5234_v6 = vmul.f32 0.2, %v6284_v29  ;;  %v6286_v42 = vadd.f32 %v5098_v36, %v4393_v13  ;;  %5421 = vmatprep.subr.bf16.mxu1 %v5354_v47  ;;  %v4423_v13 = vpop.permute.xlu1 %4422 }
 0x4ee   : > { %v5235_v11 = vmul.f32 0.2, %v6285_v52  ;;  %5422 = vmatpush1.bf16.msra.mxu1 %v5353_v57  ;;  %v5297_v54 = vmax.f32 %v6283_v43, %v5233_v10 }
 0x4ef   : > { %v5236_v46 = vmul.f32 0.2, %v6286_v42  ;;  %v5298_v5 = vmax.f32 %v6284_v29, %v5234_v6 }
 0x4f0   : > { %v5299_v60 = vmax.f32 %v6285_v52, %v5235_v11 }
 0x4f1   : > { %v5300_v25 = vmax.f32 %v6286_v42, %v5236_v46  ;;  %v5102_v27 = vpop.f32.mrb[144].mxu1 }
 0x4f2   : > { %v5355_v59 = vpack.c.bf16 %v5299_v60, %v5297_v54  ;;  %v6287_v58 = vadd.f32 %v5102_v27, %v4398_v37  ;;  %v5104_v21 = vpop.f32.mrb[145].mxu1 }
 0x4f3   : > { %v6288_v32 = vadd.f32 %v5104_v21, %v4398_v37  ;;  %v5106_v17 = vpop.f32.mrb[146].mxu1  ;;  %v5356_v35 = vpack.c.bf16 %v5300_v25, %v5298_v5  ;;  %v4428_v37 = vpop.permute.xlu0 %4427 }
 0x4f4   : > { %v5237_v1 = vmul.f32 0.2, %v6287_v58  ;;  %v6289_v56 = vadd.f32 %v5106_v17, %v4403_v45  ;;  %v5108_v16 = vpop.f32.mrb[147].mxu1 }
 0x4f5   : > { %v5238_v49 = vmul.f32 0.2, %v6288_v32  ;;  %v6290_v18 = vadd.f32 %v5108_v16, %v4403_v45  ;;  %5423 = vmatprep.subr.bf16.mxu1 %v5356_v35  ;;  %v4433_v45 = vpop.permute.xlu1 %4432 }
 0x4f6   : > { %v5239_v38 = vmul.f32 0.2, %v6289_v56  ;;  %5424 = vmatpush1.bf16.msra.mxu1 %v5355_v59  ;;  %v5301_v34 = vmax.f32 %v6287_v58, %v5237_v1 }
 0x4f7   : > { %v5240_v51 = vmul.f32 0.2, %v6290_v18  ;;  %v5302_v31 = vmax.f32 %v6288_v32, %v5238_v49 }
 0x4f8   : > { %v5303_v28 = vmax.f32 %v6289_v56, %v5239_v38 }
 0x4f9   : > { %v5304_v9 = vmax.f32 %v6290_v18, %v5240_v51  ;;  %v5112_v55 = vpop.f32.mrb[148].mxu1 }
 0x4fa   : > { %v5357_v3 = vpack.c.bf16 %v5303_v28, %v5301_v34  ;;  %v6291_v26 = vadd.f32 %v5112_v55, %v4408_v62  ;;  %v5114_v19 = vpop.f32.mrb[149].mxu1 }
 0x4fb   : > { %v6292_v30 = vadd.f32 %v5114_v19, %v4408_v62  ;;  %v5116_v20 = vpop.f32.mrb[150].mxu1  ;;  %v5358_v24 = vpack.c.bf16 %v5304_v9, %v5302_v31  ;;  %v4438_v62 = vpop.permute.xlu0 %4437 }
 0x4fc   : > { %v5241_v33 = vmul.f32 0.2, %v6291_v26  ;;  %v6293_v48 = vadd.f32 %v5116_v20, %v4413_v50  ;;  %v5118_v40 = vpop.f32.mrb[151].mxu1 }
 0x4fd   : > { %v5242_v2 = vmul.f32 0.2, %v6292_v30  ;;  %v6294_v22 = vadd.f32 %v5118_v40, %v4413_v50  ;;  %5425 = vmatprep.subr.bf16.mxu1 %v5358_v24  ;;  %v4443_v50 = vpop.permute.xlu1 %4442 }
 0x4fe   : > { %v5243_v44 = vmul.f32 0.2, %v6293_v48  ;;  %5426 = vmatpush1.bf16.msra.mxu1 %v5357_v3  ;;  %v5305_v39 = vmax.f32 %v6291_v26, %v5241_v33 }
 0x4ff   : > { %v5244_v0 = vmul.f32 0.2, %v6294_v22  ;;  %v5306_v41 = vmax.f32 %v6292_v30, %v5242_v2 }
 0x500   : > { %v5307_v61 = vmax.f32 %v6293_v48, %v5243_v44 }
 0x501   : > { %v5308_v63 = vmax.f32 %v6294_v22, %v5244_v0  ;;  %v5122_v14 = vpop.f32.mrb[152].mxu1 }
 0x502   : > { %v5359_v57 = vpack.c.bf16 %v5307_v61, %v5305_v39  ;;  %v6295_v43 = vadd.f32 %v5122_v14, %v4418_v7  ;;  %v5124_v53 = vpop.f32.mrb[153].mxu1 }
 0x503   : > { %v6296_v29 = vadd.f32 %v5124_v53, %v4418_v7  ;;  %v5126_v8 = vpop.f32.mrb[154].mxu1  ;;  %v5360_v47 = vpack.c.bf16 %v5308_v63, %v5306_v41  ;;  %v4448_v7 = vpop.permute.xlu0 %4447 }
 0x504   : > { %v5245_v10 = vmul.f32 0.2, %v6295_v43  ;;  %v6297_v52 = vadd.f32 %v5126_v8, %v4423_v13  ;;  %v5128_v36 = vpop.f32.mrb[155].mxu1 }
 0x505   : > { %v5246_v6 = vmul.f32 0.2, %v6296_v29  ;;  %v6298_v42 = vadd.f32 %v5128_v36, %v4423_v13  ;;  %5427 = vmatprep.subr.bf16.mxu1 %v5360_v47  ;;  %v4453_v13 = vpop.permute.xlu1 %4452 }
 0x506   : > { %v5247_v11 = vmul.f32 0.2, %v6297_v52  ;;  %5428 = vmatpush1.bf16.msra.mxu1 %v5359_v57  ;;  %v5309_v54 = vmax.f32 %v6295_v43, %v5245_v10 }
 0x507   : > { %v5248_v46 = vmul.f32 0.2, %v6298_v42  ;;  %v5310_v5 = vmax.f32 %v6296_v29, %v5246_v6 }
 0x508   : > { %v5311_v60 = vmax.f32 %v6297_v52, %v5247_v11 }
 0x509   : > { %v5312_v25 = vmax.f32 %v6298_v42, %v5248_v46  ;;  %v5132_v27 = vpop.f32.mrb[156].mxu1 }
 0x50a   : > { %v5361_v59 = vpack.c.bf16 %v5311_v60, %v5309_v54  ;;  %v6299_v58 = vadd.f32 %v5132_v27, %v4428_v37  ;;  %v5134_v21 = vpop.f32.mrb[157].mxu1 }
 0x50b   : > { %v6300_v32 = vadd.f32 %v5134_v21, %v4428_v37  ;;  %v5136_v17 = vpop.f32.mrb[158].mxu1  ;;  %v5362_v35 = vpack.c.bf16 %v5312_v25, %v5310_v5  ;;  %v4458_v37 = vpop.permute.xlu0 %4457 }
 0x50c   : > { %v5249_v1 = vmul.f32 0.2, %v6299_v58  ;;  %v6301_v56 = vadd.f32 %v5136_v17, %v4433_v45  ;;  %v5138_v16 = vpop.f32.mrb[159].mxu1 }
 0x50d   : > { %v5250_v49 = vmul.f32 0.2, %v6300_v32  ;;  %v6302_v18 = vadd.f32 %v5138_v16, %v4433_v45  ;;  %5429 = vmatprep.subr.bf16.mxu1 %v5362_v35  ;;  %v4463_v45 = vpop.permute.xlu1 %4462 }
 0x50e   : > { %v5251_v38 = vmul.f32 0.2, %v6301_v56  ;;  %5430 = vmatpush1.bf16.msra.mxu1 %v5361_v59  ;;  %v5313_v34 = vmax.f32 %v6299_v58, %v5249_v1 }
 0x50f   : > { %v5252_v51 = vmul.f32 0.2, %v6302_v18  ;;  %v5314_v31 = vmax.f32 %v6300_v32, %v5250_v49 }
 0x510   : > { %v5315_v28 = vmax.f32 %v6301_v56, %v5251_v38 }
 0x511   : > { %v5316_v9 = vmax.f32 %v6302_v18, %v5252_v51  ;;  %v5142_v55 = vpop.f32.mrb[160].mxu1 }
 0x512   : > { %v5363_v3 = vpack.c.bf16 %v5315_v28, %v5313_v34  ;;  %v6303_v26 = vadd.f32 %v5142_v55, %v4438_v62  ;;  %v5144_v19 = vpop.f32.mrb[161].mxu1 }
 0x513   : > { %v6304_v30 = vadd.f32 %v5144_v19, %v4438_v62  ;;  %v5146_v20 = vpop.f32.mrb[162].mxu1  ;;  %v5364_v24 = vpack.c.bf16 %v5316_v9, %v5314_v31  ;;  %v4468_v62 = vpop.permute.xlu0 %4467 }
 0x514   : > { %v5253_v33 = vmul.f32 0.2, %v6303_v26  ;;  %v6305_v48 = vadd.f32 %v5146_v20, %v4443_v50  ;;  %v5148_v40 = vpop.f32.mrb[163].mxu1 }
 0x515   : > { %v5254_v2 = vmul.f32 0.2, %v6304_v30  ;;  %v6306_v22 = vadd.f32 %v5148_v40, %v4443_v50  ;;  %5431 = vmatprep.subr.bf16.mxu1 %v5364_v24  ;;  %v4473_v50 = vpop.permute.xlu1 %4472 }
 0x516   : > { %v5255_v44 = vmul.f32 0.2, %v6305_v48  ;;  %5432 = vmatpush1.bf16.msra.mxu1 %v5363_v3  ;;  %v5317_v39 = vmax.f32 %v6303_v26, %v5253_v33 }
 0x517   : > { %v5256_v0 = vmul.f32 0.2, %v6306_v22  ;;  %v5318_v41 = vmax.f32 %v6304_v30, %v5254_v2 }
 0x518   : > { %v5319_v61 = vmax.f32 %v6305_v48, %v5255_v44 }
 0x519   : > { %v5320_v63 = vmax.f32 %v6306_v22, %v5256_v0  ;;  %v5152_v14 = vpop.f32.mrb[164].mxu1 }
 0x51a   : > { %v5365_v57 = vpack.c.bf16 %v5319_v61, %v5317_v39  ;;  %v6307_v43 = vadd.f32 %v5152_v14, %v4448_v7  ;;  %v5154_v53 = vpop.f32.mrb[165].mxu1 }
 0x51b   : > { %v6308_v29 = vadd.f32 %v5154_v53, %v4448_v7  ;;  %v5156_v8 = vpop.f32.mrb[166].mxu1  ;;  %v5366_v47 = vpack.c.bf16 %v5320_v63, %v5318_v41  ;;  %v4478_v7 = vpop.permute.xlu0 %4477 }
 0x51c   : > { %v5257_v10 = vmul.f32 0.2, %v6307_v43  ;;  %v6309_v52 = vadd.f32 %v5156_v8, %v4453_v13  ;;  %v5158_v36 = vpop.f32.mrb[167].mxu1 }
 0x51d   : > { %v5258_v6 = vmul.f32 0.2, %v6308_v29  ;;  %v6310_v42 = vadd.f32 %v5158_v36, %v4453_v13  ;;  %5433 = vmatprep.subr.bf16.mxu1 %v5366_v47  ;;  %v4483_v13 = vpop.permute.xlu1 %4482 }
 0x51e   : > { %v5259_v11 = vmul.f32 0.2, %v6309_v52  ;;  %5434 = vmatpush1.bf16.msra.mxu1 %v5365_v57  ;;  %v5321_v54 = vmax.f32 %v6307_v43, %v5257_v10 }
 0x51f   : > { %v5260_v46 = vmul.f32 0.2, %v6310_v42  ;;  %v5322_v5 = vmax.f32 %v6308_v29, %v5258_v6 }
 0x520   : > { %v5323_v60 = vmax.f32 %v6309_v52, %v5259_v11 }
 0x521   : > { %v5324_v25 = vmax.f32 %v6310_v42, %v5260_v46  ;;  %v5162_v27 = vpop.f32.mrb[168].mxu1 }
 0x522   : > { %v5367_v59 = vpack.c.bf16 %v5323_v60, %v5321_v54  ;;  %v6311_v58 = vadd.f32 %v5162_v27, %v4458_v37  ;;  %v5164_v21 = vpop.f32.mrb[169].mxu1 }
 0x523   : > { %v6312_v32 = vadd.f32 %v5164_v21, %v4458_v37  ;;  %v5166_v17 = vpop.f32.mrb[170].mxu1  ;;  %v5368_v35 = vpack.c.bf16 %v5324_v25, %v5322_v5  ;;  %v4488_v37 = vpop.permute.xlu0 %4487 }
 0x524   : > { %v5261_v1 = vmul.f32 0.2, %v6311_v58  ;;  %v6313_v56 = vadd.f32 %v5166_v17, %v4463_v45  ;;  %v5168_v16 = vpop.f32.mrb[171].mxu1 }
 0x525   : > { %v5262_v49 = vmul.f32 0.2, %v6312_v32  ;;  %v6314_v18 = vadd.f32 %v5168_v16, %v4463_v45  ;;  %5435 = vmatprep.subr.bf16.mxu1 %v5368_v35  ;;  %v4493_v45 = vpop.permute.xlu1 %4492 }
 0x526   : > { %v5263_v38 = vmul.f32 0.2, %v6313_v56  ;;  %5436 = vmatpush1.bf16.msra.mxu1 %v5367_v59  ;;  %v5325_v34 = vmax.f32 %v6311_v58, %v5261_v1 }
 0x527   : > { %v5264_v51 = vmul.f32 0.2, %v6314_v18  ;;  %v5326_v31 = vmax.f32 %v6312_v32, %v5262_v49 }
 0x528   : > { %v5327_v28 = vmax.f32 %v6313_v56, %v5263_v38 }
 0x529   : > { %v5328_v9 = vmax.f32 %v6314_v18, %v5264_v51  ;;  %v5172_v55 = vpop.f32.mrb[172].mxu1 }
 0x52a   : > { %v5369_v3 = vpack.c.bf16 %v5327_v28, %v5325_v34  ;;  %v6315_v26 = vadd.f32 %v5172_v55, %v4468_v62  ;;  %v5174_v19 = vpop.f32.mrb[173].mxu1 }
 0x52b   : > { %v6316_v30 = vadd.f32 %v5174_v19, %v4468_v62  ;;  %v5176_v20 = vpop.f32.mrb[174].mxu1  ;;  %v5370_v24 = vpack.c.bf16 %v5328_v9, %v5326_v31  ;;  %v4498_v62 = vpop.permute.xlu0 %4497 }
 0x52c   : > { %v5265_v33 = vmul.f32 0.2, %v6315_v26  ;;  %v6317_v48 = vadd.f32 %v5176_v20, %v4473_v50  ;;  %v5178_v40 = vpop.f32.mrb[175].mxu1 }
 0x52d   : > { %v5266_v2 = vmul.f32 0.2, %v6316_v30  ;;  %v6318_v22 = vadd.f32 %v5178_v40, %v4473_v50  ;;  %5437 = vmatprep.subr.bf16.mxu1 %v5370_v24  ;;  %v4503_v50 = vpop.permute.xlu1 %4502 }
 0x52e   : > { %v5267_v44 = vmul.f32 0.2, %v6317_v48  ;;  %5438 = vmatpush1.bf16.msra.mxu1 %v5369_v3  ;;  %v5329_v39 = vmax.f32 %v6315_v26, %v5265_v33 }
 0x52f   : > { %v5268_v0 = vmul.f32 0.2, %v6318_v22  ;;  %v5330_v41 = vmax.f32 %v6316_v30, %v5266_v2 }
 0x530   : > { %v5331_v61 = vmax.f32 %v6317_v48, %v5267_v44 }
 0x531   : > { %v5332_v63 = vmax.f32 %v6318_v22, %v5268_v0  ;;  %v5182_v14 = vpop.f32.mrb[176].mxu1 }
 0x532   : > { %v5371_v57 = vpack.c.bf16 %v5331_v61, %v5329_v39  ;;  %v6319_v43 = vadd.f32 %v5182_v14, %v4478_v7  ;;  %v5184_v53 = vpop.f32.mrb[177].mxu1 }
 0x533   : > { %v6320_v29 = vadd.f32 %v5184_v53, %v4478_v7  ;;  %v5186_v8 = vpop.f32.mrb[178].mxu1  ;;  %v5372_v47 = vpack.c.bf16 %v5332_v63, %v5330_v41  ;;  %v4508_v7 = vpop.permute.xlu0 %4507 }
 0x534   : > { %v5269_v10 = vmul.f32 0.2, %v6319_v43  ;;  %v6321_v52 = vadd.f32 %v5186_v8, %v4483_v13  ;;  %v5188_v36 = vpop.f32.mrb[179].mxu1 }
 0x535   : > { %v5270_v6 = vmul.f32 0.2, %v6320_v29  ;;  %v6322_v42 = vadd.f32 %v5188_v36, %v4483_v13  ;;  %5439 = vmatprep.subr.bf16.mxu1 %v5372_v47  ;;  %v4513_v13 = vpop.permute.xlu1 %4512 }
 0x536   : > { %v5271_v11 = vmul.f32 0.2, %v6321_v52  ;;  %5440 = vmatpush1.bf16.msra.mxu1 %v5371_v57  ;;  %v5333_v54 = vmax.f32 %v6319_v43, %v5269_v10 }
 0x537   : > { %v5272_v46 = vmul.f32 0.2, %v6322_v42  ;;  %v5334_v5 = vmax.f32 %v6320_v29, %v5270_v6 }
 0x538   : > { %v5335_v60 = vmax.f32 %v6321_v52, %v5271_v11 }
 0x539   : > { %v5336_v25 = vmax.f32 %v6322_v42, %v5272_v46  ;;  %v5192_v27 = vpop.f32.mrb[180].mxu1 }
 0x53a   : > { %v5373_v59 = vpack.c.bf16 %v5335_v60, %v5333_v54  ;;  %v6323_v58 = vadd.f32 %v5192_v27, %v4488_v37  ;;  %v5194_v21 = vpop.f32.mrb[181].mxu1 }
 0x53b   : > { %v6324_v32 = vadd.f32 %v5194_v21, %v4488_v37  ;;  %v5196_v17 = vpop.f32.mrb[182].mxu1  ;;  %v5374_v35 = vpack.c.bf16 %v5336_v25, %v5334_v5  ;;  %v5386_v21 = vpop.permute.xlu0 %5385 }
 0x53c   : > { %v5273_v1 = vmul.f32 0.2, %v6323_v58  ;;  %v6325_v56 = vadd.f32 %v5196_v17, %v4493_v45  ;;  %v5198_v16 = vpop.f32.mrb[183].mxu1 }
 0x53d   : > { %v5274_v49 = vmul.f32 0.2, %v6324_v32  ;;  %v6326_v18 = vadd.f32 %v5198_v16, %v4493_v45  ;;  %5441 = vmatprep.subr.bf16.mxu1 %v5374_v35 }
 0x53e   : > { %v5275_v38 = vmul.f32 0.2, %v6325_v56  ;;  %5442 = vmatpush1.bf16.msra.mxu1 %v5373_v59  ;;  %v5337_v34 = vmax.f32 %v6323_v58, %v5273_v1  ;;  %v5407_v59 = vrot.slane %v9272_v12, %v9267_v4  ;;  %v5390_v58 = vsub.s32 0, %v9264_v23 }
 0x53f   : > { %v5276_v51 = vmul.f32 0.2, %v6326_v18  ;;  %v5338_v31 = vmax.f32 %v6324_v32, %v5274_v49 }
 0x540   : > { %v5339_v28 = vmax.f32 %v6325_v56, %v5275_v38  ;;  %v5391_v45 = vrot.slane %v5386_v21, %v5390_v58 }
 0x541   : > { %v5340_v9 = vmax.f32 %v6326_v18, %v5276_v51  ;;  %v5202_v55 = vpop.f32.mrb[184].mxu1 }
 0x542   : > { %v5375_v3 = vpack.c.bf16 %v5339_v28, %v5337_v34  ;;  %v6327_v26 = vadd.f32 %v5202_v55, %v4498_v62  ;;  %v5204_v19 = vpop.f32.mrb[185].mxu1 }
 0x543   : > { %v6328_v30 = vadd.f32 %v5204_v19, %v4498_v62  ;;  %v5206_v20 = vpop.f32.mrb[186].mxu1  ;;  %v5376_v24 = vpack.c.bf16 %v5340_v9, %v5338_v31 }
 0x544   : > { %v5277_v33 = vmul.f32 0.2, %v6327_v26  ;;  %v6329_v48 = vadd.f32 %v5206_v20, %v4503_v50  ;;  %v5208_v40 = vpop.f32.mrb[187].mxu1 }
 0x545   : > { %v5278_v2 = vmul.f32 0.2, %v6328_v30  ;;  %v6330_v22 = vadd.f32 %v5208_v40, %v4503_v50  ;;  %5443 = vmatprep.subr.bf16.mxu1 %v5376_v24 }
 0x546   : > { %v5279_v44 = vmul.f32 0.2, %v6329_v48  ;;  %5444 = vmatpush1.bf16.msra.mxu1 %v5375_v3  ;;  %v5341_v39 = vmax.f32 %v6327_v26, %v5277_v33 }
 0x547   : > { %v5280_v0 = vmul.f32 0.2, %v6330_v22  ;;  %v5342_v41 = vmax.f32 %v6328_v30, %v5278_v2 }
 0x548   : > { %v5343_v61 = vmax.f32 %v6329_v48, %v5279_v44 }
 0x549   : > { %v5344_v63 = vmax.f32 %v6330_v22, %v5280_v0  ;;  %v5212_v14 = vpop.f32.mrb[188].mxu1 }
 0x54a   : > { %v5377_v57 = vpack.c.bf16 %v5343_v61, %v5341_v39  ;;  %v6331_v43 = vadd.f32 %v5212_v14, %v4508_v7  ;;  %v5214_v53 = vpop.f32.mrb[189].mxu1 }
 0x54b   : > { %v6332_v29 = vadd.f32 %v5214_v53, %v4508_v7  ;;  %v5216_v8 = vpop.f32.mrb[190].mxu1  ;;  %v5378_v47 = vpack.c.bf16 %v5344_v63, %v5342_v41 }
 0x54c   : > { %v5281_v10 = vmul.f32 0.2, %v6331_v43  ;;  %v6333_v52 = vadd.f32 %v5216_v8, %v4513_v13  ;;  %v5218_v36 = vpop.f32.mrb[191].mxu1 }
 0x54d   : > { %v5282_v6 = vmul.f32 0.2, %v6332_v29  ;;  %v6334_v42 = vadd.f32 %v5218_v36, %v4513_v13  ;;  %5445 = vmatprep.subr.bf16.mxu1 %v5378_v47 }
 0x54e   : > { %v5283_v11 = vmul.f32 0.2, %v6333_v52  ;;  %5446 = vmatpush1.bf16.msra.mxu1 %v5377_v57  ;;  %v5345_v54 = vmax.f32 %v6331_v43, %v5281_v10 }
 0x54f   : > { %v5284_v46 = vmul.f32 0.2, %v6334_v42  ;;  %v5346_v37 = vmax.f32 %v6332_v29, %v5282_v6 }
 0x550   : > { %v5347_v60 = vmax.f32 %v6333_v52, %v5283_v11 }
 0x551   : > { %v5348_v5 = vmax.f32 %v6334_v42, %v5284_v46 }
 0x552   : > { %v5379_v25 = vpack.c.bf16 %v5347_v60, %v5345_v54 }
 0x553   : > { %v5380_v27 = vpack.c.bf16 %v5348_v5, %v5346_v37 }
 0x555   : > { %5447 = vmatprep.subr.bf16.mxu1 %v5380_v27 }
 0x556   : > { %5448 = vmatpush1.bf16.msra.mxu1 %v5379_v25 }
 0x559   : > { %5450 = vmatmul.mubr.bf16.vlgmr.msra.gmra.mrb[192].mxu1 %v5407_v59 }
 0x62c   : > { %v5451_v32 = vpop.f32.mrb[192].mxu1 }
 0x62d   : > { %v5452_v17 = vadd.f32 %v5451_v32, %v5391_v45  ;;  %v5453_v35 = vpop.f32.mrb[193].mxu1 }
 0x62e   : > { %v5454_v1 = vadd.f32 %v5453_v35, %v5391_v45  ;;  %v5455_v56 = vpop.f32.mrb[194].mxu1 }
 0x62f   : > { %v5895_v16 = vmul.f32 -1.442695, %v5452_v17  ;;  %v5456_v49 = vpop.f32.mrb[195].mxu1 }
 0x630   : > { %v5896_v18 = vmul.f32 -1.442695, %v5454_v1 }
 0x631   : > { %7123 = vpow2.f32 %v5895_v16 }
 0x632   : > { %7125 = vpow2.f32 %v5896_v18 }
 0x63b   : > { %v7124_v38 = vpop.eup %7123 }
 0x63c   : > { %v7126_v12 = vpop.eup %7125  ;;  %v5464_v51 = vadd.f32 1.0, %v7124_v38 }
 0x63d   : > { %v5465_v34 = vadd.f32 1.0, %v7126_v12 }
 0x63e   : > { %7127 = vrcp.f32 %v5464_v51 }
 0x63f   : > { %7129 = vrcp.f32 %v5465_v34 }
 0x648   : > { %v7128_v23 = vpop.eup %7127 }
 0x649   : > { %v7130_v28 = vpop.eup %7129 }
 0x64a   : > { %v5472_v62 = vcombine.low %v7128_v23, %v7130_v28 }
 0x64c   : > { %v5479_v31 = vrot.slane %v5472_v62, %v9267_v4 }
 0x64e   : > { %v5486_v9 = vrot.slane %v5479_v31, %v9267_v4 }
 0x650   : > { %5492 = vst.msk [vmem:[%s276_s21] sm:$0x3] %vm5490_vm1, %v5486_v9 }
 0x651   : > { %7144 = shalt.err (!%p7141_p3)
}
 0x652   : > { %s7145_s14 = scalar_lea.hbm %s9288_s23, 32  ;;  %s7149_s16 = scalar_lea.hbm %s9337_s7, 64 }
 0x653   : > { %p7146_p4 = scmp.ne.s32.totalorder %s9288_s23, %s7145_s14  ;;  %p7150_p9 = scmp.lt.u32.totalorder %s9288_s23, %s9337_s7 }
 0x654   : > { %p7151_p10 = scmp.lt.u32.totalorder %s7149_s16, %s7145_s14  ;;  %p7153_p12 = scmp.lt.u32.totalorder %s7145_s14, %s9288_s23 }
 0x655   : > { %p7147_p7 = pnand %p7146_p4, %p7276_p5 }
 0x656   : > { %p7152_p11 = por %p7151_p10, %p7150_p9 }
 0x657   : > { %p7148_p8 = pneg %p7147_p7 }
 0x658   : > { %p7154_p13 = por %p7153_p12, %p7152_p11 }
 0x65a   : > { %p7155_p0 = pnand %p7154_p13, %p7148_p8 }
 0x65c   : > { %7158 = shalt.err (!%p7155_p0)
}
 0x65d   : > { %6664 = dma.vmem_to_hbm [thread:$0]  (%p7276_p5), %s9290_s19, 32, %s9288_s23, %s5494_s24  }
 0x65e PF: > { %p6670_p1 = scmp.ge.s32.totalorder %s7193_s29, 2  ;;  %s5520_s21 = sand.u32 1, %s7181_s26  }
 0x65f   : > { %s5521_s20 = scalar_lea.sflag [#allocation4], %s5520_s21 }
 0x660   : > { %p6667_p2 = pnand %p6670_p1, %p7280_p6 }
 0x662   : > { %7176 = dma.done.wait (!%p6667_p2), %s5521_s20, 32  }
 0x663   : > { %7178 = vsyncadd (!%p6667_p2), %s5521_s20, 4294967264  ;;  %p19_p3 = scmp.ge.s32.totalorder %s7264_s8, 4   ;;  %s9514_s26 = smov %s7185_s27 }
 0x664   : > { %s9515_s27 = smov %s7189_s28  ;;  %s9516_s28 = smov %s7274_s11 }
 0x665   : > { %s9517_s29 = smov %s7264_s8  ;;  %21 = sbr.rel (!%p19_p3) target bundleno = 6 (0x6), region = 83 }
 0x66c   :  { %5526 = vsyncpa [#allocation4], 1 }
 0x66d   :  { %5528 = vsyncpa [#allocation4 + $0x1], 1 }

</bundles_post_ra>
